<compile_context>
chip_gen: v7x
topology: tpu7x:2x2x1
jax: 0.10.0
libtpu: 0.0.40
codegen_flags: <defaults>
</compile_context>

<pallas_src>
import jax
import jax.numpy as jnp
from jax.experimental import pallas as pl
from jax.experimental.pallas import tpu as pltpu


def _round_up(x, m):
    return ((x + m - 1) // m) * m


# ----------------------------------------------------------------------------
# Pallas kernel: fused classifier MLP (concat folded into split matmuls)
#   h = ReLU((txt @ W1_txt + img @ W1_img) * s1 + b1)   (bm, 1024)
#   o = ReLU((h @ W2) * s2 + b2)                        (bm, 128-padded classes)
# int8 weights are upcast to bf16 in-kernel (exact), activations cast to bf16
# in-kernel, MXU accumulates in f32, dequant scales applied in the f32 epilogue.
# ----------------------------------------------------------------------------
def _classifier_kernel(txt_ref, img_ref, w1t_ref, w1i_ref, s1_ref, b1_ref,
                       w2_ref, s2_ref, b2_ref, o_ref):
    txt = txt_ref[...].astype(jnp.bfloat16)            # (bm, 768)  f32 -> bf16
    img = img_ref[...].astype(jnp.bfloat16)            # (bm, 1000) f32 -> bf16
    w1t = w1t_ref[...].astype(jnp.bfloat16)            # int8 -> bf16 (exact)
    w1i = w1i_ref[...].astype(jnp.bfloat16)

    acc = jnp.dot(txt, w1t, preferred_element_type=jnp.float32)
    acc = acc + jnp.dot(img, w1i, preferred_element_type=jnp.float32)
    h = jnp.maximum(acc * s1_ref[...] + b1_ref[...], 0.0)      # dequant+bias+ReLU (f32)

    w2 = w2_ref[...].astype(jnp.bfloat16)
    acc2 = jnp.dot(h.astype(jnp.bfloat16), w2, preferred_element_type=jnp.float32)
    o_ref[...] = jnp.maximum(acc2 * s2_ref[...] + b2_ref[...], 0.0)


# ----------------------------------------------------------------------------
# One-time weight preparation: per-output-channel int8 quantization, W1 split
# by modality, output dim padded to a lane-dense multiple of 128.
# ----------------------------------------------------------------------------
def _quantize_per_col(w):
    amax = jnp.max(jnp.abs(w), axis=0, keepdims=True)           # (1, N)
    scale = jnp.maximum(amax, 1e-8) / 127.0
    q = jnp.clip(jnp.round(w / scale), -127.0, 127.0).astype(jnp.int8)
    return q, scale.astype(jnp.float32)


def prepare_classifier_params(w1, b1, w2, b2, txt_dim=768):
    """w1: (1768, H) f32, b1: (1, H), w2: (H, C), b2: (1, C)."""
    F, H = w1.shape
    _, C = w2.shape
    img_dim = F - txt_dim                       # 1000 (ResNet50 logits width)
    c_pad = _round_up(C, 128)                   # lane-dense output

    q1, s1 = _quantize_per_col(w1)              # shared per-column scale across modalities
    w2_p = jnp.pad(w2, ((0, 0), (0, c_pad - C)))
    q2, s2 = _quantize_per_col(w2_p)            # padded cols are zero -> q=0
    b2_p = jnp.pad(b2, ((0, 0), (0, c_pad - C)))

    return {
        "w1_txt": q1[:txt_dim],                 # (768, H)  int8
        "w1_img": q1[txt_dim:],                 # (1000, H) int8 (unpadded K)
        "s1": s1, "b1": b1,                     # (1, H) f32
        "w2": q2, "s2": s2, "b2": b2_p,         # (H, c_pad) int8 / (1, c_pad) f32
        "num_classes": C, "img_dim": img_dim, "txt_dim": txt_dim,
    }


def fusion_classifier(txt_feat, img_feat, cls):
    """txt_feat: (B, 768) f32, img_feat: (B, 1000) f32 -> (B, num_classes) f32."""
    B, txt_dim = txt_feat.shape
    img_dim = img_feat.shape[1]
    H = cls["w1_txt"].shape[1]
    c_pad = cls["w2"].shape[1]
    C = cls["num_classes"]

    # Batch tile: multiple of 8 sublanes, up to 256 MXU rows per step
    # (fills v6e/v7x's 256-row MXU; fewer, fatter grid steps).
    bm = min(256, _round_up(B, 8))
    bp = _round_up(B, bm)
    n_tiles = bp // bm

    # Only batch padding (if needed); dtype stays f32 — cast happens in-kernel.
    if bp != B:
        txt_feat = jnp.pad(txt_feat, ((0, bp - B), (0, 0)))
        img_feat = jnp.pad(img_feat, ((0, bp - B), (0, 0)))

    resident = dict(pipeline_mode=pl.Buffered(1))   # constant-index blocks: single buffer

    flops = 2 * bp * (txt_dim * H + img_dim * H + H * c_pad)
    bytes_accessed = (
        bp * (txt_dim + img_dim) * 4                # f32 activations in
        + (txt_dim + img_dim) * H + H * c_pad       # int8 weights
        + (2 * H + 2 * c_pad) * 4                   # f32 scales + biases
        + bp * c_pad * 4                            # f32 output
    )

    out = pl.pallas_call(
        _classifier_kernel,
        out_shape=jax.ShapeDtypeStruct((bp, c_pad), jnp.float32),
        grid=(n_tiles,),
        in_specs=[
            pl.BlockSpec((bm, txt_dim), lambda i: (i, 0)),                 # txt tile (f32)
            pl.BlockSpec((bm, img_dim), lambda i: (i, 0)),                 # img tile (f32, K=1000)
            pl.BlockSpec((txt_dim, H), lambda i: (0, 0), **resident),      # W1_txt int8
            pl.BlockSpec((img_dim, H), lambda i: (0, 0), **resident),      # W1_img int8
            pl.BlockSpec((1, H), lambda i: (0, 0), **resident),            # s1
            pl.BlockSpec((1, H), lambda i: (0, 0), **resident),            # b1
            pl.BlockSpec((H, c_pad), lambda i: (0, 0), **resident),        # W2 int8
            pl.BlockSpec((1, c_pad), lambda i: (0, 0), **resident),        # s2
            pl.BlockSpec((1, c_pad), lambda i: (0, 0), **resident),        # b2
        ],
        out_specs=pl.BlockSpec((bm, c_pad), lambda i: (i, 0)),             # lane-dense out
        compiler_params=pltpu.CompilerParams(
            # Single-tile grids stay on one core (avoid duplicating the
            # weight DMA across v7x's two TensorCores); multi-tile grids
            # split the batch.
            dimension_semantics=("arbitrary",) if n_tiles == 1 else ("parallel",),
            vmem_limit_bytes=32 * 1024 * 1024,
        ),
        cost_estimate=pl.CostEstimate(
            flops=flops, transcendentals=0, bytes_accessed=bytes_accessed),
    )(txt_feat, img_feat,
      cls["w1_txt"], cls["w1_img"], cls["s1"], cls["b1"],
      cls["w2"], cls["s2"], cls["b2"])

    return out[:B, :C]


# ----------------------------------------------------------------------------
# Deterministic stand-in feature extractors (plain JAX glue).
# TODO(synk): replace with real ResNet50 / BERT forward passes when weights
#             are available; only output shapes/dtypes are matched here.
# ----------------------------------------------------------------------------
def image_features_standin(image, w_img, b_img):
    # image: (B, 3, H, W) NCHW -> global average pool over (H, W) -> (B, 3)
    pooled = jnp.mean(image, axis=(2, 3))
    return pooled @ w_img + b_img                      # (B, 1000)


def text_features_standin(input_ids, attention_mask, emb_table, w_pool, b_pool):
    emb = jnp.take(emb_table, input_ids, axis=0)       # (B, S, 768)
    mask = attention_mask.astype(jnp.float32)[..., None]
    summed = jnp.sum(emb * mask, axis=1)
    denom = jnp.maximum(jnp.sum(mask, axis=1), 1.0)
    mean = summed / denom                              # (B, 768)
    return jnp.tanh(mean @ w_pool + b_pool)            # BERT-pooler-style (B, 768)


# ----------------------------------------------------------------------------
# Full model forward
# ----------------------------------------------------------------------------
def fusion_model_forward(image, input_ids, attention_mask, params):
    img_feat = image_features_standin(image, params["w_img"], params["b_img"])
    txt_feat = text_features_standin(
        input_ids, attention_mask, params["emb"], params["w_pool"], params["b_pool"]
    )
    # concat([txt, img]) @ W1 is computed inside the kernel as split matmuls;
    # dropout(p=0.5) layers are identity at inference time.
    return fusion_classifier(txt_feat, img_feat, params["cls"])


def init_params(key, num_classes):
    ks = jax.random.split(key, 8)
    f32 = jnp.float32
    # Reference f32 classifier weights (PyTorch layout: Linear(1768,1024), Linear(1024,C)).
    w1 = jax.random.normal(ks[4], (1768, 1024), f32) * 0.02
    b1 = jax.random.normal(ks[5], (1, 1024), f32) * 0.01
    w2 = jax.random.normal(ks[6], (1024, num_classes), f32) * 0.02
    b2 = jax.random.normal(ks[7], (1, num_classes), f32) * 0.01
    return {
        # stand-in image head: 3 -> 1000
        "w_img": jax.random.normal(ks[0], (3, 1000), f32) * 0.05,
        "b_img": jax.random.normal(ks[1], (1000,), f32) * 0.01,
        # stand-in text encoder: vocab 128 -> 768, pooler 768 -> 768
        "emb": jax.random.normal(ks[2], (128, 768), f32) * 0.05,
        "w_pool": jax.random.normal(ks[3], (768, 768), f32) * 0.02,
        "b_pool": jnp.zeros((768,), f32),
        # pre-split / int8-quantized / padded classifier weights (prepared once)
        "cls": prepare_classifier_params(w1, b1, w2, b2),
    }


if __name__ == "__main__":
    key = jax.random.PRNGKey(0)
    k_img, k_ids, k_param = jax.random.split(key, 3)

    B, S, num_classes = 2, 8, 16
    image = jax.random.normal(k_img, (B, 3, 16, 16), jnp.float32)     # NCHW
    input_ids = jax.random.randint(k_ids, (B, S), 0, 128, jnp.int32)
    attention_mask = jnp.ones((B, S), jnp.int32)

    params = init_params(k_param, num_classes)

    out = fusion_model_forward(image, input_ids, attention_mask, params)
    out = jax.block_until_ready(out)

    assert out.shape == (B, num_classes), out.shape
    assert out.dtype == jnp.float32
    assert bool(jnp.all(out >= 0.0))  # final ReLU
    assert bool(jnp.all(jnp.isfinite(out)))

    print("KERNEL_OK")
</pallas_src>

<mosaic_0001>
module attributes {stable_mosaic.version = 11 : i64} {
  func.func @_classifier_kernel(%arg0: i32, %arg1: memref<8x768xf32, #tpu.memory_space<vmem>>, %arg2: memref<8x1000xf32, #tpu.memory_space<vmem>>, %arg3: memref<768x1024xi8, #tpu.memory_space<vmem>>, %arg4: memref<1000x1024xi8, #tpu.memory_space<vmem>>, %arg5: memref<1x1024xf32, #tpu.memory_space<vmem>>, %arg6: memref<1x1024xf32, #tpu.memory_space<vmem>>, %arg7: memref<1024x128xi8, #tpu.memory_space<vmem>>, %arg8: memref<1x128xf32, #tpu.memory_space<vmem>>, %arg9: memref<1x128xf32, #tpu.memory_space<vmem>>, %arg10: memref<8x128xf32, #tpu.memory_space<vmem>>) attributes {dimension_semantics = [#tpu.dimension_semantics<arbitrary>], iteration_bounds = array<i64: 1>, scalar_prefetch = 0 : i64, scratch_operands = 0 : i64, tpu.core_type = #tpu.core_type<tc>, window_params = [{transform_indices = @transform_0, window_bounds = array<i64: 8, 768>}, {transform_indices = @transform_1, window_bounds = array<i64: 8, 1000>}, {pipeline_mode = #tpu.pipeline_mode<synchronous>, transform_indices = @transform_2, window_bounds = array<i64: 768, 1024>}, {pipeline_mode = #tpu.pipeline_mode<synchronous>, transform_indices = @transform_3, window_bounds = array<i64: 1000, 1024>}, {pipeline_mode = #tpu.pipeline_mode<synchronous>, transform_indices = @transform_4, window_bounds = array<i64: 1, 1024>}, {pipeline_mode = #tpu.pipeline_mode<synchronous>, transform_indices = @transform_5, window_bounds = array<i64: 1, 1024>}, {pipeline_mode = #tpu.pipeline_mode<synchronous>, transform_indices = @transform_6, window_bounds = array<i64: 1024, 128>}, {pipeline_mode = #tpu.pipeline_mode<synchronous>, transform_indices = @transform_7, window_bounds = array<i64: 1, 128>}, {pipeline_mode = #tpu.pipeline_mode<synchronous>, transform_indices = @transform_8, window_bounds = array<i64: 1, 128>}, {transform_indices = @transform_9, window_bounds = array<i64: 8, 128>}]} {
    %c0 = arith.constant 0 : index
    %c0_0 = arith.constant 0 : index
    %0 = vector.load %arg1[%c0, %c0_0] : memref<8x768xf32, #tpu.memory_space<vmem>>, vector<8x768xf32>
    %1 = arith.truncf %0 : vector<8x768xf32> to vector<8x768xbf16>
    %c0_1 = arith.constant 0 : index
    %c0_2 = arith.constant 0 : index
    %2 = vector.load %arg2[%c0_1, %c0_2] : memref<8x1000xf32, #tpu.memory_space<vmem>>, vector<8x1000xf32>
    %3 = arith.truncf %2 : vector<8x1000xf32> to vector<8x1000xbf16>
    %c0_3 = arith.constant 0 : index
    %c0_4 = arith.constant 0 : index
    %4 = vector.load %arg3[%c0_3, %c0_4] : memref<768x1024xi8, #tpu.memory_space<vmem>>, vector<768x1024xi8>
    %5 = arith.sitofp %4 : vector<768x1024xi8> to vector<768x1024xbf16>
    %c0_5 = arith.constant 0 : index
    %c0_6 = arith.constant 0 : index
    %6 = vector.load %arg4[%c0_5, %c0_6] : memref<1000x1024xi8, #tpu.memory_space<vmem>>, vector<1000x1024xi8>
    %7 = arith.sitofp %6 : vector<1000x1024xi8> to vector<1000x1024xbf16>
    %cst = arith.constant dense<0.000000e+00> : vector<8x1024xf32>
    %8 = tpu.matmul %1, %5, %cst {dimension_numbers = #tpu.dot_dimension_numbers<[1], [0], [0], [1], [0, 0, 1, 1], [], []>} : vector<8x768xbf16>, vector<768x1024xbf16>, vector<8x1024xf32> -> vector<8x1024xf32>
    %cst_7 = arith.constant dense<0.000000e+00> : vector<8x1024xf32>
    %9 = tpu.matmul %3, %7, %cst_7 {dimension_numbers = #tpu.dot_dimension_numbers<[1], [0], [0], [1], [0, 0, 1, 1], [], []>} : vector<8x1000xbf16>, vector<1000x1024xbf16>, vector<8x1024xf32> -> vector<8x1024xf32>
    %10 = arith.addf %8, %9 : vector<8x1024xf32>
    %c0_8 = arith.constant 0 : index
    %c0_9 = arith.constant 0 : index
    %11 = vector.load %arg5[%c0_8, %c0_9] : memref<1x1024xf32, #tpu.memory_space<vmem>>, vector<1x1024xf32>
    %12 = vector.broadcast %11 : vector<1x1024xf32> to vector<8x1024xf32>
    %13 = arith.mulf %10, %12 : vector<8x1024xf32>
    %c0_10 = arith.constant 0 : index
    %c0_11 = arith.constant 0 : index
    %14 = vector.load %arg6[%c0_10, %c0_11] : memref<1x1024xf32, #tpu.memory_space<vmem>>, vector<1x1024xf32>
    %15 = vector.broadcast %14 : vector<1x1024xf32> to vector<8x1024xf32>
    %16 = arith.addf %13, %15 : vector<8x1024xf32>
    %cst_12 = arith.constant 0.000000e+00 : f32
    %17 = vector.broadcast %cst_12 : f32 to vector<8x1024xf32>
    %18 = arith.maximumf %16, %17 : vector<8x1024xf32>
    %c0_13 = arith.constant 0 : index
    %c0_14 = arith.constant 0 : index
    %19 = vector.load %arg7[%c0_13, %c0_14] : memref<1024x128xi8, #tpu.memory_space<vmem>>, vector<1024x128xi8>
    %20 = arith.sitofp %19 : vector<1024x128xi8> to vector<1024x128xbf16>
    %21 = arith.truncf %18 : vector<8x1024xf32> to vector<8x1024xbf16>
    %cst_15 = arith.constant dense<0.000000e+00> : vector<8x128xf32>
    %22 = tpu.matmul %21, %20, %cst_15 {dimension_numbers = #tpu.dot_dimension_numbers<[1], [0], [0], [1], [0, 0, 1, 1], [], []>} : vector<8x1024xbf16>, vector<1024x128xbf16>, vector<8x128xf32> -> vector<8x128xf32>
    %c0_16 = arith.constant 0 : index
    %c0_17 = arith.constant 0 : index
    %23 = vector.load %arg8[%c0_16, %c0_17] : memref<1x128xf32, #tpu.memory_space<vmem>>, vector<1x128xf32>
    %24 = vector.broadcast %23 : vector<1x128xf32> to vector<8x128xf32>
    %25 = arith.mulf %22, %24 : vector<8x128xf32>
    %c0_18 = arith.constant 0 : index
    %c0_19 = arith.constant 0 : index
    %26 = vector.load %arg9[%c0_18, %c0_19] : memref<1x128xf32, #tpu.memory_space<vmem>>, vector<1x128xf32>
    %27 = vector.broadcast %26 : vector<1x128xf32> to vector<8x128xf32>
    %28 = arith.addf %25, %27 : vector<8x128xf32>
    %cst_20 = arith.constant 0.000000e+00 : f32
    %29 = vector.broadcast %cst_20 : f32 to vector<8x128xf32>
    %30 = arith.maximumf %28, %29 : vector<8x128xf32>
    %c0_21 = arith.constant 0 : index
    %c0_22 = arith.constant 0 : index
    %31 = vector.load %arg10[%c0_21, %c0_22] : memref<8x128xf32, #tpu.memory_space<vmem>>, vector<8x128xf32>
    tpu.vector_store %arg10[%c0_21, %c0_22], %30 {strides = array<i32>} : memref<8x128xf32, #tpu.memory_space<vmem>>, vector<8x128xf32>,
    return
  }
  func.func @transform_0(%arg0: i32) -> (i32, i32) {
    %c0_i32 = arith.constant 0 : i32
    %c0_i32_0 = arith.constant 0 : i32
    return %arg0, %c0_i32 : i32, i32
  }
  func.func @transform_1(%arg0: i32) -> (i32, i32) {
    %c0_i32 = arith.constant 0 : i32
    %c0_i32_0 = arith.constant 0 : i32
    return %arg0, %c0_i32 : i32, i32
  }
  func.func @transform_2(%arg0: i32) -> (i32, i32) {
    %c0_i32 = arith.constant 0 : i32
    %c0_i32_0 = arith.constant 0 : i32
    %c0_i32_1 = arith.constant 0 : i32
    return %c0_i32, %c0_i32_0 : i32, i32
  }
  func.func @transform_3(%arg0: i32) -> (i32, i32) {
    %c0_i32 = arith.constant 0 : i32
    %c0_i32_0 = arith.constant 0 : i32
    %c0_i32_1 = arith.constant 0 : i32
    return %c0_i32, %c0_i32_0 : i32, i32
  }
  func.func @transform_4(%arg0: i32) -> (i32, i32) {
    %c0_i32 = arith.constant 0 : i32
    %c0_i32_0 = arith.constant 0 : i32
    %c0_i32_1 = arith.constant 0 : i32
    return %c0_i32, %c0_i32_0 : i32, i32
  }
  func.func @transform_5(%arg0: i32) -> (i32, i32) {
    %c0_i32 = arith.constant 0 : i32
    %c0_i32_0 = arith.constant 0 : i32
    %c0_i32_1 = arith.constant 0 : i32
    return %c0_i32, %c0_i32_0 : i32, i32
  }
  func.func @transform_6(%arg0: i32) -> (i32, i32) {
    %c0_i32 = arith.constant 0 : i32
    %c0_i32_0 = arith.constant 0 : i32
    %c0_i32_1 = arith.constant 0 : i32
    return %c0_i32, %c0_i32_0 : i32, i32
  }
  func.func @transform_7(%arg0: i32) -> (i32, i32) {
    %c0_i32 = arith.constant 0 : i32
    %c0_i32_0 = arith.constant 0 : i32
    %c0_i32_1 = arith.constant 0 : i32
    return %c0_i32, %c0_i32_0 : i32, i32
  }
  func.func @transform_8(%arg0: i32) -> (i32, i32) {
    %c0_i32 = arith.constant 0 : i32
    %c0_i32_0 = arith.constant 0 : i32
    %c0_i32_1 = arith.constant 0 : i32
    return %c0_i32, %c0_i32_0 : i32, i32
  }
  func.func @transform_9(%arg0: i32) -> (i32, i32) {
    %c0_i32 = arith.constant 0 : i32
    %c0_i32_0 = arith.constant 0 : i32
    return %arg0, %c0_i32 : i32, i32
  }
}

</mosaic_0001>

<bundles_post_ra>
// kernel: tpu_custom_call.1
= control target key start
LH: loop header
LB: loop body
LE: loop exit
PB: predicated region body
PF: predicated region fallthrough
CT: control target
= control target key end

     0   :  { %14 = vsyncpa [#allocation3], 0  ;;  %s6672_s0 = inlined_call_operand.hbm [shape: f32[8,768], index: 0, kind: input, shape index: {}]   ;;  %s6673_s1 = inlined_call_operand.hbm [shape: f32[8,1000], index: 1, kind: input, shape index: {}]   ;;  %s6674_s2 = inlined_call_operand.hbm [shape: s8[768,1024], index: 2, kind: input, shape index: {}]   ;;  %s6675_s3 = inlined_call_operand.hbm [shape: s8[1000,1024], index: 3, kind: input, shape index: {}]   ;;  %s6676_s4 = inlined_call_operand.vmem [shape: f32[1,1024], index: 4, kind: input, shape index: {}]   ;;  %s6677_s5 = inlined_call_operand.vmem [shape: f32[1,1024], index: 5, kind: input, shape index: {}]   ;;  %s6678_s6 = inlined_call_operand.hbm [shape: s8[1024,128], index: 6, kind: input, shape index: {}]   ;;  %s6679_s7 = inlined_call_operand.vmem [shape: f32[1,128], index: 7, kind: input, shape index: {}]   ;;  %s6680_s8 = inlined_call_operand.vmem [shape: f32[1,128], index: 8, kind: input, shape index: {}]   ;;  %s6681_s9 = inlined_call_operand.hbm [shape: f32[8,128], index: 9, kind: output, shape index: {}]  }
   0x1   :  { %15 = vsyncpa [#allocation6], 0 }
   0x2   :  { %16 = vsyncpa [#allocation9], 0 }
   0x3   :  { %17 = vsyncpa [#allocation4], 0  ;;  %s6386_s30 = smov [#allocation5]   ;;  %s6387_s11 = smov [#allocation8]  }
   0x4   :  { %s34_s10 = sshll.u32 %s6386_s30, 4  ;;  %s55_s12 = sshll.u32 %s6387_s11, 4  ;;  %s35_s10 = int_to_ptr.vmem [resolvable:$true] %s34_s10  ;;  %s6448_s12 = int_to_ptr.vmem [resolvable:$true] %s55_s12 }
   0x5   :  { %s6246_s15 = scalar_lea.hbm %s6673_s1, 1024 }
   0x6   :  { %p6247_p0 = scmp.ne.s32.totalorder %s6673_s1, %s6246_s15  ;;  %p6250_p1 = scmp.lt.u32.totalorder %s6246_s15, %s6673_s1 }
   0x8   :  { %p6252_p2 = pnand %p6250_p1, %p6247_p0 }
   0xa   :  { %6255 = shalt.err (!%p6252_p2)
}
   0xb   :  { %s6256_s20 = scalar_lea.vmem %s35_s10, 1024  ;;  %p6261_p4 = scmp.lt.s32.totalorder %s35_s10, %s35_s10 }
   0xc   :  { %p6257_p3 = scmp.ne.s32.totalorder %s35_s10, %s6256_s20  ;;  %p6262_p5 = scmp.lt.s32.totalorder %s6256_s20, %s6256_s20 }
   0xe   :  { %p6263_p6 = por %p6262_p5, %p6261_p4 }
  0x10   :  { %p6264_p7 = pnand %p6263_p6, %p6257_p3 }
  0x12   :  { %6267 = shalt.err (!%p6264_p7)
}
  0x13   :  { %37 = dma.hbm_to_vmem [thread:$0]  %s6673_s1, 1024, %s35_s10, [#allocation6]  }
  0x14   :  { %s6268_s25 = scalar_lea.hbm %s6675_s3, 32000 }
  0x15   :  { %p6269_p8 = scmp.ne.s32.totalorder %s6675_s3, %s6268_s25  ;;  %p6272_p9 = scmp.lt.u32.totalorder %s6268_s25, %s6675_s3 }
  0x17   :  { %p6274_p10 = pnand %p6272_p9, %p6269_p8 }
  0x19   :  { %6277 = shalt.err (!%p6274_p10)
}
  0x1a   :  { %s6278_s30 = scalar_lea.vmem %s6448_s12, 32000  ;;  %p6283_p12 = scmp.lt.s32.totalorder %s6448_s12, %s6448_s12 }
  0x1b   :  { %p6279_p11 = scmp.ne.s32.totalorder %s6448_s12, %s6278_s30  ;;  %p6284_p13 = scmp.lt.s32.totalorder %s6278_s30, %s6278_s30 }
  0x1d   :  { %p6285_p0 = por %p6284_p13, %p6283_p12 }
  0x1f   :  { %p6286_p1 = pnand %p6285_p0, %p6279_p11 }
  0x21   :  { %6289 = shalt.err (!%p6286_p1)
}
  0x22   :  { %s6388_s1 = smov 256   ;;  %s6389_s10 = smov 16  }
  0x23   :  { %61 = dma.hbm_to_vmem [thread:$0]  %s6675_s3, 32000, %s6448_s12, [#allocation9], %s6388_s1, %s6388_s1, %s6389_s10  }
  0x24   :  { %s6390_s14 = smov [#allocation2]   ;;  %s6391_s16 = smov [#allocation7]  }
  0x25   :  { %s24_s15 = sshll.u32 %s6390_s14, 4  ;;  %s43_s17 = sshll.u32 %s6391_s16, 4  ;;  %s25_s15 = int_to_ptr.vmem [resolvable:$true] %s24_s15  ;;  %s6479_s17 = int_to_ptr.vmem [resolvable:$true] %s43_s17 }
  0x26   :  { %s6290_s20 = scalar_lea.hbm %s6672_s0, 768 }
  0x27   :  { %p6291_p2 = scmp.ne.s32.totalorder %s6672_s0, %s6290_s20  ;;  %p6294_p3 = scmp.lt.u32.totalorder %s6290_s20, %s6672_s0 }
  0x29   :  { %p6296_p4 = pnand %p6294_p3, %p6291_p2 }
  0x2b   :  { %6299 = shalt.err (!%p6296_p4)
}
  0x2c   :  { %s6300_s3 = scalar_lea.vmem %s25_s15, 768  ;;  %p6305_p6 = scmp.lt.s32.totalorder %s25_s15, %s25_s15 }
  0x2d   :  { %p6301_p5 = scmp.ne.s32.totalorder %s25_s15, %s6300_s3  ;;  %p6306_p7 = scmp.lt.s32.totalorder %s6300_s3, %s6300_s3 }
  0x2f   :  { %p6307_p8 = por %p6306_p7, %p6305_p6 }
  0x31   :  { %p6308_p9 = pnand %p6307_p8, %p6301_p5 }
  0x33   :  { %6311 = shalt.err (!%p6308_p9)
}
  0x34   :  { %27 = dma.hbm_to_vmem [thread:$0]  %s6672_s0, 768, %s25_s15, [#allocation3]  }
  0x35   :  { %s6312_s28 = scalar_lea.hbm %s6674_s2, 24576 }
  0x36   :  { %p6313_p10 = scmp.ne.s32.totalorder %s6674_s2, %s6312_s28  ;;  %p6316_p11 = scmp.lt.u32.totalorder %s6312_s28, %s6674_s2 }
  0x38   :  { %p6318_p12 = pnand %p6316_p11, %p6313_p10 }
  0x3a   :  { %6321 = shalt.err (!%p6318_p12)
}
  0x3b   :  { %s6322_s11 = scalar_lea.vmem %s6479_s17, 24576  ;;  %p6327_p0 = scmp.lt.s32.totalorder %s6479_s17, %s6479_s17 }
  0x3c   :  { %p6323_p13 = scmp.ne.s32.totalorder %s6479_s17, %s6322_s11  ;;  %p6328_p1 = scmp.lt.s32.totalorder %s6322_s11, %s6322_s11 }
  0x3e   :  { %p6329_p2 = por %p6328_p1, %p6327_p0 }
  0x40   :  { %p6330_p3 = pnand %p6329_p2, %p6323_p13 }
  0x42   :  { %6333 = shalt.err (!%p6330_p3)
}
  0x43   :  { %s6392_s0 = smov 1024   ;;  %s6393_s13 = smov 64  }
  0x44   :  { %49 = dma.hbm_to_vmem [thread:$0]  %s6674_s2, 24576, %s6479_s17, [#allocation6], %s6392_s0, %s6392_s0, %s6393_s13  }
  0x45   :  { %s6394_s16 = smov [#allocation10]   ;;  %s6334_s21 = scalar_lea.hbm %s6678_s6, 4096 }
  0x46   :  { %s71_s18 = sshll.u32 %s6394_s16, 4  ;;  %p6335_p4 = scmp.ne.s32.totalorder %s6678_s6, %s6334_s21  ;;  %s72_s18 = int_to_ptr.vmem [resolvable:$true] %s71_s18 }
  0x47   :  { %p6338_p5 = scmp.lt.u32.totalorder %s6334_s21, %s6678_s6 }
  0x49   :  { %p6340_p6 = pnand %p6338_p5, %p6335_p4 }
  0x4b   :  { %6343 = shalt.err (!%p6340_p6)
}
  0x4c   :  { %s6344_s12 = scalar_lea.vmem %s72_s18, 4096  ;;  %p6349_p8 = scmp.lt.s32.totalorder %s72_s18, %s72_s18 }
  0x4d   :  { %p6345_p7 = scmp.ne.s32.totalorder %s72_s18, %s6344_s12  ;;  %p6350_p9 = scmp.lt.s32.totalorder %s6344_s12, %s6344_s12 }
  0x4f   :  { %p6351_p10 = por %p6350_p9, %p6349_p8 }
  0x51   :  { %p6352_p11 = pnand %p6351_p10, %p6345_p7 }
  0x53   :  { %6355 = shalt.err (!%p6352_p11)
}
  0x54   :  { %s6395_s2 = smov 128   ;;  %s6396_s17 = smov 8  }
  0x55   :  { %77 = dma.hbm_to_vmem [thread:$0]  %s6678_s6, 4096, %s72_s18, [#allocation9], %s6395_s2, %s6395_s2, %s6396_s17  }
  0x56   :  { %6378 = dma.done.wait [#allocation3], 768  }
  0x57   :  { %6379 = vsyncadd [#allocation3], 4294966528 }
  0x58   :  { %6380 = dma.done.wait [#allocation6], 25600  }
  0x59   :  { %6381 = vsyncadd [#allocation6], 4294941696 }
  0x5a   :  { %6382 = dma.done.wait [#allocation9], 36096  }
  0x5b   :  { %6383 = vsyncadd [#allocation9], 4294931200  ;;  %v702_v0 = vld [vmem:[#allocation8] sm:$0xff]  ;;  %v704_v1 = vld [vmem:[#allocation8 + $0x10] sm:$0xff]  ;;  %vm3952_vm0 = vcmask 850944   ;;  %vm3956_vm1 = vcmask 1043456  }
  0x5c   :  { %v706_v2 = vld [vmem:[#allocation8 + $0x20] sm:$0xff]  ;;  %v952_v3 = vunpack.c.l.s8.bf16 %v702_v0  ;;  %v956_v4 = vunpack.c.l.s8.bf16 %v704_v1  ;;  %v953_v5 = vunpack.c.h.s8.bf16 %v702_v0  ;;  %v957_v6 = vunpack.c.h.s8.bf16 %v704_v1  ;;  %v708_v7 = vld [vmem:[#allocation8 + $0x30] sm:$0xff]  ;;  %s6397_s10 = smov [#allocation11]  }
  0x5d   :  { %v960_v8 = vunpack.c.l.s8.bf16 %v706_v2  ;;  %v964_v9 = vunpack.c.l.s8.bf16 %v708_v7  ;;  %v961_v10 = vunpack.c.h.s8.bf16 %v706_v2  ;;  %v965_v11 = vunpack.c.h.s8.bf16 %v708_v7  ;;  %v710_v12 = vld [vmem:[#allocation8 + $0x40] sm:$0xff]  ;;  %v712_v13 = vld [vmem:[#allocation8 + $0x50] sm:$0xff]  ;;  %s5525_s11 = sshll.u32 %s6397_s10, 4  ;;  %s5526_s11 = int_to_ptr.vmem [resolvable:$true] %s5525_s11 }
  0x5e   :  { %v5537_v14 = vcombine.high %v952_v3, %v956_v4  ;;  %v5539_v15 = vcombine.high %v953_v5, %v957_v6  ;;  %v5536_v16 = vcombine.low %v952_v3, %v956_v4  ;;  %v5538_v17 = vcombine.low %v953_v5, %v957_v6  ;;  %v714_v18 = vld [vmem:[#allocation8 + $0x60] sm:$0xff]  ;;  %v716_v19 = vld [vmem:[#allocation8 + $0x70] sm:$0xff]  ;;  %s6356_s0 = scalar_lea.vmem %s5526_s11, 128  ;;  %p6361_p13 = scmp.lt.s32.totalorder %s5526_s11, %s5526_s11 }
  0x5f   :  { %v5545_v20 = vcombine.high %v960_v8, %v964_v9  ;;  %v5547_v21 = vcombine.high %v961_v10, %v965_v11  ;;  %v968_v22 = vunpack.c.l.s8.bf16 %v710_v12  ;;  %v972_v23 = vunpack.c.l.s8.bf16 %v712_v13  ;;  %v718_v34 = vld [vmem:[#allocation8 + $0x80] sm:$0xff]  ;;  %v720_v35 = vld [vmem:[#allocation8 + $0x90] sm:$0xff]  ;;  %p6357_p12 = scmp.ne.s32.totalorder %s5526_s11, %s6356_s0  ;;  %p6362_p0 = scmp.lt.s32.totalorder %s6356_s0, %s6356_s0 }
  0x60   :  { %3981 = vmatprep.subr.bf16.mxu0 %v5537_v14  ;;  %4145 = vmatprep.subr.bf16.mxu1 %v5539_v15  ;;  %v969_v24 = vunpack.c.h.s8.bf16 %v710_v12  ;;  %v973_v25 = vunpack.c.h.s8.bf16 %v712_v13  ;;  %v5544_v26 = vcombine.low %v960_v8, %v964_v9  ;;  %v5546_v27 = vcombine.low %v961_v10, %v965_v11  ;;  %v722_v44 = vld [vmem:[#allocation8 + $0xa0] sm:$0xff]  ;;  %v724_v45 = vld [vmem:[#allocation8 + $0xb0] sm:$0xff] }
  0x61   :  { %3982 = vmatpush1.bf16.msra.mxu0 %v5536_v16  ;;  %4146 = vmatpush1.bf16.msra.mxu1 %v5538_v17  ;;  %v976_v28 = vunpack.c.l.s8.bf16 %v714_v18  ;;  %v980_v29 = vunpack.c.l.s8.bf16 %v716_v19  ;;  %v5553_v30 = vcombine.high %v968_v22, %v972_v23  ;;  %v977_v32 = vunpack.c.h.s8.bf16 %v714_v18  ;;  %v726_v54 = vld [vmem:[#allocation8 + $0xc0] sm:$0xff]  ;;  %v728_v55 = vld [vmem:[#allocation8 + $0xd0] sm:$0xff]  ;;  %p6363_p1 = por %p6362_p0, %p6361_p13 }
  0x62   :  { %3983 = vmatprep.subr.bf16.mxu0 %v5545_v20  ;;  %4147 = vmatprep.subr.bf16.mxu1 %v5547_v21  ;;  %v5555_v31 = vcombine.high %v969_v24, %v973_v25  ;;  %v981_v33 = vunpack.c.h.s8.bf16 %v716_v19  ;;  %v5552_v36 = vcombine.low %v968_v22, %v972_v23  ;;  %v5554_v37 = vcombine.low %v969_v24, %v973_v25  ;;  %v730_v0 = vld [vmem:[#allocation8 + $0xe0] sm:$0xff]  ;;  %v732_v1 = vld [vmem:[#allocation8 + $0xf0] sm:$0xff] }
  0x63   :  { %v5561_v38 = vcombine.high %v976_v28, %v980_v29  ;;  %v984_v39 = vunpack.c.l.s8.bf16 %v718_v34  ;;  %v988_v41 = vunpack.c.l.s8.bf16 %v720_v35  ;;  %v985_v42 = vunpack.c.h.s8.bf16 %v718_v34  ;;  %v734_v10 = vld [vmem:[#allocation8 + $0x100] sm:$0xff]  ;;  %v736_v11 = vld [vmem:[#allocation8 + $0x110] sm:$0xff]  ;;  %p6364_p2 = pnand %p6363_p1, %p6357_p12 }
  0x64   :  { %v5563_v40 = vcombine.high %v977_v32, %v981_v33  ;;  %v989_v43 = vunpack.c.h.s8.bf16 %v720_v35  ;;  %v5560_v46 = vcombine.low %v976_v28, %v980_v29  ;;  %v5562_v47 = vcombine.low %v977_v32, %v981_v33  ;;  %v738_v20 = vld [vmem:[#allocation8 + $0x120] sm:$0xff]  ;;  %v740_v21 = vld [vmem:[#allocation8 + $0x130] sm:$0xff] }
  0x65   :  { %3984 = vmatpush1.bf16.msra.mxu0 %v5544_v26  ;;  %4148 = vmatpush1.bf16.msra.mxu1 %v5546_v27  ;;  %v992_v48 = vunpack.c.l.s8.bf16 %v722_v44  ;;  %v996_v49 = vunpack.c.l.s8.bf16 %v724_v45  ;;  %v5569_v50 = vcombine.high %v984_v39, %v988_v41  ;;  %v993_v52 = vunpack.c.h.s8.bf16 %v722_v44  ;;  %v111_v26 = vld [vmem:[#allocation5 + $0x8] sm:$0xff]  ;;  %v744_v32 = vld [vmem:[#allocation8 + $0x150] sm:$0xff] }
  0x66   :  { %3985 = vmatprep.subr.bf16.mxu0 %v5553_v30  ;;  %4149 = vmatprep.subr.bf16.mxu1 %v5555_v31  ;;  %v5571_v51 = vcombine.high %v985_v42, %v989_v43  ;;  %v997_v53 = vunpack.c.h.s8.bf16 %v724_v45  ;;  %v5568_v56 = vcombine.low %v984_v39, %v988_v41  ;;  %v5570_v57 = vcombine.low %v985_v42, %v989_v43  ;;  %v742_v31 = vld [vmem:[#allocation8 + $0x140] sm:$0xff]  ;;  %v748_v43 = vld [vmem:[#allocation8 + $0x170] sm:$0xff] }
  0x67   :  { %v5577_v58 = vcombine.high %v992_v48, %v996_v49  ;;  %v1000_v59 = vunpack.c.l.s8.bf16 %v726_v54  ;;  %v1004_v61 = vunpack.c.l.s8.bf16 %v728_v55  ;;  %v1001_v62 = vunpack.c.h.s8.bf16 %v726_v54  ;;  %v746_v42 = vld [vmem:[#allocation8 + $0x160] sm:$0xff] }
  0x68   :  { %v5579_v60 = vcombine.high %v993_v52, %v997_v53  ;;  %v1005_v63 = vunpack.c.h.s8.bf16 %v728_v55  ;;  %v5576_v2 = vcombine.low %v992_v48, %v996_v49  ;;  %v5578_v3 = vcombine.low %v993_v52, %v997_v53  ;;  %v750_v52 = vld [vmem:[#allocation8 + $0x180] sm:$0xff]  ;;  %v752_v53 = vld [vmem:[#allocation8 + $0x190] sm:$0xff] }
  0x69   :  { %3986 = vmatpush1.bf16.msra.mxu0 %v5552_v36  ;;  %4150 = vmatpush1.bf16.msra.mxu1 %v5554_v37  ;;  %v1008_v4 = vunpack.c.l.s8.bf16 %v730_v0  ;;  %v1012_v5 = vunpack.c.l.s8.bf16 %v732_v1  ;;  %v5585_v6 = vcombine.high %v1000_v59, %v1004_v61  ;;  %v1009_v8 = vunpack.c.h.s8.bf16 %v730_v0 }
  0x6a   :  { %3987 = vmatprep.subr.bf16.mxu0 %v5561_v38  ;;  %4151 = vmatprep.subr.bf16.mxu1 %v5563_v40  ;;  %v5587_v7 = vcombine.high %v1001_v62, %v1005_v63  ;;  %v1013_v9 = vunpack.c.h.s8.bf16 %v732_v1  ;;  %v5584_v12 = vcombine.low %v1000_v59, %v1004_v61  ;;  %v5586_v13 = vcombine.low %v1001_v62, %v1005_v63  ;;  %v754_v62 = vld [vmem:[#allocation8 + $0x1a0] sm:$0xff]  ;;  %v756_v63 = vld [vmem:[#allocation8 + $0x1b0] sm:$0xff] }
  0x6b   :  { %v5593_v14 = vcombine.high %v1008_v4, %v1012_v5  ;;  %v1016_v15 = vunpack.c.l.s8.bf16 %v734_v10  ;;  %v1020_v17 = vunpack.c.l.s8.bf16 %v736_v11  ;;  %v1017_v18 = vunpack.c.h.s8.bf16 %v734_v10 }
  0x6c   :  { %v5595_v16 = vcombine.high %v1009_v8, %v1013_v9  ;;  %v1021_v19 = vunpack.c.h.s8.bf16 %v736_v11  ;;  %v5592_v22 = vcombine.low %v1008_v4, %v1012_v5  ;;  %v5594_v23 = vcombine.low %v1009_v8, %v1013_v9  ;;  %v758_v8 = vld [vmem:[#allocation8 + $0x1c0] sm:$0xff]  ;;  %v760_v9 = vld [vmem:[#allocation8 + $0x1d0] sm:$0xff] }
  0x6d   :  { %3988 = vmatpush1.bf16.msra.mxu0 %v5560_v46  ;;  %4152 = vmatpush1.bf16.msra.mxu1 %v5562_v47  ;;  %v1024_v24 = vunpack.c.l.s8.bf16 %v738_v20  ;;  %v1028_v25 = vunpack.c.l.s8.bf16 %v740_v21  ;;  %v5601_v27 = vcombine.high %v1016_v15, %v1020_v17  ;;  %v1025_v29 = vunpack.c.h.s8.bf16 %v738_v20 }
  0x6e   :  { %3989 = vmatprep.subr.bf16.mxu0 %v5569_v50  ;;  %4153 = vmatprep.subr.bf16.mxu1 %v5571_v51  ;;  %v5603_v28 = vcombine.high %v1017_v18, %v1021_v19  ;;  %v1029_v30 = vunpack.c.h.s8.bf16 %v740_v21  ;;  %v6522_v33 = vpack.c.bf16 %v111_v26, %v111_v26  ;;  %v5600_v34 = vcombine.low %v1016_v15, %v1020_v17 }
  0x6f   :  { %v5602_v35 = vcombine.low %v1017_v18, %v1021_v19  ;;  %v5609_v36 = vcombine.high %v1024_v24, %v1028_v25  ;;  %v1032_v37 = vunpack.c.l.s8.bf16 %v742_v31  ;;  %v1036_v39 = vunpack.c.l.s8.bf16 %v744_v32  ;;  %v762_v18 = vld [vmem:[#allocation8 + $0x1e0] sm:$0xff]  ;;  %v764_v19 = vld [vmem:[#allocation8 + $0x1f0] sm:$0xff] }
  0x70   :  { %v5611_v38 = vcombine.high %v1025_v29, %v1029_v30  ;;  %v1033_v40 = vunpack.c.h.s8.bf16 %v742_v31  ;;  %v1037_v41 = vunpack.c.h.s8.bf16 %v744_v32  ;;  %4013 = vmatprep.mubr.bf16.mxu0 %v6522_v33  ;;  %4177 = vmatprep.mubr.bf16.mxu1 %v6522_v33  ;;  %v5608_v44 = vcombine.low %v1024_v24, %v1028_v25 }
  0x71   :  { %3990 = vmatpush1.bf16.msra.mxu0 %v5568_v56  ;;  %4154 = vmatpush1.bf16.msra.mxu1 %v5570_v57  ;;  %v5610_v45 = vcombine.low %v1025_v29, %v1029_v30  ;;  %v1040_v46 = vunpack.c.l.s8.bf16 %v746_v42  ;;  %v1044_v47 = vunpack.c.l.s8.bf16 %v748_v43  ;;  %v5617_v48 = vcombine.high %v1032_v37, %v1036_v39  ;;  %v768_v29 = vld [vmem:[#allocation8 + $0x210] sm:$0xff] }
  0x72   :  { %3991 = vmatprep.subr.bf16.mxu0 %v5577_v58  ;;  %4155 = vmatprep.subr.bf16.mxu1 %v5579_v60  ;;  %v5619_v49 = vcombine.high %v1033_v40, %v1037_v41  ;;  %v1041_v50 = vunpack.c.h.s8.bf16 %v746_v42  ;;  %v1045_v51 = vunpack.c.h.s8.bf16 %v748_v43  ;;  %v5616_v54 = vcombine.low %v1032_v37, %v1036_v39  ;;  %v770_v39 = vld [vmem:[#allocation8 + $0x220] sm:$0xff] }
  0x73   :  { %v5618_v55 = vcombine.low %v1033_v40, %v1037_v41  ;;  %v5625_v56 = vcombine.high %v1040_v46, %v1044_v47  ;;  %v1048_v57 = vunpack.c.l.s8.bf16 %v750_v52  ;;  %v1052_v59 = vunpack.c.l.s8.bf16 %v752_v53  ;;  %v772_v40 = vld [vmem:[#allocation8 + $0x230] sm:$0xff]  ;;  %v110_v43 = vld [vmem:[#allocation5] sm:$0xff] }
  0x74   :  { %v5627_v58 = vcombine.high %v1041_v50, %v1045_v51  ;;  %v1049_v60 = vunpack.c.h.s8.bf16 %v750_v52  ;;  %v1053_v61 = vunpack.c.h.s8.bf16 %v752_v53  ;;  %v5624_v0 = vcombine.low %v1040_v46, %v1044_v47  ;;  %v113_v53 = vld [vmem:[#allocation5 + $0x18] sm:$0xff] }
  0x75   :  { %3992 = vmatpush1.bf16.msra.mxu0 %v5576_v2  ;;  %4156 = vmatpush1.bf16.msra.mxu1 %v5578_v3  ;;  %v5626_v1 = vcombine.low %v1041_v50, %v1045_v51  ;;  %v1056_v2 = vunpack.c.l.s8.bf16 %v754_v62  ;;  %v1060_v3 = vunpack.c.l.s8.bf16 %v756_v63  ;;  %v5633_v4 = vcombine.high %v1048_v57, %v1052_v59  ;;  %v774_v50 = vld [vmem:[#allocation8 + $0x240] sm:$0xff]  ;;  %v776_v51 = vld [vmem:[#allocation8 + $0x250] sm:$0xff] }
  0x76   :  { %3993 = vmatprep.subr.bf16.mxu0 %v5585_v6  ;;  %4157 = vmatprep.subr.bf16.mxu1 %v5587_v7  ;;  %v5635_v5 = vcombine.high %v1049_v60, %v1053_v61  ;;  %v1057_v6 = vunpack.c.h.s8.bf16 %v754_v62  ;;  %v1061_v7 = vunpack.c.h.s8.bf16 %v756_v63  ;;  %v5632_v10 = vcombine.low %v1048_v57, %v1052_v59  ;;  %v778_v62 = vld [vmem:[#allocation8 + $0x260] sm:$0xff]  ;;  %v780_v63 = vld [vmem:[#allocation8 + $0x270] sm:$0xff] }
  0x77   :  { %v5634_v11 = vcombine.low %v1049_v60, %v1053_v61  ;;  %v1068_v15 = vunpack.c.l.s8.bf16 %v760_v9  ;;  %v1069_v17 = vunpack.c.h.s8.bf16 %v760_v9  ;;  %v5640_v20 = vcombine.low %v1056_v2, %v1060_v3  ;;  %v782_v9 = vld [vmem:[#allocation8 + $0x280] sm:$0xff] }
  0x78   :  { %v5642_v21 = vcombine.low %v1057_v6, %v1061_v7  ;;  %v1073_v26 = vunpack.c.h.s8.bf16 %v762_v18  ;;  %v6526_v52 = vpack.c.bf16 %v110_v43, %v110_v43  ;;  %v1096_v57 = vunpack.c.l.s8.bf16 %v774_v50 }
  0x79   :  { %3994 = vmatpush1.bf16.msra.mxu0 %v5584_v12  ;;  %4158 = vmatpush1.bf16.msra.mxu1 %v5586_v13  ;;  %v5641_v12 = vcombine.high %v1056_v2, %v1060_v3  ;;  %v1064_v13 = vunpack.c.l.s8.bf16 %v758_v8  ;;  %v1100_v59 = vunpack.c.l.s8.bf16 %v776_v51  ;;  %v1097_v60 = vunpack.c.h.s8.bf16 %v774_v50  ;;  %v798_v50 = vld [vmem:[#allocation8 + $0x300] sm:$0xff] }
  0x7a   :  { %3995 = vmatprep.subr.bf16.mxu0 %v5593_v14  ;;  %4159 = vmatprep.subr.bf16.mxu1 %v5595_v16  ;;  %v5643_v14 = vcombine.high %v1057_v6, %v1061_v7  ;;  %v1065_v16 = vunpack.c.h.s8.bf16 %v758_v8  ;;  %v1101_v61 = vunpack.c.h.s8.bf16 %v776_v51  ;;  %v1104_v3 = vunpack.c.l.s8.bf16 %v778_v62  ;;  %v800_v51 = vld [vmem:[#allocation8 + $0x310] sm:$0xff] }
  0x7b   :  { %v5649_v24 = vcombine.high %v1064_v13, %v1068_v15  ;;  %v5648_v30 = vcombine.low %v1064_v13, %v1068_v15  ;;  %v1109_v6 = vunpack.c.h.s8.bf16 %v780_v63  ;;  %v5681_v7 = vcombine.high %v1096_v57, %v1100_v59 }
  0x7c   :  { %v5651_v25 = vcombine.high %v1065_v16, %v1069_v17  ;;  %v5650_v31 = vcombine.low %v1065_v16, %v1069_v17  ;;  %v5683_v8 = vcombine.high %v1097_v60, %v1101_v61  ;;  %v1112_v15 = vunpack.c.l.s8.bf16 %v782_v9 }
  0x7d   :  { %3996 = vmatpush1.bf16.msra.mxu0 %v5592_v22  ;;  %4160 = vmatpush1.bf16.msra.mxu1 %v5594_v23  ;;  %v1072_v22 = vunpack.c.l.s8.bf16 %v762_v18  ;;  %v1076_v23 = vunpack.c.l.s8.bf16 %v764_v19  ;;  %v1113_v17 = vunpack.c.h.s8.bf16 %v782_v9  ;;  %v808_v9 = vld [vmem:[#allocation8 + $0x350] sm:$0xff] }
  0x7e   :  { %3997 = vmatprep.subr.bf16.mxu0 %v5601_v27  ;;  %4161 = vmatprep.subr.bf16.mxu1 %v5603_v28  ;;  %v1077_v27 = vunpack.c.h.s8.bf16 %v764_v19  ;;  %v766_v28 = vld [vmem:[#allocation8 + $0x200] sm:$0xff] }
  0x7f   :  { %v5657_v32 = vcombine.high %v1072_v22, %v1076_v23  ;;  %v1081_v37 = vunpack.c.h.s8.bf16 %v766_v28  ;;  %v5656_v41 = vcombine.low %v1072_v22, %v1076_v23  ;;  %v786_v19 = vld [vmem:[#allocation8 + $0x2a0] sm:$0xff] }
  0x80   :  { %v5658_v42 = vcombine.low %v1073_v26, %v1077_v27  ;;  %v1120_v23 = vunpack.c.l.s8.bf16 %v786_v19 }
  0x81   :  { %3998 = vmatpush1.bf16.msra.mxu0 %v5600_v34  ;;  %4162 = vmatpush1.bf16.msra.mxu1 %v5602_v35  ;;  %v1080_v34 = vunpack.c.l.s8.bf16 %v766_v28  ;;  %v5659_v35 = vcombine.high %v1073_v26, %v1077_v27 }
  0x82   :  { %3999 = vmatprep.subr.bf16.mxu0 %v5609_v36  ;;  %4163 = vmatprep.subr.bf16.mxu1 %v5611_v38  ;;  %v1084_v36 = vunpack.c.l.s8.bf16 %v768_v29  ;;  %v1085_v38 = vunpack.c.h.s8.bf16 %v768_v29  ;;  %v790_v29 = vld [vmem:[#allocation8 + $0x2c0] sm:$0xff] }
  0x84   :  { %v5665_v46 = vcombine.high %v1080_v34, %v1084_v36  ;;  %v5667_v47 = vcombine.high %v1081_v37, %v1085_v38 }
  0x85   :  { %4000 = vmatpush1.bf16.msra.mxu0 %v5608_v44  ;;  %4164 = vmatpush1.bf16.msra.mxu1 %v5610_v45  ;;  %v1088_v44 = vunpack.c.l.s8.bf16 %v770_v39  ;;  %v1092_v45 = vunpack.c.l.s8.bf16 %v772_v40 }
  0x86   :  { %4001 = vmatprep.subr.bf16.mxu0 %v5617_v48  ;;  %4165 = vmatprep.subr.bf16.mxu1 %v5619_v49  ;;  %v1089_v48 = vunpack.c.h.s8.bf16 %v770_v39  ;;  %v1093_v49 = vunpack.c.h.s8.bf16 %v772_v40  ;;  %v794_v40 = vld [vmem:[#allocation8 + $0x2e0] sm:$0xff] }
  0x88   :  { %v5674_v2 = vcombine.low %v1089_v48, %v1093_v49 }
  0x89   :  { %4002 = vmatpush1.bf16.msra.mxu0 %v5616_v54  ;;  %4166 = vmatpush1.bf16.msra.mxu1 %v5618_v55  ;;  %v5664_v54 = vcombine.low %v1080_v34, %v1084_v36  ;;  %v5666_v55 = vcombine.low %v1081_v37, %v1085_v38  ;;  %v1128_v36 = vunpack.c.l.s8.bf16 %v790_v29  ;;  %v1129_v38 = vunpack.c.h.s8.bf16 %v790_v29  ;;  %v816_v29 = vld [vmem:[#allocation8 + $0x390] sm:$0xff] }
  0x8a   :  { %4003 = vmatprep.subr.bf16.mxu0 %v5625_v56  ;;  %4167 = vmatprep.subr.bf16.mxu1 %v5627_v58  ;;  %v5673_v56 = vcombine.high %v1088_v44, %v1092_v45  ;;  %v5675_v58 = vcombine.high %v1089_v48, %v1093_v49 }
  0x8d   :  { %4004 = vmatpush1.bf16.msra.mxu0 %v5624_v0  ;;  %4168 = vmatpush1.bf16.msra.mxu1 %v5626_v1  ;;  %v6528_v0 = vpack.c.bf16 %v113_v53, %v113_v53  ;;  %v5672_v1 = vcombine.low %v1088_v44, %v1092_v45  ;;  %v1136_v44 = vunpack.c.l.s8.bf16 %v794_v40 }
  0x8e   :  { %4005 = vmatprep.subr.bf16.mxu0 %v5633_v4  ;;  %4169 = vmatprep.subr.bf16.mxu1 %v5635_v5  ;;  %v1108_v4 = vunpack.c.l.s8.bf16 %v780_v63  ;;  %v1105_v5 = vunpack.c.h.s8.bf16 %v778_v62  ;;  %v804_v62 = vld [vmem:[#allocation8 + $0x330] sm:$0xff] }
  0x90   :  { %v5689_v13 = vcombine.high %v1104_v3, %v1108_v4  ;;  %v5690_v22 = vcombine.low %v1105_v5, %v1109_v6 }
  0x91   :  { %4006 = vmatpush1.bf16.msra.mxu0 %v5632_v10  ;;  %4170 = vmatpush1.bf16.msra.mxu1 %v5634_v11  ;;  %v784_v10 = vld [vmem:[#allocation8 + $0x290] sm:$0xff]  ;;  %v5680_v11 = vcombine.low %v1096_v57, %v1100_v59  ;;  %v1144_v57 = vunpack.c.l.s8.bf16 %v798_v50  ;;  %v1145_v59 = vunpack.c.h.s8.bf16 %v798_v50 }
  0x92   :  { %4007 = vmatprep.subr.bf16.mxu0 %v5641_v12  ;;  %4171 = vmatprep.subr.bf16.mxu1 %v5643_v14  ;;  %v5682_v12 = vcombine.low %v1097_v60, %v1101_v61  ;;  %v5691_v14 = vcombine.high %v1105_v5, %v1109_v6  ;;  %v1116_v16 = vunpack.c.l.s8.bf16 %v784_v10  ;;  %v1117_v18 = vunpack.c.h.s8.bf16 %v784_v10  ;;  %v802_v61 = vld [vmem:[#allocation8 + $0x320] sm:$0xff]  ;;  %v824_v50 = vld [vmem:[#allocation8 + $0x3d0] sm:$0xff] }
  0x93   :  { %v1149_v60 = vunpack.c.h.s8.bf16 %v800_v51  ;;  %v1157_v5 = vunpack.c.h.s8.bf16 %v804_v62 }
  0x94   :  { %v5697_v27 = vcombine.high %v1112_v15, %v1116_v16  ;;  %v5699_v28 = vcombine.high %v1113_v17, %v1117_v18 }
  0x95   :  { %4008 = vmatpush1.bf16.msra.mxu0 %v5640_v20  ;;  %4172 = vmatpush1.bf16.msra.mxu1 %v5642_v21  ;;  %v788_v20 = vld [vmem:[#allocation8 + $0x2b0] sm:$0xff]  ;;  %v5688_v21 = vcombine.low %v1104_v3, %v1108_v4  ;;  %v1156_v3 = vunpack.c.l.s8.bf16 %v804_v62  ;;  %v1153_v4 = vunpack.c.h.s8.bf16 %v802_v61 }
  0x96   :  { %4009 = vmatprep.subr.bf16.mxu0 %v5649_v24  ;;  %4173 = vmatprep.subr.bf16.mxu1 %v5651_v25  ;;  %v1124_v24 = vunpack.c.l.s8.bf16 %v788_v20  ;;  %v1121_v25 = vunpack.c.h.s8.bf16 %v786_v19  ;;  %v1125_v26 = vunpack.c.h.s8.bf16 %v788_v20  ;;  %v812_v19 = vld [vmem:[#allocation8 + $0x370] sm:$0xff] }
  0x98   :  { %v5705_v34 = vcombine.high %v1120_v23, %v1124_v24  ;;  %v5706_v43 = vcombine.low %v1121_v25, %v1125_v26 }
  0x99   :  { %4010 = vmatpush1.bf16.msra.mxu0 %v5648_v30  ;;  %4174 = vmatpush1.bf16.msra.mxu1 %v5650_v31  ;;  %v792_v30 = vld [vmem:[#allocation8 + $0x2d0] sm:$0xff]  ;;  %v5696_v31 = vcombine.low %v1112_v15, %v1116_v16  ;;  %v1164_v15 = vunpack.c.l.s8.bf16 %v808_v9 }
  0x9a   :  { %4011 = vmatprep.subr.bf16.mxu0 %v5657_v32  ;;  %4175 = vmatprep.subr.bf16.mxu1 %v5659_v35  ;;  %v5698_v32 = vcombine.low %v1113_v17, %v1117_v18  ;;  %v5707_v35 = vcombine.high %v1121_v25, %v1125_v26  ;;  %v1132_v37 = vunpack.c.l.s8.bf16 %v792_v30  ;;  %v1133_v39 = vunpack.c.h.s8.bf16 %v792_v30  ;;  %v810_v18 = vld [vmem:[#allocation8 + $0x360] sm:$0xff] }
  0x9b   :  { %v1165_v17 = vunpack.c.h.s8.bf16 %v808_v9  ;;  %v1173_v25 = vunpack.c.h.s8.bf16 %v812_v19 }
  0x9c   :  { %v5713_v48 = vcombine.high %v1128_v36, %v1132_v37  ;;  %v5715_v49 = vcombine.high %v1129_v38, %v1133_v39  ;;  %v5712_v53 = vcombine.low %v1128_v36, %v1132_v37  ;;  %v1180_v36 = vunpack.c.l.s8.bf16 %v816_v29 }
  0x9d   :  { %4012 = vmatpush1.bf16.msra.mxu0 %v5656_v41  ;;  %4176 = vmatpush1.bf16.msra.mxu1 %v5658_v42  ;;  %v796_v41 = vld [vmem:[#allocation8 + $0x2f0] sm:$0xff]  ;;  %v5704_v42 = vcombine.low %v1120_v23, %v1124_v24  ;;  %v1172_v23 = vunpack.c.l.s8.bf16 %v812_v19  ;;  %v1169_v24 = vunpack.c.h.s8.bf16 %v810_v18 }
  0x9e   :  { %4022 = vmatprep.subr.bf16.mxu0 %v5665_v46  ;;  %4186 = vmatprep.subr.bf16.mxu1 %v5667_v47  ;;  %v1140_v45 = vunpack.c.l.s8.bf16 %v796_v41  ;;  %v1137_v46 = vunpack.c.h.s8.bf16 %v794_v40  ;;  %v1141_v47 = vunpack.c.h.s8.bf16 %v796_v41  ;;  %v820_v40 = vld [vmem:[#allocation8 + $0x3b0] sm:$0xff] }
  0xa0   :  { %4014 = vmatmul.mubr.bf16.vlgmr.msra.gmra.mrb[0].mxu0 %v6526_v52  ;;  %4178 = vmatmul.mubr.bf16.vlgmr.msra.gmra.mrb[0].mxu1 %v6526_v52  ;;  %v5720_v63 = vcombine.low %v1136_v44, %v1140_v45 }
  0xa1   :  { %4023 = vmatpush1.bf16.msra.mxu0 %v5664_v54  ;;  %4187 = vmatpush1.bf16.msra.mxu1 %v5666_v55  ;;  %v5714_v54 = vcombine.low %v1129_v38, %v1133_v39  ;;  %v5721_v55 = vcombine.high %v1136_v44, %v1140_v45  ;;  %v1181_v38 = vunpack.c.h.s8.bf16 %v816_v29  ;;  %v818_v39 = vld [vmem:[#allocation8 + $0x3a0] sm:$0xff]  ;;  %v1188_v44 = vunpack.c.l.s8.bf16 %v820_v40  ;;  %v840_v29 = vld [vmem:[#allocation8 + $0x450] sm:$0xff] }
  0xa2   :  { %4024 = vmatprep.subr.bf16.mxu0 %v5673_v56  ;;  %4188 = vmatprep.subr.bf16.mxu1 %v5675_v58  ;;  %v5723_v56 = vcombine.high %v1137_v46, %v1141_v47  ;;  %v1148_v58 = vunpack.c.l.s8.bf16 %v800_v51  ;;  %v1185_v45 = vunpack.c.h.s8.bf16 %v818_v39 }
  0xa3   :  { %4054 = vmatprep.mubr.bf16.mxu0 %v6528_v0  ;;  %4218 = vmatprep.mubr.bf16.mxu1 %v6528_v0 }
  0xa4   :  { %v5729_v6 = vcombine.high %v1144_v57, %v1148_v58  ;;  %v5728_v10 = vcombine.low %v1144_v57, %v1148_v58  ;;  %v1196_v57 = vunpack.c.l.s8.bf16 %v824_v50 }
  0xa5   :  { %4025 = vmatpush1.bf16.msra.mxu0 %v5672_v1  ;;  %4189 = vmatpush1.bf16.msra.mxu1 %v5674_v2  ;;  %v5722_v1 = vcombine.low %v1137_v46, %v1141_v47  ;;  %v1152_v2 = vunpack.c.l.s8.bf16 %v802_v61  ;;  %v1189_v46 = vunpack.c.h.s8.bf16 %v820_v40  ;;  %v828_v61 = vld [vmem:[#allocation8 + $0x3f0] sm:$0xff]  ;;  %v1229_v40 = vunpack.c.h.s8.bf16 %v840_v29 }
  0xa6   :  { %4026 = vmatprep.subr.bf16.mxu0 %v5681_v7  ;;  %4190 = vmatprep.subr.bf16.mxu1 %v5683_v8  ;;  %v5731_v7 = vcombine.high %v1145_v59, %v1149_v60  ;;  %v806_v8 = vld [vmem:[#allocation8 + $0x340] sm:$0xff] }
  0xa7   :  { %v1161_v16 = vunpack.c.h.s8.bf16 %v806_v8  ;;  %v5736_v20 = vcombine.low %v1152_v2, %v1156_v3 }
  0xa9   :  { %4027 = vmatpush1.bf16.msra.mxu0 %v5680_v11  ;;  %4191 = vmatpush1.bf16.msra.mxu1 %v5682_v12  ;;  %v5730_v11 = vcombine.low %v1145_v59, %v1149_v60  ;;  %v5737_v12 = vcombine.high %v1152_v2, %v1156_v3  ;;  %v1197_v59 = vunpack.c.h.s8.bf16 %v824_v50  ;;  %v826_v60 = vld [vmem:[#allocation8 + $0x3e0] sm:$0xff]  ;;  %v1204_v2 = vunpack.c.l.s8.bf16 %v828_v61 }
  0xaa   :  { %4028 = vmatprep.subr.bf16.mxu0 %v5689_v13  ;;  %4192 = vmatprep.subr.bf16.mxu1 %v5691_v14  ;;  %v5739_v13 = vcombine.high %v1153_v4, %v1157_v5  ;;  %v1160_v14 = vunpack.c.l.s8.bf16 %v806_v8  ;;  %v1201_v3 = vunpack.c.h.s8.bf16 %v826_v60  ;;  %v832_v8 = vld [vmem:[#allocation8 + $0x410] sm:$0xff] }
  0xac   :  { %v5745_v26 = vcombine.high %v1160_v14, %v1164_v15  ;;  %v5744_v30 = vcombine.low %v1160_v14, %v1164_v15  ;;  %v1212_v14 = vunpack.c.l.s8.bf16 %v832_v8 }
  0xad   :  { %4029 = vmatpush1.bf16.msra.mxu0 %v5688_v21  ;;  %4193 = vmatpush1.bf16.msra.mxu1 %v5690_v22  ;;  %v5738_v21 = vcombine.low %v1153_v4, %v1157_v5  ;;  %v1168_v22 = vunpack.c.l.s8.bf16 %v810_v18  ;;  %v1205_v4 = vunpack.c.h.s8.bf16 %v828_v61  ;;  %v836_v18 = vld [vmem:[#allocation8 + $0x430] sm:$0xff] }
  0xae   :  { %4030 = vmatprep.subr.bf16.mxu0 %v5697_v27  ;;  %4194 = vmatprep.subr.bf16.mxu1 %v5699_v28  ;;  %v5747_v27 = vcombine.high %v1161_v16, %v1165_v17  ;;  %v814_v28 = vld [vmem:[#allocation8 + $0x380] sm:$0xff] }
  0xaf   :  { %v1177_v37 = vunpack.c.h.s8.bf16 %v814_v28  ;;  %v5752_v41 = vcombine.low %v1168_v22, %v1172_v23 }
  0xb1   :  { %4031 = vmatpush1.bf16.msra.mxu0 %v5696_v31  ;;  %4195 = vmatpush1.bf16.msra.mxu1 %v5698_v32  ;;  %v5746_v31 = vcombine.low %v1161_v16, %v1165_v17  ;;  %v5753_v32 = vcombine.high %v1168_v22, %v1172_v23  ;;  %v1213_v16 = vunpack.c.h.s8.bf16 %v832_v8  ;;  %v834_v17 = vld [vmem:[#allocation8 + $0x420] sm:$0xff]  ;;  %v1220_v23 = vunpack.c.l.s8.bf16 %v836_v18 }
  0xb2   :  { %4032 = vmatprep.subr.bf16.mxu0 %v5705_v34  ;;  %4196 = vmatprep.subr.bf16.mxu1 %v5707_v35  ;;  %v5755_v34 = vcombine.high %v1169_v24, %v1173_v25  ;;  %v1176_v35 = vunpack.c.l.s8.bf16 %v814_v28  ;;  %v1216_v22 = vunpack.c.l.s8.bf16 %v834_v17  ;;  %v838_v28 = vld [vmem:[#allocation8 + $0x440] sm:$0xff] }
  0xb4   :  { %v5761_v47 = vcombine.high %v1176_v35, %v1180_v36  ;;  %v5760_v51 = vcombine.low %v1176_v35, %v1180_v36  ;;  %v5801_v35 = vcombine.high %v1216_v22, %v1220_v23 }
  0xb5   :  { %4033 = vmatpush1.bf16.msra.mxu0 %v5704_v42  ;;  %4197 = vmatpush1.bf16.msra.mxu1 %v5706_v43  ;;  %v5754_v42 = vcombine.low %v1169_v24, %v1173_v25  ;;  %v1184_v43 = vunpack.c.l.s8.bf16 %v818_v39  ;;  %v1217_v24 = vunpack.c.h.s8.bf16 %v834_v17  ;;  %v1221_v25 = vunpack.c.h.s8.bf16 %v836_v18 }
  0xb6   :  { %4034 = vmatprep.subr.bf16.mxu0 %v5713_v48  ;;  %4198 = vmatprep.subr.bf16.mxu1 %v5715_v49  ;;  %v5763_v48 = vcombine.high %v1177_v37, %v1181_v38  ;;  %v822_v49 = vld [vmem:[#allocation8 + $0x3c0] sm:$0xff]  ;;  %v1225_v39 = vunpack.c.h.s8.bf16 %v838_v28 }
  0xb7   :  { %v1193_v58 = vunpack.c.h.s8.bf16 %v822_v49  ;;  %v5768_v62 = vcombine.low %v1184_v43, %v1188_v44  ;;  %v5803_v36 = vcombine.high %v1217_v24, %v1221_v25 }
  0xb9   :  { %4035 = vmatpush1.bf16.msra.mxu0 %v5712_v53  ;;  %4199 = vmatpush1.bf16.msra.mxu1 %v5714_v54  ;;  %v5762_v53 = vcombine.low %v1177_v37, %v1181_v38  ;;  %v5769_v54 = vcombine.high %v1184_v43, %v1188_v44  ;;  %v1224_v37 = vunpack.c.l.s8.bf16 %v838_v28  ;;  %v1228_v38 = vunpack.c.l.s8.bf16 %v840_v29 }
  0xba   :  { %4036 = vmatprep.subr.bf16.mxu0 %v5721_v55  ;;  %4200 = vmatprep.subr.bf16.mxu1 %v5723_v56  ;;  %v5771_v55 = vcombine.high %v1185_v45, %v1189_v46  ;;  %v1192_v56 = vunpack.c.l.s8.bf16 %v822_v49  ;;  %v5800_v44 = vcombine.low %v1216_v22, %v1220_v23  ;;  %v5811_v49 = vcombine.high %v1225_v39, %v1229_v40 }
  0xbc   :  { %v5777_v5 = vcombine.high %v1192_v56, %v1196_v57  ;;  %v5776_v9 = vcombine.low %v1192_v56, %v1196_v57  ;;  %v5810_v56 = vcombine.low %v1225_v39, %v1229_v40 }
  0xbd   :  { %4037 = vmatpush1.bf16.msra.mxu0 %v5720_v63  ;;  %4201 = vmatpush1.bf16.msra.mxu1 %v5722_v1  ;;  %v5770_v63 = vcombine.low %v1185_v45, %v1189_v46  ;;  %v1200_v1 = vunpack.c.l.s8.bf16 %v826_v60  ;;  %v5802_v45 = vcombine.low %v1217_v24, %v1221_v25 }
  0xbe   :  { %4038 = vmatprep.subr.bf16.mxu0 %v5729_v6  ;;  %4202 = vmatprep.subr.bf16.mxu1 %v5731_v7  ;;  %v5779_v6 = vcombine.high %v1193_v58, %v1197_v59  ;;  %v830_v7 = vld [vmem:[#allocation8 + $0x400] sm:$0xff] }
  0xbf   :  { %v1209_v15 = vunpack.c.h.s8.bf16 %v830_v7  ;;  %v5784_v19 = vcombine.low %v1200_v1, %v1204_v2 }
  0xc1   :  { %4039 = vmatpush1.bf16.msra.mxu0 %v5728_v10  ;;  %4203 = vmatpush1.bf16.msra.mxu1 %v5730_v11  ;;  %v5778_v10 = vcombine.low %v1193_v58, %v1197_v59  ;;  %v5785_v11 = vcombine.high %v1200_v1, %v1204_v2  ;;  %v852_v1 = vld [vmem:[#allocation8 + $0x4b0] sm:$0xff] }
  0xc2   :  { %4040 = vmatprep.subr.bf16.mxu0 %v5737_v12  ;;  %4204 = vmatprep.subr.bf16.mxu1 %v5739_v13  ;;  %v5787_v12 = vcombine.high %v1201_v3, %v1205_v4  ;;  %v1208_v13 = vunpack.c.l.s8.bf16 %v830_v7  ;;  %v1253_v7 = vunpack.c.h.s8.bf16 %v852_v1 }
  0xc5   :  { %4041 = vmatpush1.bf16.msra.mxu0 %v5736_v20  ;;  %4205 = vmatpush1.bf16.msra.mxu1 %v5738_v21  ;;  %v5786_v20 = vcombine.low %v1201_v3, %v1205_v4  ;;  %v112_v21 = vld [vmem:[#allocation5 + $0x10] sm:$0xff] }
  0xc6   :  { %4042 = vmatprep.subr.bf16.mxu0 %v5745_v26  ;;  %4206 = vmatprep.subr.bf16.mxu1 %v5747_v27  ;;  %v5793_v26 = vcombine.high %v1208_v13, %v1212_v14  ;;  %v5795_v27 = vcombine.high %v1209_v15, %v1213_v16 }
  0xc9   :  { %4043 = vmatpush1.bf16.msra.mxu0 %v5744_v30  ;;  %4207 = vmatpush1.bf16.msra.mxu1 %v5746_v31  ;;  %v6534_v30 = vpack.c.bf16 %v112_v21, %v112_v21  ;;  %v5792_v31 = vcombine.low %v1208_v13, %v1212_v14  ;;  %v860_v21 = vld [vmem:[#allocation8 + $0x4f0] sm:$0xff] }
  0xca   :  { %4044 = vmatprep.subr.bf16.mxu0 %v5753_v32  ;;  %4208 = vmatprep.subr.bf16.mxu1 %v5755_v34  ;;  %v115_v32 = vld [vmem:[#allocation5 + $0x28] sm:$0xff]  ;;  %v5794_v34 = vcombine.low %v1209_v15, %v1213_v16  ;;  %v1268_v25 = vunpack.c.l.s8.bf16 %v860_v21 }
  0xcb   :  { %v6536_v43 = vpack.c.bf16 %v115_v32, %v115_v32  ;;  %v864_v32 = vld [vmem:[#allocation8 + $0x510] sm:$0xff] }
  0xcc   :  { %v1276_v39 = vunpack.c.l.s8.bf16 %v864_v32 }
  0xcd   :  { %4045 = vmatpush1.bf16.msra.mxu0 %v5752_v41  ;;  %4209 = vmatpush1.bf16.msra.mxu1 %v5754_v42  ;;  %v842_v41 = vld [vmem:[#allocation8 + $0x460] sm:$0xff]  ;;  %v844_v42 = vld [vmem:[#allocation8 + $0x470] sm:$0xff] }
  0xce   :  { %4046 = vmatprep.subr.bf16.mxu0 %v5761_v47  ;;  %4210 = vmatprep.subr.bf16.mxu1 %v5763_v48  ;;  %v1232_v46 = vunpack.c.l.s8.bf16 %v842_v41  ;;  %v1236_v47 = vunpack.c.l.s8.bf16 %v844_v42  ;;  %v5809_v48 = vcombine.high %v1224_v37, %v1228_v38  ;;  %v1233_v50 = vunpack.c.h.s8.bf16 %v842_v41 }
  0xcf   :  { %v1277_v41 = vunpack.c.h.s8.bf16 %v864_v32  ;;  %v886_v32 = vld [vmem:[#allocation8 + $0x5c0] sm:$0xff] }
  0xd0   :  { %v5817_v57 = vcombine.high %v1232_v46, %v1236_v47  ;;  %v5816_v2 = vcombine.low %v1232_v46, %v1236_v47 }
  0xd1   :  { %4047 = vmatpush1.bf16.msra.mxu0 %v5760_v51  ;;  %4211 = vmatpush1.bf16.msra.mxu1 %v5762_v53  ;;  %v1237_v51 = vunpack.c.h.s8.bf16 %v844_v42  ;;  %v846_v53 = vld [vmem:[#allocation8 + $0x480] sm:$0xff] }
  0xd2   :  { %4048 = vmatprep.subr.bf16.mxu0 %v5769_v54  ;;  %4212 = vmatprep.subr.bf16.mxu1 %v5771_v55  ;;  %v848_v54 = vld [vmem:[#allocation8 + $0x490] sm:$0xff]  ;;  %v5808_v55 = vcombine.low %v1224_v37, %v1228_v38  ;;  %v1240_v58 = vunpack.c.l.s8.bf16 %v846_v53  ;;  %v1241_v61 = vunpack.c.h.s8.bf16 %v846_v53  ;;  %v866_v42 = vld [vmem:[#allocation8 + $0x520] sm:$0xff] }
  0xd3   :  { %v5819_v59 = vcombine.high %v1233_v50, %v1237_v51  ;;  %v1244_v60 = vunpack.c.l.s8.bf16 %v848_v54  ;;  %v5818_v3 = vcombine.low %v1233_v50, %v1237_v51  ;;  %v1280_v47 = vunpack.c.l.s8.bf16 %v866_v42 }
  0xd5   :  { %4049 = vmatpush1.bf16.msra.mxu0 %v5768_v62  ;;  %4213 = vmatpush1.bf16.msra.mxu1 %v5770_v63  ;;  %v1245_v62 = vunpack.c.h.s8.bf16 %v848_v54  ;;  %v850_v63 = vld [vmem:[#allocation8 + $0x4a0] sm:$0xff]  ;;  %v5825_v8 = vcombine.high %v1240_v58, %v1244_v60 }
  0xd6   :  { %4050 = vmatprep.subr.bf16.mxu0 %v5777_v5  ;;  %4214 = vmatprep.subr.bf16.mxu1 %v5779_v6  ;;  %v1248_v4 = vunpack.c.l.s8.bf16 %v850_v63  ;;  %v1252_v5 = vunpack.c.l.s8.bf16 %v852_v1  ;;  %v1249_v6 = vunpack.c.h.s8.bf16 %v850_v63  ;;  %v870_v54 = vld [vmem:[#allocation8 + $0x540] sm:$0xff] }
  0xd7   :  { %v5826_v13 = vcombine.low %v1241_v61, %v1245_v62  ;;  %v874_v1 = vld [vmem:[#allocation8 + $0x560] sm:$0xff] }
  0xd8   :  { %v5833_v14 = vcombine.high %v1248_v4, %v1252_v5  ;;  %v5835_v15 = vcombine.high %v1249_v6, %v1253_v7  ;;  %v5832_v22 = vcombine.low %v1248_v4, %v1252_v5  ;;  %v5834_v23 = vcombine.low %v1249_v6, %v1253_v7 }
  0xd9   :  { %4051 = vmatpush1.bf16.msra.mxu0 %v5776_v9  ;;  %4215 = vmatpush1.bf16.msra.mxu1 %v5778_v10  ;;  %v5827_v9 = vcombine.high %v1241_v61, %v1245_v62  ;;  %v854_v10 = vld [vmem:[#allocation8 + $0x4c0] sm:$0xff]  ;;  %v1289_v62 = vunpack.c.h.s8.bf16 %v870_v54  ;;  %v1296_v5 = vunpack.c.l.s8.bf16 %v874_v1  ;;  %v1297_v7 = vunpack.c.h.s8.bf16 %v874_v1 }
  0xda   :  { %4052 = vmatprep.subr.bf16.mxu0 %v5785_v11  ;;  %4216 = vmatprep.subr.bf16.mxu1 %v5787_v12  ;;  %v856_v11 = vld [vmem:[#allocation8 + $0x4d0] sm:$0xff]  ;;  %v5824_v12 = vcombine.low %v1240_v58, %v1244_v60  ;;  %v1256_v16 = vunpack.c.l.s8.bf16 %v854_v10  ;;  %v1257_v18 = vunpack.c.h.s8.bf16 %v854_v10  ;;  %v1288_v60 = vunpack.c.l.s8.bf16 %v870_v54 }
  0xdb   :  { %v1260_v17 = vunpack.c.l.s8.bf16 %v856_v11 }
  0xdd   :  { %4053 = vmatpush1.bf16.msra.mxu0 %v5784_v19  ;;  %4217 = vmatpush1.bf16.msra.mxu1 %v5786_v20  ;;  %v1261_v19 = vunpack.c.h.s8.bf16 %v856_v11  ;;  %v858_v20 = vld [vmem:[#allocation8 + $0x4e0] sm:$0xff]  ;;  %v5841_v28 = vcombine.high %v1256_v16, %v1260_v17 }
  0xde   :  { %4063 = vmatprep.subr.bf16.mxu0 %v5793_v26  ;;  %4227 = vmatprep.subr.bf16.mxu1 %v5795_v27  ;;  %v1264_v24 = vunpack.c.l.s8.bf16 %v858_v20  ;;  %v1265_v26 = vunpack.c.h.s8.bf16 %v858_v20  ;;  %v1269_v27 = vunpack.c.h.s8.bf16 %v860_v21  ;;  %v878_v11 = vld [vmem:[#allocation8 + $0x580] sm:$0xff] }
  0xdf   :  { %v5843_v29 = vcombine.high %v1257_v18, %v1261_v19  ;;  %v882_v21 = vld [vmem:[#allocation8 + $0x5a0] sm:$0xff] }
  0xe0   :  { %4055 = vmatmul.mubr.bf16.vlgmr.msra.gmra.mrb[0].mxu0 %v6534_v30  ;;  %4219 = vmatmul.mubr.bf16.vlgmr.msra.gmra.mrb[0].mxu1 %v6534_v30  ;;  %v5851_v37 = vcombine.high %v1265_v26, %v1269_v27  ;;  %v5850_v46 = vcombine.low %v1265_v26, %v1269_v27  ;;  %v1313_v27 = vunpack.c.h.s8.bf16 %v882_v21 }
  0xe1   :  { %4064 = vmatpush1.bf16.msra.mxu0 %v5792_v31  ;;  %4228 = vmatpush1.bf16.msra.mxu1 %v5794_v34  ;;  %v862_v31 = vld [vmem:[#allocation8 + $0x500] sm:$0xff]  ;;  %v5840_v34 = vcombine.low %v1256_v16, %v1260_v17  ;;  %v1304_v17 = vunpack.c.l.s8.bf16 %v878_v11 }
  0xe2   :  { %4065 = vmatprep.subr.bf16.mxu0 %v5801_v35  ;;  %4229 = vmatprep.subr.bf16.mxu1 %v5803_v36  ;;  %v5842_v35 = vcombine.low %v1257_v18, %v1261_v19  ;;  %v5849_v36 = vcombine.high %v1264_v24, %v1268_v25  ;;  %v1272_v38 = vunpack.c.l.s8.bf16 %v862_v31  ;;  %v1273_v40 = vunpack.c.h.s8.bf16 %v862_v31 }
  0xe3   :  { %4095 = vmatprep.mubr.bf16.mxu0 %v6536_v43  ;;  %4259 = vmatprep.mubr.bf16.mxu1 %v6536_v43  ;;  %v1305_v19 = vunpack.c.h.s8.bf16 %v878_v11 }
  0xe4   :  { %v5857_v51 = vcombine.high %v1272_v38, %v1276_v39  ;;  %v5859_v53 = vcombine.high %v1273_v40, %v1277_v41 }
  0xe5   :  { %4066 = vmatpush1.bf16.msra.mxu0 %v5800_v44  ;;  %4230 = vmatpush1.bf16.msra.mxu1 %v5802_v45  ;;  %v868_v44 = vld [vmem:[#allocation8 + $0x530] sm:$0xff]  ;;  %v5848_v45 = vcombine.low %v1264_v24, %v1268_v25  ;;  %v1312_v25 = vunpack.c.l.s8.bf16 %v882_v21 }
  0xe6   :  { %4067 = vmatprep.subr.bf16.mxu0 %v5809_v48  ;;  %4231 = vmatprep.subr.bf16.mxu1 %v5811_v49  ;;  %v1284_v48 = vunpack.c.l.s8.bf16 %v868_v44  ;;  %v1281_v49 = vunpack.c.h.s8.bf16 %v866_v42  ;;  %v1285_v50 = vunpack.c.h.s8.bf16 %v868_v44  ;;  %v890_v44 = vld [vmem:[#allocation8 + $0x5e0] sm:$0xff] }
  0xe8   :  { %v5865_v58 = vcombine.high %v1280_v47, %v1284_v48  ;;  %v5866_v4 = vcombine.low %v1281_v49, %v1285_v50 }
  0xe9   :  { %4068 = vmatpush1.bf16.msra.mxu0 %v5808_v55  ;;  %4232 = vmatpush1.bf16.msra.mxu1 %v5810_v56  ;;  %v872_v55 = vld [vmem:[#allocation8 + $0x550] sm:$0xff]  ;;  %v5856_v56 = vcombine.low %v1272_v38, %v1276_v39  ;;  %v1320_v39 = vunpack.c.l.s8.bf16 %v886_v32 }
  0xea   :  { %4069 = vmatprep.subr.bf16.mxu0 %v5817_v57  ;;  %4233 = vmatprep.subr.bf16.mxu1 %v5819_v59  ;;  %v5858_v57 = vcombine.low %v1273_v40, %v1277_v41  ;;  %v5867_v59 = vcombine.high %v1281_v49, %v1285_v50  ;;  %v1292_v61 = vunpack.c.l.s8.bf16 %v872_v55  ;;  %v1293_v63 = vunpack.c.h.s8.bf16 %v872_v55  ;;  %v894_v55 = vld [vmem:[#allocation8 + $0x600] sm:$0xff] }
  0xeb   :  { %v1321_v41 = vunpack.c.h.s8.bf16 %v886_v32  ;;  %v1329_v50 = vunpack.c.h.s8.bf16 %v890_v44 }
  0xec   :  { %v5875_v10 = vcombine.high %v1289_v62, %v1293_v63 }
  0xed   :  { %4070 = vmatpush1.bf16.msra.mxu0 %v5816_v2  ;;  %4234 = vmatpush1.bf16.msra.mxu1 %v5818_v3  ;;  %v876_v2 = vld [vmem:[#allocation8 + $0x570] sm:$0xff]  ;;  %v5864_v3 = vcombine.low %v1280_v47, %v1284_v48  ;;  %v1328_v48 = vunpack.c.l.s8.bf16 %v890_v44 }
  0xee   :  { %4071 = vmatprep.subr.bf16.mxu0 %v5825_v8  ;;  %4235 = vmatprep.subr.bf16.mxu1 %v5827_v9  ;;  %v1300_v6 = vunpack.c.l.s8.bf16 %v876_v2  ;;  %v1301_v8 = vunpack.c.h.s8.bf16 %v876_v2  ;;  %v5873_v9 = vcombine.high %v1288_v60, %v1292_v61  ;;  %v898_v2 = vld [vmem:[#allocation8 + $0x620] sm:$0xff] }
  0xf0   :  { %v5883_v16 = vcombine.high %v1297_v7, %v1301_v8  ;;  %v5882_v24 = vcombine.low %v1297_v7, %v1301_v8  ;;  %v1344_v7 = vunpack.c.l.s8.bf16 %v898_v2 }
  0xf1   :  { %4072 = vmatpush1.bf16.msra.mxu0 %v5824_v12  ;;  %4236 = vmatpush1.bf16.msra.mxu1 %v5826_v13  ;;  %v880_v12 = vld [vmem:[#allocation8 + $0x590] sm:$0xff]  ;;  %v5872_v13 = vcombine.low %v1288_v60, %v1292_v61  ;;  %v1336_v61 = vunpack.c.l.s8.bf16 %v894_v55 }
  0xf2   :  { %4073 = vmatprep.subr.bf16.mxu0 %v5833_v14  ;;  %4237 = vmatprep.subr.bf16.mxu1 %v5835_v15  ;;  %v5874_v14 = vcombine.low %v1289_v62, %v1293_v63  ;;  %v5881_v15 = vcombine.high %v1296_v5, %v1300_v6  ;;  %v1308_v18 = vunpack.c.l.s8.bf16 %v880_v12  ;;  %v1309_v20 = vunpack.c.h.s8.bf16 %v880_v12 }
  0xf3   :  { %v1337_v63 = vunpack.c.h.s8.bf16 %v894_v55 }
  0xf4   :  { %v5891_v31 = vcombine.high %v1305_v19, %v1309_v20 }
  0xf5   :  { %4074 = vmatpush1.bf16.msra.mxu0 %v5832_v22  ;;  %4238 = vmatpush1.bf16.msra.mxu1 %v5834_v23  ;;  %v884_v22 = vld [vmem:[#allocation8 + $0x5b0] sm:$0xff]  ;;  %v5880_v23 = vcombine.low %v1296_v5, %v1300_v6  ;;  %v114_v6 = vld [vmem:[#allocation5 + $0x20] sm:$0xff] }
  0xf6   :  { %4075 = vmatprep.subr.bf16.mxu0 %v5841_v28  ;;  %4239 = vmatprep.subr.bf16.mxu1 %v5843_v29  ;;  %v1316_v26 = vunpack.c.l.s8.bf16 %v884_v22  ;;  %v1317_v28 = vunpack.c.h.s8.bf16 %v884_v22  ;;  %v5889_v29 = vcombine.high %v1304_v17, %v1308_v18 }
  0xf8   :  { %v5899_v38 = vcombine.high %v1313_v27, %v1317_v28  ;;  %v5898_v47 = vcombine.low %v1313_v27, %v1317_v28 }
  0xf9   :  { %4076 = vmatpush1.bf16.msra.mxu0 %v5840_v34  ;;  %4240 = vmatpush1.bf16.msra.mxu1 %v5842_v35  ;;  %v888_v34 = vld [vmem:[#allocation8 + $0x5d0] sm:$0xff]  ;;  %v5888_v35 = vcombine.low %v1304_v17, %v1308_v18  ;;  %v117_v17 = vld [vmem:[#allocation5 + $0x38] sm:$0xff] }
  0xfa   :  { %4077 = vmatprep.subr.bf16.mxu0 %v5849_v36  ;;  %4241 = vmatprep.subr.bf16.mxu1 %v5851_v37  ;;  %v5890_v36 = vcombine.low %v1305_v19, %v1309_v20  ;;  %v5897_v37 = vcombine.high %v1312_v25, %v1316_v26  ;;  %v1324_v40 = vunpack.c.l.s8.bf16 %v888_v34  ;;  %v1325_v42 = vunpack.c.h.s8.bf16 %v888_v34 }
  0xfb   :  { %v6544_v27 = vpack.c.bf16 %v117_v17, %v117_v17 }
  0xfc   :  { %v5907_v54 = vcombine.high %v1321_v41, %v1325_v42 }
  0xfd   :  { %4078 = vmatpush1.bf16.msra.mxu0 %v5848_v45  ;;  %4242 = vmatpush1.bf16.msra.mxu1 %v5850_v46  ;;  %v892_v45 = vld [vmem:[#allocation8 + $0x5f0] sm:$0xff]  ;;  %v5896_v46 = vcombine.low %v1312_v25, %v1316_v26  ;;  %v906_v25 = vld [vmem:[#allocation8 + $0x660] sm:$0xff] }
  0xfe   :  { %4079 = vmatprep.subr.bf16.mxu0 %v5857_v51  ;;  %4243 = vmatprep.subr.bf16.mxu1 %v5859_v53  ;;  %v1332_v49 = vunpack.c.l.s8.bf16 %v892_v45  ;;  %v1333_v51 = vunpack.c.h.s8.bf16 %v892_v45  ;;  %v5905_v53 = vcombine.high %v1320_v39, %v1324_v40  ;;  %v908_v26 = vld [vmem:[#allocation8 + $0x670] sm:$0xff]  ;;  %v1361_v34 = vunpack.c.h.s8.bf16 %v906_v25 }
  0xff   :  { %v1364_v32 = vunpack.c.l.s8.bf16 %v908_v26 }
 0x100   :  { %v5915_v60 = vcombine.high %v1329_v50, %v1333_v51  ;;  %v5914_v5 = vcombine.low %v1329_v50, %v1333_v51  ;;  %v916_v50 = vld [vmem:[#allocation8 + $0x6b0] sm:$0xff] }
 0x101   :  { %4080 = vmatpush1.bf16.msra.mxu0 %v5856_v56  ;;  %4244 = vmatpush1.bf16.msra.mxu1 %v5858_v57  ;;  %v896_v56 = vld [vmem:[#allocation8 + $0x610] sm:$0xff]  ;;  %v5904_v57 = vcombine.low %v1320_v39, %v1324_v40  ;;  %v1380_v55 = vunpack.c.l.s8.bf16 %v916_v50 }
 0x102   :  { %4081 = vmatprep.subr.bf16.mxu0 %v5865_v58  ;;  %4245 = vmatprep.subr.bf16.mxu1 %v5867_v59  ;;  %v5906_v58 = vcombine.low %v1321_v41, %v1325_v42  ;;  %v5913_v59 = vcombine.high %v1328_v48, %v1332_v49  ;;  %v1340_v62 = vunpack.c.l.s8.bf16 %v896_v56  ;;  %v1341_v1 = vunpack.c.h.s8.bf16 %v896_v56  ;;  %v912_v39 = vld [vmem:[#allocation8 + $0x690] sm:$0xff] }
 0x104   :  { %v5921_v11 = vcombine.high %v1336_v61, %v1340_v62  ;;  %v5923_v12 = vcombine.high %v1337_v63, %v1341_v1  ;;  %v5922_v18 = vcombine.low %v1337_v63, %v1341_v1 }
 0x105   :  { %4082 = vmatpush1.bf16.msra.mxu0 %v5864_v3  ;;  %4246 = vmatpush1.bf16.msra.mxu1 %v5866_v4  ;;  %v900_v3 = vld [vmem:[#allocation8 + $0x630] sm:$0xff]  ;;  %v5912_v4 = vcombine.low %v1328_v48, %v1332_v49  ;;  %v1373_v48 = vunpack.c.h.s8.bf16 %v912_v39  ;;  %v914_v49 = vld [vmem:[#allocation8 + $0x6a0] sm:$0xff] }
 0x106   :  { %4083 = vmatprep.subr.bf16.mxu0 %v5873_v9  ;;  %4247 = vmatprep.subr.bf16.mxu1 %v5875_v10  ;;  %v1348_v8 = vunpack.c.l.s8.bf16 %v900_v3  ;;  %v1345_v9 = vunpack.c.h.s8.bf16 %v898_v2  ;;  %v1349_v10 = vunpack.c.h.s8.bf16 %v900_v3  ;;  %v1377_v56 = vunpack.c.h.s8.bf16 %v914_v49 }
 0x108   :  { %v5929_v19 = vcombine.high %v1344_v7, %v1348_v8  ;;  %v5931_v20 = vcombine.high %v1345_v9, %v1349_v10  ;;  %v5928_v28 = vcombine.low %v1344_v7, %v1348_v8  ;;  %v922_v7 = vld [vmem:[#allocation8 + $0x6e0] sm:$0xff]  ;;  %v924_v8 = vld [vmem:[#allocation8 + $0x6f0] sm:$0xff] }
 0x109   :  { %4084 = vmatpush1.bf16.msra.mxu0 %v5872_v13  ;;  %4248 = vmatpush1.bf16.msra.mxu1 %v5874_v14  ;;  %v902_v13 = vld [vmem:[#allocation8 + $0x640] sm:$0xff]  ;;  %v904_v14 = vld [vmem:[#allocation8 + $0x650] sm:$0xff] }
 0x10a   :  { %4085 = vmatprep.subr.bf16.mxu0 %v5881_v15  ;;  %4249 = vmatprep.subr.bf16.mxu1 %v5883_v16  ;;  %v6542_v15 = vpack.c.bf16 %v114_v6, %v114_v6  ;;  %v5920_v16 = vcombine.low %v1336_v61, %v1340_v62  ;;  %v1352_v21 = vunpack.c.l.s8.bf16 %v902_v13  ;;  %v1356_v22 = vunpack.c.l.s8.bf16 %v904_v14  ;;  %v920_v61 = vld [vmem:[#allocation8 + $0x6d0] sm:$0xff] }
 0x10b   :  { %v1389_v6 = vunpack.c.h.s8.bf16 %v920_v61 }
 0x10c   :  { %v5936_v40 = vcombine.low %v1352_v21, %v1356_v22 }
 0x10d   :  { %4086 = vmatpush1.bf16.msra.mxu0 %v5880_v23  ;;  %4250 = vmatpush1.bf16.msra.mxu1 %v5882_v24  ;;  %v1353_v23 = vunpack.c.h.s8.bf16 %v902_v13  ;;  %v1357_v24 = vunpack.c.h.s8.bf16 %v904_v14  ;;  %v1393_v13 = vunpack.c.h.s8.bf16 %v922_v7  ;;  %v1397_v14 = vunpack.c.h.s8.bf16 %v924_v8 }
 0x10e   :  { %4087 = vmatprep.subr.bf16.mxu0 %v5889_v29  ;;  %4251 = vmatprep.subr.bf16.mxu1 %v5891_v31  ;;  %v5930_v29 = vcombine.low %v1345_v9, %v1349_v10  ;;  %v1360_v31 = vunpack.c.l.s8.bf16 %v906_v25 }
 0x10f   :  { %v5938_v41 = vcombine.low %v1353_v23, %v1357_v24 }
 0x110   :  { %v5945_v42 = vcombine.high %v1360_v31, %v1364_v32  ;;  %v5944_v51 = vcombine.low %v1360_v31, %v1364_v32  ;;  %v932_v31 = vld [vmem:[#allocation8 + $0x730] sm:$0xff] }
 0x111   :  { %4088 = vmatpush1.bf16.msra.mxu0 %v5888_v35  ;;  %4252 = vmatpush1.bf16.msra.mxu1 %v5890_v36  ;;  %v1365_v35 = vunpack.c.h.s8.bf16 %v908_v26  ;;  %v5937_v36 = vcombine.high %v1352_v21, %v1356_v22 }
 0x112   :  { %4089 = vmatprep.subr.bf16.mxu0 %v5897_v37  ;;  %4253 = vmatprep.subr.bf16.mxu1 %v5899_v38  ;;  %v5939_v37 = vcombine.high %v1353_v23, %v1357_v24  ;;  %v910_v38 = vld [vmem:[#allocation8 + $0x680] sm:$0xff]  ;;  %v5979_v23 = vcombine.high %v1393_v13, %v1397_v14 }
 0x113   :  { %v5947_v44 = vcombine.high %v1361_v34, %v1365_v35  ;;  %v1368_v45 = vunpack.c.l.s8.bf16 %v910_v38 }
 0x115   :  { %4090 = vmatpush1.bf16.msra.mxu0 %v5896_v46  ;;  %4254 = vmatpush1.bf16.msra.mxu1 %v5898_v47  ;;  %v1372_v46 = vunpack.c.l.s8.bf16 %v912_v39  ;;  %v1369_v47 = vunpack.c.h.s8.bf16 %v910_v38  ;;  %v1413_v38 = vunpack.c.h.s8.bf16 %v932_v31 }
 0x116   :  { %4091 = vmatprep.subr.bf16.mxu0 %v5905_v53  ;;  %4255 = vmatprep.subr.bf16.mxu1 %v5907_v54  ;;  %v5946_v53 = vcombine.low %v1361_v34, %v1365_v35  ;;  %v1376_v54 = vunpack.c.l.s8.bf16 %v914_v49  ;;  %v5978_v34 = vcombine.low %v1393_v13, %v1397_v14 }
 0x117   :  { %v5952_v62 = vcombine.low %v1368_v45, %v1372_v46  ;;  %v5954_v63 = vcombine.low %v1369_v47, %v1373_v48 }
 0x118   :  { %v5961_v1 = vcombine.high %v1376_v54, %v1380_v55  ;;  %v5960_v9 = vcombine.low %v1376_v54, %v1380_v55  ;;  %v940_v54 = vld [vmem:[#allocation8 + $0x770] sm:$0xff] }
 0x119   :  { %4092 = vmatpush1.bf16.msra.mxu0 %v5904_v57  ;;  %4256 = vmatpush1.bf16.msra.mxu1 %v5906_v58  ;;  %v1381_v57 = vunpack.c.h.s8.bf16 %v916_v50  ;;  %v5953_v58 = vcombine.high %v1368_v45, %v1372_v46 }
 0x11a   :  { %4093 = vmatprep.subr.bf16.mxu0 %v5913_v59  ;;  %4257 = vmatprep.subr.bf16.mxu1 %v5915_v60  ;;  %v5955_v59 = vcombine.high %v1369_v47, %v1373_v48  ;;  %v918_v60 = vld [vmem:[#allocation8 + $0x6c0] sm:$0xff] }
 0x11b   :  { %v5963_v2 = vcombine.high %v1377_v56, %v1381_v57  ;;  %v1384_v3 = vunpack.c.l.s8.bf16 %v918_v60  ;;  %v5962_v10 = vcombine.low %v1377_v56, %v1381_v57 }
 0x11d   :  { %4094 = vmatpush1.bf16.msra.mxu0 %v5912_v4  ;;  %4258 = vmatpush1.bf16.msra.mxu1 %v5914_v5  ;;  %v1388_v4 = vunpack.c.l.s8.bf16 %v920_v61  ;;  %v1385_v5 = vunpack.c.h.s8.bf16 %v918_v60  ;;  %v1429_v60 = vunpack.c.h.s8.bf16 %v940_v54 }
 0x11e   :  { %4104 = vmatprep.subr.bf16.mxu0 %v5921_v11  ;;  %4268 = vmatprep.subr.bf16.mxu1 %v5923_v12  ;;  %v1392_v11 = vunpack.c.l.s8.bf16 %v922_v7  ;;  %v1396_v12 = vunpack.c.l.s8.bf16 %v924_v8 }
 0x11f   :  { %v5971_v17 = vcombine.high %v1385_v5, %v1389_v6  ;;  %v5970_v21 = vcombine.low %v1385_v5, %v1389_v6 }
 0x120   :  { %4096 = vmatmul.mubr.bf16.vlgmr.msra.gmra.mrb[0].mxu0 %v6542_v15  ;;  %4260 = vmatmul.mubr.bf16.vlgmr.msra.gmra.mrb[0].mxu1 %v6542_v15  ;;  %v5977_v22 = vcombine.high %v1392_v11, %v1396_v12  ;;  %v5976_v32 = vcombine.low %v1392_v11, %v1396_v12  ;;  %v948_v11 = vld [vmem:[#allocation8 + $0x7b0] sm:$0xff] }
 0x121   :  { %4105 = vmatpush1.bf16.msra.mxu0 %v5920_v16  ;;  %4269 = vmatpush1.bf16.msra.mxu1 %v5922_v18  ;;  %v5969_v16 = vcombine.high %v1384_v3, %v1388_v4  ;;  %v926_v18 = vld [vmem:[#allocation8 + $0x700] sm:$0xff] }
 0x122   :  { %4106 = vmatprep.subr.bf16.mxu0 %v5929_v19  ;;  %4270 = vmatprep.subr.bf16.mxu1 %v5931_v20  ;;  %v928_v19 = vld [vmem:[#allocation8 + $0x710] sm:$0xff]  ;;  %v5968_v20 = vcombine.low %v1384_v3, %v1388_v4  ;;  %v1400_v24 = vunpack.c.l.s8.bf16 %v926_v18  ;;  %v1401_v26 = vunpack.c.h.s8.bf16 %v926_v18 }
 0x123   :  { %6041 = vmatprep.mubr.msk.bf16.mxu0 %vm3952_vm0, %v6544_v27  ;;  %6043 = vmatprep.mubr.msk.bf16.mxu1 %vm3952_vm0, %v6544_v27  ;;  %v1404_v25 = vunpack.c.l.s8.bf16 %v928_v19 }
 0x125   :  { %4107 = vmatpush1.bf16.msra.mxu0 %v5928_v28  ;;  %4271 = vmatpush1.bf16.msra.mxu1 %v5930_v29  ;;  %v1405_v28 = vunpack.c.h.s8.bf16 %v928_v19  ;;  %v930_v29 = vld [vmem:[#allocation8 + $0x720] sm:$0xff]  ;;  %v5985_v39 = vcombine.high %v1400_v24, %v1404_v25 }
 0x126   :  { %4108 = vmatprep.subr.bf16.mxu0 %v5937_v36  ;;  %4272 = vmatprep.subr.bf16.mxu1 %v5939_v37  ;;  %v1408_v35 = vunpack.c.l.s8.bf16 %v930_v29  ;;  %v1412_v36 = vunpack.c.l.s8.bf16 %v932_v31  ;;  %v1409_v37 = vunpack.c.h.s8.bf16 %v930_v29  ;;  %v703_v29 = vld [vmem:[#allocation8 + $0x8] sm:$0xff]  ;;  %v705_v31 = vld [vmem:[#allocation8 + $0x18] sm:$0xff] }
 0x127   :  { %v5986_v45 = vcombine.low %v1401_v26, %v1405_v28 }
 0x128   :  { %v5993_v46 = vcombine.high %v1408_v35, %v1412_v36  ;;  %v5995_v47 = vcombine.high %v1409_v37, %v1413_v38  ;;  %v5992_v55 = vcombine.low %v1408_v35, %v1412_v36  ;;  %v5994_v56 = vcombine.low %v1409_v37, %v1413_v38 }
 0x129   :  { %4109 = vmatpush1.bf16.msra.mxu0 %v5936_v40  ;;  %4273 = vmatpush1.bf16.msra.mxu1 %v5938_v41  ;;  %v5987_v40 = vcombine.high %v1401_v26, %v1405_v28  ;;  %v934_v41 = vld [vmem:[#allocation8 + $0x740] sm:$0xff]  ;;  %v954_v37 = vunpack.c.l.s8.bf16 %v703_v29  ;;  %v958_v38 = vunpack.c.l.s8.bf16 %v705_v31 }
 0x12a   :  { %4110 = vmatprep.subr.bf16.mxu0 %v5945_v42  ;;  %4274 = vmatprep.subr.bf16.mxu1 %v5947_v44  ;;  %v936_v42 = vld [vmem:[#allocation8 + $0x750] sm:$0xff]  ;;  %v5984_v44 = vcombine.low %v1400_v24, %v1404_v25  ;;  %v1416_v48 = vunpack.c.l.s8.bf16 %v934_v41  ;;  %v1417_v50 = vunpack.c.h.s8.bf16 %v934_v41  ;;  %v955_v41 = vunpack.c.h.s8.bf16 %v703_v29 }
 0x12b   :  { %v1420_v49 = vunpack.c.l.s8.bf16 %v936_v42 }
 0x12d   :  { %4111 = vmatpush1.bf16.msra.mxu0 %v5944_v51  ;;  %4275 = vmatpush1.bf16.msra.mxu1 %v5946_v53  ;;  %v1421_v51 = vunpack.c.h.s8.bf16 %v936_v42  ;;  %v938_v53 = vld [vmem:[#allocation8 + $0x760] sm:$0xff]  ;;  %v6001_v61 = vcombine.high %v1416_v48, %v1420_v49  ;;  %v959_v42 = vunpack.c.h.s8.bf16 %v705_v31 }
 0x12e   :  { %4112 = vmatprep.subr.bf16.mxu0 %v5953_v58  ;;  %4276 = vmatprep.subr.bf16.mxu1 %v5955_v59  ;;  %v1424_v57 = vunpack.c.l.s8.bf16 %v938_v53  ;;  %v1428_v58 = vunpack.c.l.s8.bf16 %v940_v54  ;;  %v1425_v59 = vunpack.c.h.s8.bf16 %v938_v53 }
 0x12f   :  { %v6002_v3 = vcombine.low %v1417_v50, %v1421_v51 }
 0x130   :  { %v6009_v4 = vcombine.high %v1424_v57, %v1428_v58  ;;  %v6011_v5 = vcombine.high %v1425_v59, %v1429_v60  ;;  %v6008_v12 = vcombine.low %v1424_v57, %v1428_v58  ;;  %v6010_v13 = vcombine.low %v1425_v59, %v1429_v60  ;;  %v713_v57 = vld [vmem:[#allocation8 + $0x58] sm:$0xff] }
 0x131   :  { %4113 = vmatpush1.bf16.msra.mxu0 %v5952_v62  ;;  %4277 = vmatpush1.bf16.msra.mxu1 %v5954_v63  ;;  %v6003_v62 = vcombine.high %v1417_v50, %v1421_v51  ;;  %v942_v63 = vld [vmem:[#allocation8 + $0x780] sm:$0xff]  ;;  %v5543_v51 = vcombine.high %v955_v41, %v959_v42  ;;  %v5540_v59 = vcombine.low %v954_v37, %v958_v38 }
 0x132   :  { %4114 = vmatprep.subr.bf16.mxu0 %v5961_v1  ;;  %4278 = vmatprep.subr.bf16.mxu1 %v5963_v2  ;;  %v944_v1 = vld [vmem:[#allocation8 + $0x790] sm:$0xff]  ;;  %v6000_v2 = vcombine.low %v1416_v48, %v1420_v49  ;;  %v1432_v6 = vunpack.c.l.s8.bf16 %v942_v63  ;;  %v1433_v8 = vunpack.c.h.s8.bf16 %v942_v63  ;;  %v5541_v48 = vcombine.high %v954_v37, %v958_v38  ;;  %v727_v37 = vld [vmem:[#allocation8 + $0xc8] sm:$0xff]  ;;  %v729_v38 = vld [vmem:[#allocation8 + $0xd8] sm:$0xff] }
 0x133   :  { %v1436_v7 = vunpack.c.l.s8.bf16 %v944_v1  ;;  %v116_v49 = vld [vmem:[#allocation5 + $0x30] sm:$0xff]  ;;  %v5542_v60 = vcombine.low %v955_v41, %v959_v42  ;;  %v1002_v41 = vunpack.c.l.s8.bf16 %v727_v37  ;;  %v1006_v42 = vunpack.c.l.s8.bf16 %v729_v38 }
 0x134   :  { %v6556_v58 = vpack.c.bf16 %v116_v49, %v116_v49  ;;  %v733_v49 = vld [vmem:[#allocation8 + $0xf8] sm:$0xff] }
 0x135   :  { %4115 = vmatpush1.bf16.msra.mxu0 %v5960_v9  ;;  %4279 = vmatpush1.bf16.msra.mxu1 %v5962_v10  ;;  %v1437_v9 = vunpack.c.h.s8.bf16 %v944_v1  ;;  %v946_v10 = vld [vmem:[#allocation8 + $0x7a0] sm:$0xff]  ;;  %v975_v1 = vunpack.c.h.s8.bf16 %v713_v57 }
 0x136   :  { %4116 = vmatprep.subr.bf16.mxu0 %v5969_v16  ;;  %4280 = vmatprep.subr.bf16.mxu1 %v5971_v17  ;;  %v1440_v14 = vunpack.c.l.s8.bf16 %v946_v10  ;;  %v1444_v16 = vunpack.c.l.s8.bf16 %v948_v11  ;;  %v6017_v17 = vcombine.high %v1432_v6, %v1436_v7  ;;  %v1441_v19 = vunpack.c.h.s8.bf16 %v946_v10 }
 0x137   :  { %v6019_v18 = vcombine.high %v1433_v8, %v1437_v9 }
 0x138   :  { %v6025_v26 = vcombine.high %v1440_v14, %v1444_v16 }
 0x139   :  { %4117 = vmatpush1.bf16.msra.mxu0 %v5968_v20  ;;  %4281 = vmatpush1.bf16.msra.mxu1 %v5970_v21  ;;  %v1445_v20 = vunpack.c.h.s8.bf16 %v948_v11  ;;  %v950_v21 = vld [vmem:[#allocation8 + $0x7c0] sm:$0xff] }
 0x13a   :  { %4118 = vmatprep.subr.bf16.mxu0 %v5977_v22  ;;  %4282 = vmatprep.subr.bf16.mxu1 %v5979_v23  ;;  %v6016_v22 = vcombine.low %v1432_v6, %v1436_v7  ;;  %v6018_v23 = vcombine.low %v1433_v8, %v1437_v9  ;;  %v1448_v24 = vunpack.c.l.s8.bf16 %v950_v21  ;;  %v1449_v25 = vunpack.c.h.s8.bf16 %v950_v21 }
 0x13b   :  { %v6027_v28 = vcombine.high %v1441_v19, %v1445_v20 }
 0x13c   :  { %v6032_v35 = vcombine.low %v1448_v24, %v1448_v24  ;;  %v6034_v36 = vcombine.low %v1449_v25, %v1449_v25 }
 0x13d   :  { %4119 = vmatpush1.bf16.msra.mxu0 %v5976_v32  ;;  %4283 = vmatpush1.bf16.msra.mxu1 %v5978_v34  ;;  %v6024_v32 = vcombine.low %v1440_v14, %v1444_v16  ;;  %v6026_v34 = vcombine.low %v1441_v19, %v1445_v20  ;;  %v719_v14 = vld [vmem:[#allocation8 + $0x88] sm:$0xff]  ;;  %v721_v16 = vld [vmem:[#allocation8 + $0x98] sm:$0xff] }
 0x13e   :  { %4120 = vmatprep.subr.bf16.mxu0 %v5985_v39  ;;  %4284 = vmatprep.subr.bf16.mxu1 %v5987_v40  ;;  %v6033_v39 = vcombine.high %v1448_v24, %v1448_v24  ;;  %v6035_v40 = vcombine.high %v1449_v25, %v1449_v25  ;;  %v986_v19 = vunpack.c.l.s8.bf16 %v719_v14  ;;  %v990_v20 = vunpack.c.l.s8.bf16 %v721_v16  ;;  %v723_v25 = vld [vmem:[#allocation8 + $0xa8] sm:$0xff] }
 0x13f   :  { %v987_v21 = vunpack.c.h.s8.bf16 %v719_v14 }
 0x140   :  { %v5573_v31 = vcombine.high %v986_v19, %v990_v20 }
 0x141   :  { %4121 = vmatpush1.bf16.msra.mxu0 %v5984_v44  ;;  %4285 = vmatpush1.bf16.msra.mxu1 %v5986_v45  ;;  %v707_v44 = vld [vmem:[#allocation8 + $0x28] sm:$0xff]  ;;  %v709_v45 = vld [vmem:[#allocation8 + $0x38] sm:$0xff] }
 0x142   :  { %4122 = vmatprep.subr.bf16.mxu0 %v5993_v46  ;;  %4286 = vmatprep.subr.bf16.mxu1 %v5995_v47  ;;  %v3958_v46 = vsel %vm3956_vm1, %v6032_v35, 0  ;;  %v3964_v47 = vsel %vm3956_vm1, %v6034_v36, 0  ;;  %v962_v50 = vunpack.c.l.s8.bf16 %v707_v44  ;;  %v966_v53 = vunpack.c.l.s8.bf16 %v709_v45 }
 0x143   :  { %v963_v54 = vunpack.c.h.s8.bf16 %v707_v44  ;;  %v995_v35 = vunpack.c.h.s8.bf16 %v723_v25  ;;  %v1003_v44 = vunpack.c.h.s8.bf16 %v727_v37 }
 0x144   :  { %v5548_v6 = vcombine.low %v962_v50, %v966_v53 }
 0x145   :  { %4123 = vmatpush1.bf16.msra.mxu0 %v5992_v55  ;;  %4287 = vmatpush1.bf16.msra.mxu1 %v5994_v56  ;;  %v967_v55 = vunpack.c.h.s8.bf16 %v709_v45  ;;  %v711_v56 = vld [vmem:[#allocation8 + $0x48] sm:$0xff]  ;;  %v1007_v45 = vunpack.c.h.s8.bf16 %v729_v38 }
 0x146   :  { %4124 = vmatprep.subr.bf16.mxu0 %v6001_v61  ;;  %4288 = vmatprep.subr.bf16.mxu1 %v6003_v62  ;;  %v970_v61 = vunpack.c.l.s8.bf16 %v711_v56  ;;  %v974_v62 = vunpack.c.l.s8.bf16 %v713_v57  ;;  %v971_v63 = vunpack.c.h.s8.bf16 %v711_v56  ;;  %v1014_v56 = vunpack.c.l.s8.bf16 %v733_v49 }
 0x147   :  { %v5550_v7 = vcombine.low %v963_v54, %v967_v55 }
 0x148   :  { %v5557_v8 = vcombine.high %v970_v61, %v974_v62  ;;  %v5559_v9 = vcombine.high %v971_v63, %v975_v1 }
 0x149   :  { %4125 = vmatpush1.bf16.msra.mxu0 %v6000_v2  ;;  %4289 = vmatpush1.bf16.msra.mxu1 %v6002_v3  ;;  %v5549_v2 = vcombine.high %v962_v50, %v966_v53  ;;  %v5551_v3 = vcombine.high %v963_v54, %v967_v55  ;;  %v5589_v53 = vcombine.high %v1002_v41, %v1006_v42 }
 0x14a   :  { %4126 = vmatprep.subr.bf16.mxu0 %v6009_v4  ;;  %4290 = vmatprep.subr.bf16.mxu1 %v6011_v5  ;;  %v715_v4 = vld [vmem:[#allocation8 + $0x68] sm:$0xff]  ;;  %v717_v5 = vld [vmem:[#allocation8 + $0x78] sm:$0xff]  ;;  %v5591_v54 = vcombine.high %v1003_v44, %v1007_v45 }
 0x14b   :  { %v978_v10 = vunpack.c.l.s8.bf16 %v715_v4  ;;  %v982_v11 = vunpack.c.l.s8.bf16 %v717_v5 }
 0x14d   :  { %4127 = vmatpush1.bf16.msra.mxu0 %v6008_v12  ;;  %4291 = vmatpush1.bf16.msra.mxu1 %v6010_v13  ;;  %v979_v12 = vunpack.c.h.s8.bf16 %v715_v4  ;;  %v983_v13 = vunpack.c.h.s8.bf16 %v717_v5 }
 0x14e   :  { %4128 = vmatprep.subr.bf16.mxu0 %v6017_v17  ;;  %4292 = vmatprep.subr.bf16.mxu1 %v6019_v18  ;;  %v5556_v17 = vcombine.low %v970_v61, %v974_v62  ;;  %v5558_v18 = vcombine.low %v971_v63, %v975_v1  ;;  %v737_v61 = vld [vmem:[#allocation8 + $0x118] sm:$0xff]  ;;  %v5588_v62 = vcombine.low %v1002_v41, %v1006_v42 }
 0x14f   :  { %v5567_v24 = vcombine.high %v979_v12, %v983_v13  ;;  %v5566_v29 = vcombine.low %v979_v12, %v983_v13  ;;  %v5590_v63 = vcombine.low %v1003_v44, %v1007_v45  ;;  %v1023_v4 = vunpack.c.h.s8.bf16 %v737_v61  ;;  %v753_v41 = vld [vmem:[#allocation8 + $0x198] sm:$0xff] }
 0x151   :  { %4129 = vmatpush1.bf16.msra.mxu0 %v6016_v22  ;;  %4293 = vmatpush1.bf16.msra.mxu1 %v6018_v23  ;;  %v991_v22 = vunpack.c.h.s8.bf16 %v721_v16  ;;  %v5565_v23 = vcombine.high %v978_v10, %v982_v11 }
 0x152   :  { %4130 = vmatprep.subr.bf16.mxu0 %v6025_v26  ;;  %4294 = vmatprep.subr.bf16.mxu1 %v6027_v28  ;;  %v725_v26 = vld [vmem:[#allocation8 + $0xb8] sm:$0xff]  ;;  %v5564_v28 = vcombine.low %v978_v10, %v982_v11 }
 0x153   :  { %v999_v36 = vunpack.c.h.s8.bf16 %v725_v26 }
 0x155   :  { %4131 = vmatpush1.bf16.msra.mxu0 %v6024_v32  ;;  %4295 = vmatpush1.bf16.msra.mxu1 %v6026_v34  ;;  %v994_v32 = vunpack.c.l.s8.bf16 %v723_v25  ;;  %v998_v34 = vunpack.c.l.s8.bf16 %v725_v26 }
 0x156   :  { %6040 = vmatprep.subr.msk.bf16.mxu0 %vm3956_vm1, %v6033_v39  ;;  %6042 = vmatprep.subr.msk.bf16.mxu1 %vm3956_vm1, %v6035_v40  ;;  %v5572_v39 = vcombine.low %v986_v19, %v990_v20  ;;  %v5574_v40 = vcombine.low %v987_v21, %v991_v22  ;;  %v745_v19 = vld [vmem:[#allocation8 + $0x158] sm:$0xff] }
 0x157   :  { %v5580_v50 = vcombine.low %v994_v32, %v998_v34  ;;  %v1039_v25 = vunpack.c.h.s8.bf16 %v745_v19 }
 0x159   :  { %4133 = vmatpush1.bf16.msra.mxu0 %v3958_v46  ;;  %4297 = vmatpush1.bf16.msra.mxu1 %v3964_v47  ;;  %v5581_v46 = vcombine.high %v994_v32, %v998_v34  ;;  %v5583_v47 = vcombine.high %v995_v35, %v999_v36 }
 0x15a   :  { %4309 = vmatprep.subr.bf16.mxu0 %v5541_v48  ;;  %4473 = vmatprep.subr.bf16.mxu1 %v5543_v51  ;;  %v731_v48 = vld [vmem:[#allocation8 + $0xe8] sm:$0xff]  ;;  %v5582_v51 = vcombine.low %v995_v35, %v999_v36 }
 0x15b   :  { %v1010_v55 = vunpack.c.l.s8.bf16 %v731_v48  ;;  %v1011_v57 = vunpack.c.h.s8.bf16 %v731_v48  ;;  %v1055_v48 = vunpack.c.h.s8.bf16 %v753_v41 }
 0x15c   :  { %4137 = vmatmul.mubr.bf16.vlgmr.msra.gmra.mrb[0].mxu0 %v6556_v58  ;;  %4301 = vmatmul.mubr.bf16.vlgmr.msra.gmra.mrb[0].mxu1 %v6556_v58 }
 0x15d   :  { %4310 = vmatpush1.bf16.msra.mxu0 %v5540_v59  ;;  %4474 = vmatpush1.bf16.msra.mxu1 %v5542_v60  ;;  %v1015_v59 = vunpack.c.h.s8.bf16 %v733_v49  ;;  %v735_v60 = vld [vmem:[#allocation8 + $0x108] sm:$0xff]  ;;  %v5597_v5 = vcombine.high %v1010_v55, %v1014_v56 }
 0x15e   :  { %4311 = vmatprep.subr.bf16.mxu0 %v5549_v2  ;;  %4475 = vmatprep.subr.bf16.mxu1 %v5551_v3  ;;  %v1018_v1 = vunpack.c.l.s8.bf16 %v735_v60  ;;  %v1022_v2 = vunpack.c.l.s8.bf16 %v737_v61  ;;  %v1019_v3 = vunpack.c.h.s8.bf16 %v735_v60 }
 0x15f   :  { %4341 = vmatprep.mubr.bf16.mxu0 %v6522_v33  ;;  %4505 = vmatprep.mubr.bf16.mxu1 %v6522_v33  ;;  %v5575_v33 = vcombine.high %v987_v21, %v991_v22  ;;  %v5598_v10 = vcombine.low %v1011_v57, %v1015_v59 }
 0x160   :  { %v5605_v11 = vcombine.high %v1018_v1, %v1022_v2  ;;  %v5607_v12 = vcombine.high %v1019_v3, %v1023_v4  ;;  %v5604_v20 = vcombine.low %v1018_v1, %v1022_v2  ;;  %v5606_v21 = vcombine.low %v1019_v3, %v1023_v4  ;;  %v761_v1 = vld [vmem:[#allocation8 + $0x1d8] sm:$0xff] }
 0x161   :  { %4312 = vmatpush1.bf16.msra.mxu0 %v5548_v6  ;;  %4476 = vmatpush1.bf16.msra.mxu1 %v5550_v7  ;;  %v5599_v6 = vcombine.high %v1011_v57, %v1015_v59  ;;  %v739_v7 = vld [vmem:[#allocation8 + $0x128] sm:$0xff] }
 0x162   :  { %4313 = vmatprep.subr.bf16.mxu0 %v5557_v8  ;;  %4477 = vmatprep.subr.bf16.mxu1 %v5559_v9  ;;  %v741_v8 = vld [vmem:[#allocation8 + $0x138] sm:$0xff]  ;;  %v5596_v9 = vcombine.low %v1010_v55, %v1014_v56  ;;  %v1026_v13 = vunpack.c.l.s8.bf16 %v739_v7  ;;  %v1027_v16 = vunpack.c.h.s8.bf16 %v739_v7  ;;  %v1071_v7 = vunpack.c.h.s8.bf16 %v761_v1 }
 0x163   :  { %v1030_v14 = vunpack.c.l.s8.bf16 %v741_v8 }
 0x165   :  { %4314 = vmatpush1.bf16.msra.mxu0 %v5556_v17  ;;  %4478 = vmatpush1.bf16.msra.mxu1 %v5558_v18  ;;  %v1031_v17 = vunpack.c.h.s8.bf16 %v741_v8  ;;  %v743_v18 = vld [vmem:[#allocation8 + $0x148] sm:$0xff]  ;;  %v5613_v26 = vcombine.high %v1026_v13, %v1030_v14 }
 0x166   :  { %4315 = vmatprep.subr.bf16.mxu0 %v5565_v23  ;;  %4479 = vmatprep.subr.bf16.mxu1 %v5567_v24  ;;  %v1034_v22 = vunpack.c.l.s8.bf16 %v743_v18  ;;  %v1038_v23 = vunpack.c.l.s8.bf16 %v745_v19  ;;  %v1035_v24 = vunpack.c.h.s8.bf16 %v743_v18 }
 0x167   :  { %v5614_v32 = vcombine.low %v1027_v16, %v1031_v17 }
 0x168   :  { %v5621_v34 = vcombine.high %v1034_v22, %v1038_v23  ;;  %v5623_v35 = vcombine.high %v1035_v24, %v1039_v25  ;;  %v5620_v42 = vcombine.low %v1034_v22, %v1038_v23  ;;  %v5622_v44 = vcombine.low %v1035_v24, %v1039_v25  ;;  %v769_v22 = vld [vmem:[#allocation8 + $0x218] sm:$0xff] }
 0x169   :  { %4316 = vmatpush1.bf16.msra.mxu0 %v5564_v28  ;;  %4480 = vmatpush1.bf16.msra.mxu1 %v5566_v29  ;;  %v5615_v28 = vcombine.high %v1027_v16, %v1031_v17  ;;  %v747_v29 = vld [vmem:[#allocation8 + $0x168] sm:$0xff] }
 0x16a   :  { %4317 = vmatprep.subr.bf16.mxu0 %v5573_v31  ;;  %4481 = vmatprep.subr.bf16.mxu1 %v5575_v33  ;;  %v749_v31 = vld [vmem:[#allocation8 + $0x178] sm:$0xff]  ;;  %v5612_v33 = vcombine.low %v1026_v13, %v1030_v14  ;;  %v1042_v36 = vunpack.c.l.s8.bf16 %v747_v29  ;;  %v1043_v38 = vunpack.c.h.s8.bf16 %v747_v29  ;;  %v1087_v29 = vunpack.c.h.s8.bf16 %v769_v22 }
 0x16b   :  { %v1046_v37 = vunpack.c.l.s8.bf16 %v749_v31 }
 0x16d   :  { %4318 = vmatpush1.bf16.msra.mxu0 %v5572_v39  ;;  %4482 = vmatpush1.bf16.msra.mxu1 %v5574_v40  ;;  %v1047_v39 = vunpack.c.h.s8.bf16 %v749_v31  ;;  %v751_v40 = vld [vmem:[#allocation8 + $0x188] sm:$0xff]  ;;  %v5629_v49 = vcombine.high %v1042_v36, %v1046_v37 }
 0x16e   :  { %4319 = vmatprep.subr.bf16.mxu0 %v5581_v46  ;;  %4483 = vmatprep.subr.bf16.mxu1 %v5583_v47  ;;  %v1050_v45 = vunpack.c.l.s8.bf16 %v751_v40  ;;  %v1054_v46 = vunpack.c.l.s8.bf16 %v753_v41  ;;  %v1051_v47 = vunpack.c.h.s8.bf16 %v751_v40 }
 0x16f   :  { %v5630_v55 = vcombine.low %v1043_v38, %v1047_v39 }
 0x170   :  { %v5637_v56 = vcombine.high %v1050_v45, %v1054_v46  ;;  %v5639_v57 = vcombine.high %v1051_v47, %v1055_v48  ;;  %v5636_v2 = vcombine.low %v1050_v45, %v1054_v46  ;;  %v5638_v3 = vcombine.low %v1051_v47, %v1055_v48  ;;  %v777_v45 = vld [vmem:[#allocation8 + $0x258] sm:$0xff] }
 0x171   :  { %4320 = vmatpush1.bf16.msra.mxu0 %v5580_v50  ;;  %4484 = vmatpush1.bf16.msra.mxu1 %v5582_v51  ;;  %v5631_v50 = vcombine.high %v1043_v38, %v1047_v39  ;;  %v755_v51 = vld [vmem:[#allocation8 + $0x1a8] sm:$0xff] }
 0x172   :  { %4321 = vmatprep.subr.bf16.mxu0 %v5589_v53  ;;  %4485 = vmatprep.subr.bf16.mxu1 %v5591_v54  ;;  %v757_v53 = vld [vmem:[#allocation8 + $0x1b8] sm:$0xff]  ;;  %v5628_v54 = vcombine.low %v1042_v36, %v1046_v37  ;;  %v1058_v59 = vunpack.c.l.s8.bf16 %v755_v51  ;;  %v1059_v61 = vunpack.c.h.s8.bf16 %v755_v51  ;;  %v1103_v51 = vunpack.c.h.s8.bf16 %v777_v45 }
 0x173   :  { %v1062_v60 = vunpack.c.l.s8.bf16 %v757_v53 }
 0x175   :  { %4322 = vmatpush1.bf16.msra.mxu0 %v5588_v62  ;;  %4486 = vmatpush1.bf16.msra.mxu1 %v5590_v63  ;;  %v1063_v62 = vunpack.c.h.s8.bf16 %v757_v53  ;;  %v759_v63 = vld [vmem:[#allocation8 + $0x1c8] sm:$0xff]  ;;  %v5645_v8 = vcombine.high %v1058_v59, %v1062_v60 }
 0x176   :  { %4323 = vmatprep.subr.bf16.mxu0 %v5597_v5  ;;  %4487 = vmatprep.subr.bf16.mxu1 %v5599_v6  ;;  %v1066_v4 = vunpack.c.l.s8.bf16 %v759_v63  ;;  %v1070_v5 = vunpack.c.l.s8.bf16 %v761_v1  ;;  %v1067_v6 = vunpack.c.h.s8.bf16 %v759_v63 }
 0x177   :  { %v5646_v13 = vcombine.low %v1059_v61, %v1063_v62 }
 0x178   :  { %v5653_v14 = vcombine.high %v1066_v4, %v1070_v5  ;;  %v5655_v16 = vcombine.high %v1067_v6, %v1071_v7  ;;  %v5652_v23 = vcombine.low %v1066_v4, %v1070_v5  ;;  %v5654_v24 = vcombine.low %v1067_v6, %v1071_v7  ;;  %v785_v4 = vld [vmem:[#allocation8 + $0x298] sm:$0xff] }
 0x179   :  { %4324 = vmatpush1.bf16.msra.mxu0 %v5596_v9  ;;  %4488 = vmatpush1.bf16.msra.mxu1 %v5598_v10  ;;  %v5647_v9 = vcombine.high %v1059_v61, %v1063_v62  ;;  %v763_v10 = vld [vmem:[#allocation8 + $0x1e8] sm:$0xff]  ;;  %v1118_v7 = vunpack.c.l.s8.bf16 %v785_v4 }
 0x17a   :  { %4325 = vmatprep.subr.bf16.mxu0 %v5605_v11  ;;  %4489 = vmatprep.subr.bf16.mxu1 %v5607_v12  ;;  %v765_v11 = vld [vmem:[#allocation8 + $0x1f8] sm:$0xff]  ;;  %v5644_v12 = vcombine.low %v1058_v59, %v1062_v60  ;;  %v1074_v17 = vunpack.c.l.s8.bf16 %v763_v10  ;;  %v1075_v19 = vunpack.c.h.s8.bf16 %v763_v10 }
 0x17b   :  { %v1078_v18 = vunpack.c.l.s8.bf16 %v765_v11 }
 0x17d   :  { %4326 = vmatpush1.bf16.msra.mxu0 %v5604_v20  ;;  %4490 = vmatpush1.bf16.msra.mxu1 %v5606_v21  ;;  %v1079_v20 = vunpack.c.h.s8.bf16 %v765_v11  ;;  %v767_v21 = vld [vmem:[#allocation8 + $0x208] sm:$0xff]  ;;  %v5661_v31 = vcombine.high %v1074_v17, %v1078_v18 }
 0x17e   :  { %4327 = vmatprep.subr.bf16.mxu0 %v5613_v26  ;;  %4491 = vmatprep.subr.bf16.mxu1 %v5615_v28  ;;  %v1082_v25 = vunpack.c.l.s8.bf16 %v767_v21  ;;  %v1086_v26 = vunpack.c.l.s8.bf16 %v769_v22  ;;  %v1083_v28 = vunpack.c.h.s8.bf16 %v767_v21  ;;  %v791_v22 = vld [vmem:[#allocation8 + $0x2c8] sm:$0xff] }
 0x17f   :  { %v5662_v36 = vcombine.low %v1075_v19, %v1079_v20 }
 0x180   :  { %v5669_v37 = vcombine.high %v1082_v25, %v1086_v26  ;;  %v5671_v38 = vcombine.high %v1083_v28, %v1087_v29  ;;  %v5668_v46 = vcombine.low %v1082_v25, %v1086_v26  ;;  %v5670_v47 = vcombine.low %v1083_v28, %v1087_v29 }
 0x181   :  { %4328 = vmatpush1.bf16.msra.mxu0 %v5612_v33  ;;  %4492 = vmatpush1.bf16.msra.mxu1 %v5614_v32  ;;  %v5663_v33 = vcombine.high %v1075_v19, %v1079_v20  ;;  %v771_v32 = vld [vmem:[#allocation8 + $0x228] sm:$0xff]  ;;  %v1130_v26 = vunpack.c.l.s8.bf16 %v791_v22  ;;  %v1131_v29 = vunpack.c.h.s8.bf16 %v791_v22 }
 0x182   :  { %4329 = vmatprep.subr.bf16.mxu0 %v5621_v34  ;;  %4493 = vmatprep.subr.bf16.mxu1 %v5623_v35  ;;  %v773_v34 = vld [vmem:[#allocation8 + $0x238] sm:$0xff]  ;;  %v5660_v35 = vcombine.low %v1074_v17, %v1078_v18  ;;  %v1090_v39 = vunpack.c.l.s8.bf16 %v771_v32  ;;  %v1091_v41 = vunpack.c.h.s8.bf16 %v771_v32 }
 0x183   :  { %v1094_v40 = vunpack.c.l.s8.bf16 %v773_v34 }
 0x185   :  { %4330 = vmatpush1.bf16.msra.mxu0 %v5620_v42  ;;  %4494 = vmatpush1.bf16.msra.mxu1 %v5622_v44  ;;  %v1095_v42 = vunpack.c.h.s8.bf16 %v773_v34  ;;  %v775_v44 = vld [vmem:[#allocation8 + $0x248] sm:$0xff]  ;;  %v5677_v53 = vcombine.high %v1090_v39, %v1094_v40 }
 0x186   :  { %4331 = vmatprep.subr.bf16.mxu0 %v5629_v49  ;;  %4495 = vmatprep.subr.bf16.mxu1 %v5631_v50  ;;  %v1098_v48 = vunpack.c.l.s8.bf16 %v775_v44  ;;  %v1102_v49 = vunpack.c.l.s8.bf16 %v777_v45  ;;  %v1099_v50 = vunpack.c.h.s8.bf16 %v775_v44  ;;  %v795_v34 = vld [vmem:[#allocation8 + $0x2e8] sm:$0xff] }
 0x187   :  { %v5678_v59 = vcombine.low %v1091_v41, %v1095_v42  ;;  %v799_v45 = vld [vmem:[#allocation8 + $0x308] sm:$0xff] }
 0x188   :  { %v5685_v60 = vcombine.high %v1098_v48, %v1102_v49  ;;  %v5687_v61 = vcombine.high %v1099_v50, %v1103_v51  ;;  %v5684_v5 = vcombine.low %v1098_v48, %v1102_v49  ;;  %v1146_v49 = vunpack.c.l.s8.bf16 %v799_v45 }
 0x189   :  { %4332 = vmatpush1.bf16.msra.mxu0 %v5628_v54  ;;  %4496 = vmatpush1.bf16.msra.mxu1 %v5630_v55  ;;  %v5679_v54 = vcombine.high %v1091_v41, %v1095_v42  ;;  %v779_v55 = vld [vmem:[#allocation8 + $0x268] sm:$0xff]  ;;  %v1139_v42 = vunpack.c.h.s8.bf16 %v795_v34 }
 0x18a   :  { %4333 = vmatprep.subr.bf16.mxu0 %v5637_v56  ;;  %4497 = vmatprep.subr.bf16.mxu1 %v5639_v57  ;;  %v781_v56 = vld [vmem:[#allocation8 + $0x278] sm:$0xff]  ;;  %v5676_v57 = vcombine.low %v1090_v39, %v1094_v40  ;;  %v1106_v62 = vunpack.c.l.s8.bf16 %v779_v55  ;;  %v1107_v1 = vunpack.c.h.s8.bf16 %v779_v55  ;;  %v1138_v40 = vunpack.c.l.s8.bf16 %v795_v34 }
 0x18b   :  { %v1110_v63 = vunpack.c.l.s8.bf16 %v781_v56 }
 0x18d   :  { %4334 = vmatpush1.bf16.msra.mxu0 %v5636_v2  ;;  %4498 = vmatpush1.bf16.msra.mxu1 %v5638_v3  ;;  %v1111_v2 = vunpack.c.h.s8.bf16 %v781_v56  ;;  %v783_v3 = vld [vmem:[#allocation8 + $0x288] sm:$0xff]  ;;  %v5693_v10 = vcombine.high %v1106_v62, %v1110_v63 }
 0x18e   :  { %4335 = vmatprep.subr.bf16.mxu0 %v5645_v8  ;;  %4499 = vmatprep.subr.bf16.mxu1 %v5647_v9  ;;  %v1114_v6 = vunpack.c.l.s8.bf16 %v783_v3  ;;  %v1115_v8 = vunpack.c.h.s8.bf16 %v783_v3  ;;  %v1119_v9 = vunpack.c.h.s8.bf16 %v785_v4  ;;  %v803_v56 = vld [vmem:[#allocation8 + $0x328] sm:$0xff] }
 0x18f   :  { %v5695_v11 = vcombine.high %v1107_v1, %v1111_v2  ;;  %v807_v4 = vld [vmem:[#allocation8 + $0x348] sm:$0xff] }
 0x190   :  { %v5701_v17 = vcombine.high %v1114_v6, %v1118_v7  ;;  %v5702_v25 = vcombine.low %v1115_v8, %v1119_v9 }
 0x191   :  { %4336 = vmatpush1.bf16.msra.mxu0 %v5644_v12  ;;  %4500 = vmatpush1.bf16.msra.mxu1 %v5646_v13  ;;  %v787_v12 = vld [vmem:[#allocation8 + $0x2a8] sm:$0xff]  ;;  %v789_v13 = vld [vmem:[#allocation8 + $0x2b8] sm:$0xff] }
 0x192   :  { %4337 = vmatprep.subr.bf16.mxu0 %v5653_v14  ;;  %4501 = vmatprep.subr.bf16.mxu1 %v5655_v16  ;;  %v5692_v14 = vcombine.low %v1106_v62, %v1110_v63  ;;  %v5694_v16 = vcombine.low %v1107_v1, %v1111_v2  ;;  %v1122_v18 = vunpack.c.l.s8.bf16 %v787_v12  ;;  %v1126_v19 = vunpack.c.l.s8.bf16 %v789_v13 }
 0x193   :  { %v1123_v20 = vunpack.c.h.s8.bf16 %v787_v12  ;;  %v1127_v21 = vunpack.c.h.s8.bf16 %v789_v13  ;;  %v1154_v63 = vunpack.c.l.s8.bf16 %v803_v56  ;;  %v1155_v2 = vunpack.c.h.s8.bf16 %v803_v56  ;;  %v811_v13 = vld [vmem:[#allocation8 + $0x368] sm:$0xff] }
 0x195   :  { %4338 = vmatpush1.bf16.msra.mxu0 %v5652_v23  ;;  %4502 = vmatpush1.bf16.msra.mxu1 %v5654_v24  ;;  %v793_v23 = vld [vmem:[#allocation8 + $0x2d8] sm:$0xff]  ;;  %v5700_v24 = vcombine.low %v1114_v6, %v1118_v7  ;;  %v5711_v32 = vcombine.high %v1123_v20, %v1127_v21  ;;  %v1162_v7 = vunpack.c.l.s8.bf16 %v807_v4 }
 0x196   :  { %4339 = vmatprep.subr.bf16.mxu0 %v5661_v31  ;;  %4503 = vmatprep.subr.bf16.mxu1 %v5663_v33  ;;  %v1134_v28 = vunpack.c.l.s8.bf16 %v793_v23  ;;  %v1135_v31 = vunpack.c.h.s8.bf16 %v793_v23  ;;  %v5709_v33 = vcombine.high %v1122_v18, %v1126_v19  ;;  %v815_v23 = vld [vmem:[#allocation8 + $0x388] sm:$0xff] }
 0x198   :  { %v5719_v39 = vcombine.high %v1131_v29, %v1135_v31  ;;  %v5718_v48 = vcombine.low %v1131_v29, %v1135_v31  ;;  %v1179_v31 = vunpack.c.h.s8.bf16 %v815_v23 }
 0x199   :  { %4340 = vmatpush1.bf16.msra.mxu0 %v5660_v35  ;;  %4504 = vmatpush1.bf16.msra.mxu1 %v5662_v36  ;;  %v797_v35 = vld [vmem:[#allocation8 + $0x2f8] sm:$0xff]  ;;  %v5708_v36 = vcombine.low %v1122_v18, %v1126_v19  ;;  %v1170_v19 = vunpack.c.l.s8.bf16 %v811_v13 }
 0x19a   :  { %4350 = vmatprep.subr.bf16.mxu0 %v5669_v37  ;;  %4514 = vmatprep.subr.bf16.mxu1 %v5671_v38  ;;  %v5710_v37 = vcombine.low %v1123_v20, %v1127_v21  ;;  %v5717_v38 = vcombine.high %v1130_v26, %v1134_v28  ;;  %v1142_v41 = vunpack.c.l.s8.bf16 %v797_v35  ;;  %v1143_v44 = vunpack.c.h.s8.bf16 %v797_v35  ;;  %v819_v35 = vld [vmem:[#allocation8 + $0x3a8] sm:$0xff] }
 0x19b   :  { %v1171_v21 = vunpack.c.h.s8.bf16 %v811_v13 }
 0x19c   :  { %4342 = vmatmul.mubr.bf16.vlgmr.msra.gmra.mrb[4].mxu0 %v6526_v52  ;;  %4506 = vmatmul.mubr.bf16.vlgmr.msra.gmra.mrb[4].mxu1 %v6526_v52  ;;  %v5686_v52 = vcombine.low %v1099_v50, %v1103_v51  ;;  %v1147_v51 = vunpack.c.h.s8.bf16 %v799_v45  ;;  %v5727_v55 = vcombine.high %v1139_v42, %v1143_v44 }
 0x19d   :  { %4351 = vmatpush1.bf16.msra.mxu0 %v5668_v46  ;;  %4515 = vmatpush1.bf16.msra.mxu1 %v5670_v47  ;;  %v801_v46 = vld [vmem:[#allocation8 + $0x318] sm:$0xff]  ;;  %v5716_v47 = vcombine.low %v1130_v26, %v1134_v28  ;;  %v1178_v28 = vunpack.c.l.s8.bf16 %v815_v23 }
 0x19e   :  { %4352 = vmatprep.subr.bf16.mxu0 %v5677_v53  ;;  %4516 = vmatprep.subr.bf16.mxu1 %v5679_v54  ;;  %v1150_v50 = vunpack.c.l.s8.bf16 %v801_v46  ;;  %v1151_v53 = vunpack.c.h.s8.bf16 %v801_v46  ;;  %v5725_v54 = vcombine.high %v1138_v40, %v1142_v41  ;;  %v823_v46 = vld [vmem:[#allocation8 + $0x3c8] sm:$0xff] }
 0x19f   :  { %4382 = vmatprep.mubr.bf16.mxu0 %v6528_v0  ;;  %4546 = vmatprep.mubr.bf16.mxu1 %v6528_v0  ;;  %v5703_v0 = vcombine.high %v1115_v8, %v1119_v9  ;;  %v1163_v9 = vunpack.c.h.s8.bf16 %v807_v4 }
 0x1a0   :  { %v5735_v62 = vcombine.high %v1147_v51, %v1151_v53  ;;  %v5734_v6 = vcombine.low %v1147_v51, %v1151_v53  ;;  %v1195_v53 = vunpack.c.h.s8.bf16 %v823_v46 }
 0x1a1   :  { %4353 = vmatpush1.bf16.msra.mxu0 %v5676_v57  ;;  %4517 = vmatpush1.bf16.msra.mxu1 %v5678_v59  ;;  %v805_v57 = vld [vmem:[#allocation8 + $0x338] sm:$0xff]  ;;  %v5724_v59 = vcombine.low %v1138_v40, %v1142_v41  ;;  %v1186_v41 = vunpack.c.l.s8.bf16 %v819_v35 }
 0x1a2   :  { %4354 = vmatprep.subr.bf16.mxu0 %v5685_v60  ;;  %4518 = vmatprep.subr.bf16.mxu1 %v5687_v61  ;;  %v5726_v60 = vcombine.low %v1139_v42, %v1143_v44  ;;  %v5733_v61 = vcombine.high %v1146_v49, %v1150_v50  ;;  %v1158_v1 = vunpack.c.l.s8.bf16 %v805_v57  ;;  %v1159_v3 = vunpack.c.h.s8.bf16 %v805_v57  ;;  %v827_v57 = vld [vmem:[#allocation8 + $0x3e8] sm:$0xff] }
 0x1a3   :  { %v1187_v44 = vunpack.c.h.s8.bf16 %v819_v35 }
 0x1a4   :  { %v5743_v12 = vcombine.high %v1155_v2, %v1159_v3 }
 0x1a5   :  { %4355 = vmatpush1.bf16.msra.mxu0 %v5684_v5  ;;  %4519 = vmatpush1.bf16.msra.mxu1 %v5686_v52  ;;  %v809_v5 = vld [vmem:[#allocation8 + $0x358] sm:$0xff]  ;;  %v5732_v52 = vcombine.low %v1146_v49, %v1150_v50  ;;  %v1194_v50 = vunpack.c.l.s8.bf16 %v823_v46 }
 0x1a6   :  { %4356 = vmatprep.subr.bf16.mxu0 %v5693_v10  ;;  %4520 = vmatprep.subr.bf16.mxu1 %v5695_v11  ;;  %v1166_v8 = vunpack.c.l.s8.bf16 %v809_v5  ;;  %v1167_v10 = vunpack.c.h.s8.bf16 %v809_v5  ;;  %v5741_v11 = vcombine.high %v1154_v63, %v1158_v1  ;;  %v831_v5 = vld [vmem:[#allocation8 + $0x408] sm:$0xff] }
 0x1a8   :  { %v5751_v18 = vcombine.high %v1163_v9, %v1167_v10  ;;  %v5750_v26 = vcombine.low %v1163_v9, %v1167_v10  ;;  %v1211_v10 = vunpack.c.h.s8.bf16 %v831_v5 }
 0x1a9   :  { %4357 = vmatpush1.bf16.msra.mxu0 %v5692_v14  ;;  %4521 = vmatpush1.bf16.msra.mxu1 %v5694_v16  ;;  %v813_v14 = vld [vmem:[#allocation8 + $0x378] sm:$0xff]  ;;  %v5740_v16 = vcombine.low %v1154_v63, %v1158_v1  ;;  %v1202_v1 = vunpack.c.l.s8.bf16 %v827_v57 }
 0x1aa   :  { %4358 = vmatprep.subr.bf16.mxu0 %v5701_v17  ;;  %4522 = vmatprep.subr.bf16.mxu1 %v5703_v0  ;;  %v5742_v17 = vcombine.low %v1155_v2, %v1159_v3  ;;  %v5749_v0 = vcombine.high %v1162_v7, %v1166_v8  ;;  %v1174_v20 = vunpack.c.l.s8.bf16 %v813_v14  ;;  %v1175_v22 = vunpack.c.h.s8.bf16 %v813_v14  ;;  %v835_v14 = vld [vmem:[#allocation8 + $0x428] sm:$0xff] }
 0x1ab   :  { %v1203_v3 = vunpack.c.h.s8.bf16 %v827_v57  ;;  %v851_v57 = vld [vmem:[#allocation8 + $0x4a8] sm:$0xff] }
 0x1ac   :  { %v5759_v34 = vcombine.high %v1171_v21, %v1175_v22 }
 0x1ad   :  { %4359 = vmatpush1.bf16.msra.mxu0 %v5700_v24  ;;  %4523 = vmatpush1.bf16.msra.mxu1 %v5702_v25  ;;  %v817_v24 = vld [vmem:[#allocation8 + $0x398] sm:$0xff]  ;;  %v5748_v25 = vcombine.low %v1162_v7, %v1166_v8  ;;  %v1210_v8 = vunpack.c.l.s8.bf16 %v831_v5 }
 0x1ae   :  { %4360 = vmatprep.subr.bf16.mxu0 %v5709_v33  ;;  %4524 = vmatprep.subr.bf16.mxu1 %v5711_v32  ;;  %v1182_v29 = vunpack.c.l.s8.bf16 %v817_v24  ;;  %v1183_v33 = vunpack.c.h.s8.bf16 %v817_v24  ;;  %v5757_v32 = vcombine.high %v1170_v19, %v1174_v20  ;;  %v839_v24 = vld [vmem:[#allocation8 + $0x448] sm:$0xff]  ;;  %v857_v5 = vld [vmem:[#allocation8 + $0x4d8] sm:$0xff] }
 0x1b0   :  { %v5767_v40 = vcombine.high %v1179_v31, %v1183_v33  ;;  %v5766_v49 = vcombine.low %v1179_v31, %v1183_v33  ;;  %v1227_v33 = vunpack.c.h.s8.bf16 %v839_v24 }
 0x1b1   :  { %4361 = vmatpush1.bf16.msra.mxu0 %v5708_v36  ;;  %4525 = vmatpush1.bf16.msra.mxu1 %v5710_v37  ;;  %v821_v36 = vld [vmem:[#allocation8 + $0x3b8] sm:$0xff]  ;;  %v5756_v37 = vcombine.low %v1170_v19, %v1174_v20  ;;  %v1218_v20 = vunpack.c.l.s8.bf16 %v835_v14 }
 0x1b2   :  { %4362 = vmatprep.subr.bf16.mxu0 %v5717_v38  ;;  %4526 = vmatprep.subr.bf16.mxu1 %v5719_v39  ;;  %v5758_v38 = vcombine.low %v1171_v21, %v1175_v22  ;;  %v5765_v39 = vcombine.high %v1178_v28, %v1182_v29  ;;  %v1190_v42 = vunpack.c.l.s8.bf16 %v821_v36  ;;  %v1191_v45 = vunpack.c.h.s8.bf16 %v821_v36  ;;  %v843_v36 = vld [vmem:[#allocation8 + $0x468] sm:$0xff] }
 0x1b3   :  { %v1219_v22 = vunpack.c.h.s8.bf16 %v835_v14  ;;  %v861_v14 = vld [vmem:[#allocation8 + $0x4f8] sm:$0xff] }
 0x1b4   :  { %v5775_v56 = vcombine.high %v1187_v44, %v1191_v45 }
 0x1b5   :  { %4363 = vmatpush1.bf16.msra.mxu0 %v5716_v47  ;;  %4527 = vmatpush1.bf16.msra.mxu1 %v5718_v48  ;;  %v825_v47 = vld [vmem:[#allocation8 + $0x3d8] sm:$0xff]  ;;  %v5764_v48 = vcombine.low %v1178_v28, %v1182_v29  ;;  %v1226_v29 = vunpack.c.l.s8.bf16 %v839_v24 }
 0x1b6   :  { %4364 = vmatprep.subr.bf16.mxu0 %v5725_v54  ;;  %4528 = vmatprep.subr.bf16.mxu1 %v5727_v55  ;;  %v1198_v51 = vunpack.c.l.s8.bf16 %v825_v47  ;;  %v1199_v54 = vunpack.c.h.s8.bf16 %v825_v47  ;;  %v5773_v55 = vcombine.high %v1186_v41, %v1190_v42  ;;  %v847_v47 = vld [vmem:[#allocation8 + $0x488] sm:$0xff]  ;;  %v865_v24 = vld [vmem:[#allocation8 + $0x518] sm:$0xff] }
 0x1b8   :  { %v5783_v63 = vcombine.high %v1195_v53, %v1199_v54  ;;  %v5782_v7 = vcombine.low %v1195_v53, %v1199_v54  ;;  %v1243_v53 = vunpack.c.h.s8.bf16 %v847_v47 }
 0x1b9   :  { %4365 = vmatpush1.bf16.msra.mxu0 %v5724_v59  ;;  %4529 = vmatpush1.bf16.msra.mxu1 %v5726_v60  ;;  %v829_v59 = vld [vmem:[#allocation8 + $0x3f8] sm:$0xff]  ;;  %v5772_v60 = vcombine.low %v1186_v41, %v1190_v42  ;;  %v1234_v42 = vunpack.c.l.s8.bf16 %v843_v36 }
 0x1ba   :  { %4366 = vmatprep.subr.bf16.mxu0 %v5733_v61  ;;  %4530 = vmatprep.subr.bf16.mxu1 %v5735_v62  ;;  %v5774_v61 = vcombine.low %v1187_v44, %v1191_v45  ;;  %v5781_v62 = vcombine.high %v1194_v50, %v1198_v51  ;;  %v1206_v2 = vunpack.c.l.s8.bf16 %v829_v59  ;;  %v1207_v4 = vunpack.c.h.s8.bf16 %v829_v59  ;;  %v853_v59 = vld [vmem:[#allocation8 + $0x4b8] sm:$0xff] }
 0x1bb   :  { %v1235_v45 = vunpack.c.h.s8.bf16 %v843_v36  ;;  %v869_v36 = vld [vmem:[#allocation8 + $0x538] sm:$0xff] }
 0x1bc   :  { %v5791_v13 = vcombine.high %v1203_v3, %v1207_v4 }
 0x1bd   :  { %4367 = vmatpush1.bf16.msra.mxu0 %v5732_v52  ;;  %4531 = vmatpush1.bf16.msra.mxu1 %v5734_v6  ;;  %v833_v52 = vld [vmem:[#allocation8 + $0x418] sm:$0xff]  ;;  %v5780_v6 = vcombine.low %v1194_v50, %v1198_v51  ;;  %v1242_v50 = vunpack.c.l.s8.bf16 %v847_v47 }
 0x1be   :  { %4368 = vmatprep.subr.bf16.mxu0 %v5741_v11  ;;  %4532 = vmatprep.subr.bf16.mxu1 %v5743_v12  ;;  %v1214_v9 = vunpack.c.l.s8.bf16 %v833_v52  ;;  %v1215_v11 = vunpack.c.h.s8.bf16 %v833_v52  ;;  %v5789_v12 = vcombine.high %v1202_v1, %v1206_v2  ;;  %v873_v47 = vld [vmem:[#allocation8 + $0x558] sm:$0xff] }
 0x1c0   :  { %v5799_v19 = vcombine.high %v1211_v10, %v1215_v11  ;;  %v5798_v28 = vcombine.low %v1211_v10, %v1215_v11  ;;  %v1263_v10 = vunpack.c.h.s8.bf16 %v857_v5 }
 0x1c1   :  { %4369 = vmatpush1.bf16.msra.mxu0 %v5740_v16  ;;  %4533 = vmatpush1.bf16.msra.mxu1 %v5742_v17  ;;  %v837_v16 = vld [vmem:[#allocation8 + $0x438] sm:$0xff]  ;;  %v5788_v17 = vcombine.low %v1202_v1, %v1206_v2  ;;  %v1254_v1 = vunpack.c.l.s8.bf16 %v853_v59  ;;  %v1251_v2 = vunpack.c.h.s8.bf16 %v851_v57 }
 0x1c2   :  { %4370 = vmatprep.subr.bf16.mxu0 %v5749_v0  ;;  %4534 = vmatprep.subr.bf16.mxu1 %v5751_v18  ;;  %v5790_v0 = vcombine.low %v1203_v3, %v1207_v4  ;;  %v5797_v18 = vcombine.high %v1210_v8, %v1214_v9  ;;  %v1222_v21 = vunpack.c.l.s8.bf16 %v837_v16  ;;  %v1223_v23 = vunpack.c.h.s8.bf16 %v837_v16  ;;  %v855_v4 = vld [vmem:[#allocation8 + $0x4c8] sm:$0xff] }
 0x1c3   :  { %v1255_v3 = vunpack.c.h.s8.bf16 %v853_v59 }
 0x1c4   :  { %v5807_v35 = vcombine.high %v1219_v22, %v1223_v23 }
 0x1c5   :  { %4371 = vmatpush1.bf16.msra.mxu0 %v5748_v25  ;;  %4535 = vmatpush1.bf16.msra.mxu1 %v5750_v26  ;;  %v841_v25 = vld [vmem:[#allocation8 + $0x458] sm:$0xff]  ;;  %v5796_v26 = vcombine.low %v1210_v8, %v1214_v9  ;;  %v1262_v8 = vunpack.c.l.s8.bf16 %v857_v5  ;;  %v1259_v9 = vunpack.c.h.s8.bf16 %v855_v4 }
 0x1c6   :  { %4372 = vmatprep.subr.bf16.mxu0 %v5757_v32  ;;  %4536 = vmatprep.subr.bf16.mxu1 %v5759_v34  ;;  %v1230_v31 = vunpack.c.l.s8.bf16 %v841_v25  ;;  %v1231_v32 = vunpack.c.h.s8.bf16 %v841_v25  ;;  %v5805_v34 = vcombine.high %v1218_v20, %v1222_v21 }
 0x1c8   :  { %v5815_v41 = vcombine.high %v1227_v33, %v1231_v32 }
 0x1c9   :  { %4373 = vmatpush1.bf16.msra.mxu0 %v5756_v37  ;;  %4537 = vmatpush1.bf16.msra.mxu1 %v5758_v38  ;;  %v845_v37 = vld [vmem:[#allocation8 + $0x478] sm:$0xff]  ;;  %v5804_v38 = vcombine.low %v1218_v20, %v1222_v21  ;;  %v1270_v20 = vunpack.c.l.s8.bf16 %v861_v14 }
 0x1ca   :  { %4374 = vmatprep.subr.bf16.mxu0 %v5765_v39  ;;  %4538 = vmatprep.subr.bf16.mxu1 %v5767_v40  ;;  %v5806_v39 = vcombine.low %v1219_v22, %v1223_v23  ;;  %v5813_v40 = vcombine.high %v1226_v29, %v1230_v31  ;;  %v1238_v44 = vunpack.c.l.s8.bf16 %v845_v37  ;;  %v1239_v46 = vunpack.c.h.s8.bf16 %v845_v37  ;;  %v863_v23 = vld [vmem:[#allocation8 + $0x508] sm:$0xff] }
 0x1cb   :  { %v1271_v22 = vunpack.c.h.s8.bf16 %v861_v14 }
 0x1cd   :  { %4375 = vmatpush1.bf16.msra.mxu0 %v5764_v48  ;;  %4539 = vmatpush1.bf16.msra.mxu1 %v5766_v49  ;;  %v849_v48 = vld [vmem:[#allocation8 + $0x498] sm:$0xff]  ;;  %v5812_v49 = vcombine.low %v1226_v29, %v1230_v31  ;;  %v1278_v29 = vunpack.c.l.s8.bf16 %v865_v24  ;;  %v1275_v31 = vunpack.c.h.s8.bf16 %v863_v23 }
 0x1ce   :  { %4376 = vmatprep.subr.bf16.mxu0 %v5773_v55  ;;  %4540 = vmatprep.subr.bf16.mxu1 %v5775_v56  ;;  %v1246_v51 = vunpack.c.l.s8.bf16 %v849_v48  ;;  %v1247_v54 = vunpack.c.h.s8.bf16 %v849_v48  ;;  %v5821_v55 = vcombine.high %v1234_v42, %v1238_v44  ;;  %v5823_v56 = vcombine.high %v1235_v45, %v1239_v46 }
 0x1d0   :  { %v5828_v52 = vcombine.low %v1242_v50, %v1246_v51 }
 0x1d1   :  { %4377 = vmatpush1.bf16.msra.mxu0 %v5772_v60  ;;  %4541 = vmatpush1.bf16.msra.mxu1 %v5774_v61  ;;  %v5820_v60 = vcombine.low %v1234_v42, %v1238_v44  ;;  %v5822_v61 = vcombine.low %v1235_v45, %v1239_v46  ;;  %v1286_v42 = vunpack.c.l.s8.bf16 %v869_v36  ;;  %v1287_v45 = vunpack.c.h.s8.bf16 %v869_v36  ;;  %v871_v46 = vld [vmem:[#allocation8 + $0x548] sm:$0xff] }
 0x1d2   :  { %4378 = vmatprep.subr.bf16.mxu0 %v5781_v62  ;;  %4542 = vmatprep.subr.bf16.mxu1 %v5783_v63  ;;  %v5829_v62 = vcombine.high %v1242_v50, %v1246_v51  ;;  %v1250_v63 = vunpack.c.l.s8.bf16 %v851_v57  ;;  %v1294_v50 = vunpack.c.l.s8.bf16 %v873_v47  ;;  %v1291_v51 = vunpack.c.h.s8.bf16 %v871_v46  ;;  %v877_v57 = vld [vmem:[#allocation8 + $0x578] sm:$0xff] }
 0x1d4   :  { %v5837_v11 = vcombine.high %v1250_v63, %v1254_v1  ;;  %v5836_v16 = vcombine.low %v1250_v63, %v1254_v1  ;;  %v1302_v63 = vunpack.c.l.s8.bf16 %v877_v57 }
 0x1d5   :  { %4379 = vmatpush1.bf16.msra.mxu0 %v5780_v6  ;;  %4543 = vmatpush1.bf16.msra.mxu1 %v5782_v7  ;;  %v5830_v6 = vcombine.low %v1243_v53, %v1247_v54  ;;  %v1258_v7 = vunpack.c.l.s8.bf16 %v855_v4  ;;  %v881_v4 = vld [vmem:[#allocation8 + $0x598] sm:$0xff] }
 0x1d6   :  { %4380 = vmatprep.subr.bf16.mxu0 %v5789_v12  ;;  %4544 = vmatprep.subr.bf16.mxu1 %v5791_v13  ;;  %v5839_v12 = vcombine.high %v1251_v2, %v1255_v3  ;;  %v859_v13 = vld [vmem:[#allocation8 + $0x4e8] sm:$0xff] }
 0x1d7   :  { %v1267_v21 = vunpack.c.h.s8.bf16 %v859_v13  ;;  %v5844_v25 = vcombine.low %v1258_v7, %v1262_v8 }
 0x1d9   :  { %4381 = vmatpush1.bf16.msra.mxu0 %v5788_v17  ;;  %4545 = vmatpush1.bf16.msra.mxu1 %v5790_v0  ;;  %v5838_v17 = vcombine.low %v1251_v2, %v1255_v3  ;;  %v5845_v0 = vcombine.high %v1258_v7, %v1262_v8  ;;  %v1303_v2 = vunpack.c.h.s8.bf16 %v877_v57  ;;  %v879_v3 = vld [vmem:[#allocation8 + $0x588] sm:$0xff]  ;;  %v1310_v7 = vunpack.c.l.s8.bf16 %v881_v4 }
 0x1da   :  { %4391 = vmatprep.subr.bf16.mxu0 %v5797_v18  ;;  %4555 = vmatprep.subr.bf16.mxu1 %v5799_v19  ;;  %v5847_v18 = vcombine.high %v1259_v9, %v1263_v10  ;;  %v1266_v19 = vunpack.c.l.s8.bf16 %v859_v13  ;;  %v1307_v8 = vunpack.c.h.s8.bf16 %v879_v3  ;;  %v885_v13 = vld [vmem:[#allocation8 + $0x5b8] sm:$0xff] }
 0x1dc   :  { %4383 = vmatmul.mubr.bf16.vlgmr.msra.gmra.mrb[4].mxu0 %v6534_v30  ;;  %4547 = vmatmul.mubr.bf16.vlgmr.msra.gmra.mrb[4].mxu1 %v6534_v30  ;;  %v5814_v30 = vcombine.low %v1227_v33, %v1231_v32  ;;  %v1279_v33 = vunpack.c.h.s8.bf16 %v865_v24  ;;  %v5853_v32 = vcombine.high %v1266_v19, %v1270_v20  ;;  %v5852_v37 = vcombine.low %v1266_v19, %v1270_v20 }
 0x1dd   :  { %4392 = vmatpush1.bf16.msra.mxu0 %v5796_v26  ;;  %4556 = vmatpush1.bf16.msra.mxu1 %v5798_v28  ;;  %v5846_v26 = vcombine.low %v1259_v9, %v1263_v10  ;;  %v1274_v28 = vunpack.c.l.s8.bf16 %v863_v23  ;;  %v1311_v9 = vunpack.c.h.s8.bf16 %v881_v4  ;;  %v1318_v19 = vunpack.c.l.s8.bf16 %v885_v13  ;;  %v889_v23 = vld [vmem:[#allocation8 + $0x5d8] sm:$0xff] }
 0x1de   :  { %4393 = vmatprep.subr.bf16.mxu0 %v5805_v34  ;;  %4557 = vmatprep.subr.bf16.mxu1 %v5807_v35  ;;  %v5855_v34 = vcombine.high %v1267_v21, %v1271_v22  ;;  %v867_v35 = vld [vmem:[#allocation8 + $0x528] sm:$0xff] }
 0x1df   :  { %4423 = vmatprep.mubr.bf16.mxu0 %v6536_v43  ;;  %4587 = vmatprep.mubr.bf16.mxu1 %v6536_v43  ;;  %v5831_v43 = vcombine.high %v1243_v53, %v1247_v54  ;;  %v1283_v44 = vunpack.c.h.s8.bf16 %v867_v35  ;;  %v5860_v48 = vcombine.low %v1274_v28, %v1278_v29  ;;  %v1295_v53 = vunpack.c.h.s8.bf16 %v873_v47 }
 0x1e1   :  { %4394 = vmatpush1.bf16.msra.mxu0 %v5804_v38  ;;  %4558 = vmatpush1.bf16.msra.mxu1 %v5806_v39  ;;  %v5854_v38 = vcombine.low %v1267_v21, %v1271_v22  ;;  %v5861_v39 = vcombine.high %v1274_v28, %v1278_v29  ;;  %v1319_v21 = vunpack.c.h.s8.bf16 %v885_v13  ;;  %v887_v22 = vld [vmem:[#allocation8 + $0x5c8] sm:$0xff]  ;;  %v1326_v28 = vunpack.c.l.s8.bf16 %v889_v23 }
 0x1e2   :  { %4395 = vmatprep.subr.bf16.mxu0 %v5813_v40  ;;  %4559 = vmatprep.subr.bf16.mxu1 %v5815_v41  ;;  %v5863_v40 = vcombine.high %v1275_v31, %v1279_v33  ;;  %v1282_v41 = vunpack.c.l.s8.bf16 %v867_v35  ;;  %v1323_v29 = vunpack.c.h.s8.bf16 %v887_v22  ;;  %v893_v35 = vld [vmem:[#allocation8 + $0x5f8] sm:$0xff] }
 0x1e4   :  { %v5869_v54 = vcombine.high %v1282_v41, %v1286_v42  ;;  %v5868_v59 = vcombine.low %v1282_v41, %v1286_v42  ;;  %v1334_v41 = vunpack.c.l.s8.bf16 %v893_v35 }
 0x1e5   :  { %4396 = vmatpush1.bf16.msra.mxu0 %v5812_v49  ;;  %4560 = vmatpush1.bf16.msra.mxu1 %v5814_v30  ;;  %v5862_v49 = vcombine.low %v1275_v31, %v1279_v33  ;;  %v1290_v30 = vunpack.c.l.s8.bf16 %v871_v46  ;;  %v1327_v31 = vunpack.c.h.s8.bf16 %v889_v23  ;;  %v897_v46 = vld [vmem:[#allocation8 + $0x618] sm:$0xff] }
 0x1e6   :  { %4397 = vmatprep.subr.bf16.mxu0 %v5821_v55  ;;  %4561 = vmatprep.subr.bf16.mxu1 %v5823_v56  ;;  %v5871_v55 = vcombine.high %v1283_v44, %v1287_v45  ;;  %v875_v56 = vld [vmem:[#allocation8 + $0x568] sm:$0xff] }
 0x1e7   :  { %v1299_v1 = vunpack.c.h.s8.bf16 %v875_v56  ;;  %v5876_v5 = vcombine.low %v1290_v30, %v1294_v50 }
 0x1e9   :  { %4398 = vmatpush1.bf16.msra.mxu0 %v5820_v60  ;;  %4562 = vmatpush1.bf16.msra.mxu1 %v5822_v61  ;;  %v5870_v60 = vcombine.low %v1283_v44, %v1287_v45  ;;  %v5877_v61 = vcombine.high %v1290_v30, %v1294_v50  ;;  %v1335_v44 = vunpack.c.h.s8.bf16 %v893_v35  ;;  %v895_v45 = vld [vmem:[#allocation8 + $0x608] sm:$0xff]  ;;  %v1342_v30 = vunpack.c.l.s8.bf16 %v897_v46 }
 0x1ea   :  { %4399 = vmatprep.subr.bf16.mxu0 %v5829_v62  ;;  %4563 = vmatprep.subr.bf16.mxu1 %v5831_v43  ;;  %v5879_v62 = vcombine.high %v1291_v51, %v1295_v53  ;;  %v1298_v43 = vunpack.c.l.s8.bf16 %v875_v56  ;;  %v1339_v50 = vunpack.c.h.s8.bf16 %v895_v45  ;;  %v901_v56 = vld [vmem:[#allocation8 + $0x638] sm:$0xff] }
 0x1ec   :  { %v5885_v10 = vcombine.high %v1298_v43, %v1302_v63  ;;  %v5884_v14 = vcombine.low %v1298_v43, %v1302_v63  ;;  %v1350_v43 = vunpack.c.l.s8.bf16 %v901_v56 }
 0x1ed   :  { %4400 = vmatpush1.bf16.msra.mxu0 %v5828_v52  ;;  %4564 = vmatpush1.bf16.msra.mxu1 %v5830_v6  ;;  %v5878_v52 = vcombine.low %v1291_v51, %v1295_v53  ;;  %v1306_v6 = vunpack.c.l.s8.bf16 %v879_v3  ;;  %v1343_v51 = vunpack.c.h.s8.bf16 %v897_v46  ;;  %v905_v3 = vld [vmem:[#allocation8 + $0x658] sm:$0xff] }
 0x1ee   :  { %4401 = vmatprep.subr.bf16.mxu0 %v5837_v11  ;;  %4565 = vmatprep.subr.bf16.mxu1 %v5839_v12  ;;  %v5887_v11 = vcombine.high %v1299_v1, %v1303_v2  ;;  %v883_v12 = vld [vmem:[#allocation8 + $0x5a8] sm:$0xff] }
 0x1ef   :  { %v1315_v20 = vunpack.c.h.s8.bf16 %v883_v12  ;;  %v5892_v24 = vcombine.low %v1306_v6, %v1310_v7 }
 0x1f1   :  { %4402 = vmatpush1.bf16.msra.mxu0 %v5836_v16  ;;  %4566 = vmatpush1.bf16.msra.mxu1 %v5838_v17  ;;  %v5886_v16 = vcombine.low %v1299_v1, %v1303_v2  ;;  %v5893_v17 = vcombine.high %v1306_v6, %v1310_v7  ;;  %v1351_v1 = vunpack.c.h.s8.bf16 %v901_v56  ;;  %v903_v2 = vld [vmem:[#allocation8 + $0x648] sm:$0xff]  ;;  %v1358_v6 = vunpack.c.l.s8.bf16 %v905_v3 }
 0x1f2   :  { %4403 = vmatprep.subr.bf16.mxu0 %v5845_v0  ;;  %4567 = vmatprep.subr.bf16.mxu1 %v5847_v18  ;;  %v5895_v0 = vcombine.high %v1307_v8, %v1311_v9  ;;  %v1314_v18 = vunpack.c.l.s8.bf16 %v883_v12  ;;  %v1355_v7 = vunpack.c.h.s8.bf16 %v903_v2  ;;  %v909_v12 = vld [vmem:[#allocation8 + $0x678] sm:$0xff] }
 0x1f4   :  { %v5901_v33 = vcombine.high %v1314_v18, %v1318_v19  ;;  %v5900_v36 = vcombine.low %v1314_v18, %v1318_v19  ;;  %v1366_v18 = vunpack.c.l.s8.bf16 %v909_v12 }
 0x1f5   :  { %4404 = vmatpush1.bf16.msra.mxu0 %v5844_v25  ;;  %4568 = vmatpush1.bf16.msra.mxu1 %v5846_v26  ;;  %v5894_v25 = vcombine.low %v1307_v8, %v1311_v9  ;;  %v1322_v26 = vunpack.c.l.s8.bf16 %v887_v22  ;;  %v1359_v8 = vunpack.c.h.s8.bf16 %v905_v3  ;;  %v913_v22 = vld [vmem:[#allocation8 + $0x698] sm:$0xff] }
 0x1f6   :  { %4405 = vmatprep.subr.bf16.mxu0 %v5853_v32  ;;  %4569 = vmatprep.subr.bf16.mxu1 %v5855_v34  ;;  %v5903_v32 = vcombine.high %v1315_v20, %v1319_v21  ;;  %v891_v34 = vld [vmem:[#allocation8 + $0x5e8] sm:$0xff] }
 0x1f7   :  { %v1331_v42 = vunpack.c.h.s8.bf16 %v891_v34  ;;  %v5908_v47 = vcombine.low %v1322_v26, %v1326_v28  ;;  %v5942_v23 = vcombine.low %v1355_v7, %v1359_v8 }
 0x1f9   :  { %4406 = vmatpush1.bf16.msra.mxu0 %v5852_v37  ;;  %4570 = vmatpush1.bf16.msra.mxu1 %v5854_v38  ;;  %v5902_v37 = vcombine.low %v1315_v20, %v1319_v21  ;;  %v5909_v38 = vcombine.high %v1322_v26, %v1326_v28  ;;  %v1367_v20 = vunpack.c.h.s8.bf16 %v909_v12  ;;  %v911_v21 = vld [vmem:[#allocation8 + $0x688] sm:$0xff]  ;;  %v1375_v28 = vunpack.c.h.s8.bf16 %v913_v22 }
 0x1fa   :  { %4407 = vmatprep.subr.bf16.mxu0 %v5861_v39  ;;  %4571 = vmatprep.subr.bf16.mxu1 %v5863_v40  ;;  %v5911_v39 = vcombine.high %v1323_v29, %v1327_v31  ;;  %v1330_v40 = vunpack.c.l.s8.bf16 %v891_v34  ;;  %v1371_v26 = vunpack.c.h.s8.bf16 %v911_v21 }
 0x1fc   :  { %v5917_v53 = vcombine.high %v1330_v40, %v1334_v41  ;;  %v5916_v57 = vcombine.low %v1330_v40, %v1334_v41  ;;  %v919_v41 = vld [vmem:[#allocation8 + $0x6c8] sm:$0xff] }
 0x1fd   :  { %4408 = vmatpush1.bf16.msra.mxu0 %v5860_v48  ;;  %4572 = vmatpush1.bf16.msra.mxu1 %v5862_v49  ;;  %v5910_v48 = vcombine.low %v1323_v29, %v1327_v31  ;;  %v1338_v49 = vunpack.c.l.s8.bf16 %v895_v45  ;;  %v5958_v45 = vcombine.low %v1371_v26, %v1375_v28  ;;  %v1386_v46 = vunpack.c.l.s8.bf16 %v919_v41 }
 0x1fe   :  { %4409 = vmatprep.subr.bf16.mxu0 %v5869_v54  ;;  %4573 = vmatprep.subr.bf16.mxu1 %v5871_v55  ;;  %v5919_v54 = vcombine.high %v1331_v42, %v1335_v44  ;;  %v899_v55 = vld [vmem:[#allocation8 + $0x628] sm:$0xff] }
 0x1ff   :  { %v1347_v63 = vunpack.c.h.s8.bf16 %v899_v55  ;;  %v5924_v4 = vcombine.low %v1338_v49, %v1342_v30 }
 0x201   :  { %4410 = vmatpush1.bf16.msra.mxu0 %v5868_v59  ;;  %4574 = vmatpush1.bf16.msra.mxu1 %v5870_v60  ;;  %v5918_v59 = vcombine.low %v1331_v42, %v1335_v44  ;;  %v5925_v60 = vcombine.high %v1338_v49, %v1342_v30  ;;  %v921_v42 = vld [vmem:[#allocation8 + $0x6d8] sm:$0xff] }
 0x202   :  { %4411 = vmatprep.subr.bf16.mxu0 %v5877_v61  ;;  %4575 = vmatprep.subr.bf16.mxu1 %v5879_v62  ;;  %v5927_v61 = vcombine.high %v1339_v50, %v1343_v51  ;;  %v1346_v62 = vunpack.c.l.s8.bf16 %v899_v55  ;;  %v1391_v49 = vunpack.c.h.s8.bf16 %v921_v42 }
 0x204   :  { %v5933_v9 = vcombine.high %v1346_v62, %v1350_v43  ;;  %v5932_v13 = vcombine.low %v1346_v62, %v1350_v43  ;;  %v927_v43 = vld [vmem:[#allocation8 + $0x708] sm:$0xff] }
 0x205   :  { %4412 = vmatpush1.bf16.msra.mxu0 %v5876_v5  ;;  %4576 = vmatpush1.bf16.msra.mxu1 %v5878_v52  ;;  %v5926_v5 = vcombine.low %v1339_v50, %v1343_v51  ;;  %v1354_v52 = vunpack.c.l.s8.bf16 %v903_v2  ;;  %v923_v51 = vld [vmem:[#allocation8 + $0x6e8] sm:$0xff]  ;;  %v1402_v3 = vunpack.c.l.s8.bf16 %v927_v43 }
 0x206   :  { %4413 = vmatprep.subr.bf16.mxu0 %v5885_v10  ;;  %4577 = vmatprep.subr.bf16.mxu1 %v5887_v11  ;;  %v5935_v10 = vcombine.high %v1347_v63, %v1351_v1  ;;  %v907_v11 = vld [vmem:[#allocation8 + $0x668] sm:$0xff] }
 0x207   :  { %v1363_v19 = vunpack.c.h.s8.bf16 %v907_v11 }
 0x209   :  { %4414 = vmatpush1.bf16.msra.mxu0 %v5884_v14  ;;  %4578 = vmatpush1.bf16.msra.mxu1 %v5886_v16  ;;  %v5934_v14 = vcombine.low %v1347_v63, %v1351_v1  ;;  %v5941_v16 = vcombine.high %v1354_v52, %v1358_v6  ;;  %v5951_v31 = vcombine.high %v1363_v19, %v1367_v20  ;;  %v929_v63 = vld [vmem:[#allocation8 + $0x718] sm:$0xff] }
 0x20a   :  { %4415 = vmatprep.subr.bf16.mxu0 %v5893_v17  ;;  %4579 = vmatprep.subr.bf16.mxu1 %v5895_v0  ;;  %v5943_v17 = vcombine.high %v1355_v7, %v1359_v8  ;;  %v1362_v0 = vunpack.c.l.s8.bf16 %v907_v11  ;;  %v5950_v35 = vcombine.low %v1363_v19, %v1367_v20  ;;  %v931_v8 = vld [vmem:[#allocation8 + $0x728] sm:$0xff]  ;;  %v937_v19 = vld [vmem:[#allocation8 + $0x758] sm:$0xff] }
 0x20c   :  { %v5949_v29 = vcombine.high %v1362_v0, %v1366_v18  ;;  %v5948_v34 = vcombine.low %v1362_v0, %v1366_v18  ;;  %v935_v18 = vld [vmem:[#allocation8 + $0x748] sm:$0xff] }
 0x20d   :  { %4416 = vmatpush1.bf16.msra.mxu0 %v5892_v24  ;;  %4580 = vmatpush1.bf16.msra.mxu1 %v5894_v25  ;;  %v1370_v24 = vunpack.c.l.s8.bf16 %v911_v21  ;;  %v1374_v25 = vunpack.c.l.s8.bf16 %v913_v22  ;;  %v1418_v22 = vunpack.c.l.s8.bf16 %v935_v18 }
 0x20e   :  { %4417 = vmatprep.subr.bf16.mxu0 %v5901_v33  ;;  %4581 = vmatprep.subr.bf16.mxu1 %v5903_v32  ;;  %v915_v33 = vld [vmem:[#allocation8 + $0x6a8] sm:$0xff]  ;;  %v917_v32 = vld [vmem:[#allocation8 + $0x6b8] sm:$0xff] }
 0x20f   :  { %v1383_v40 = vunpack.c.h.s8.bf16 %v917_v32  ;;  %v5956_v44 = vcombine.low %v1370_v24, %v1374_v25 }
 0x211   :  { %4418 = vmatpush1.bf16.msra.mxu0 %v5900_v36  ;;  %4582 = vmatpush1.bf16.msra.mxu1 %v5902_v37  ;;  %v5957_v36 = vcombine.high %v1370_v24, %v1374_v25  ;;  %v1378_v37 = vunpack.c.l.s8.bf16 %v915_v33  ;;  %v1423_v24 = vunpack.c.h.s8.bf16 %v937_v19 }
 0x212   :  { %4419 = vmatprep.subr.bf16.mxu0 %v5909_v38  ;;  %4583 = vmatprep.subr.bf16.mxu1 %v5911_v39  ;;  %v1382_v38 = vunpack.c.l.s8.bf16 %v917_v32  ;;  %v1379_v39 = vunpack.c.h.s8.bf16 %v915_v33 }
 0x214   :  { %v5965_v30 = vcombine.high %v1378_v37, %v1382_v38  ;;  %v5967_v50 = vcombine.high %v1379_v39, %v1383_v40  ;;  %v5966_v55 = vcombine.low %v1379_v39, %v1383_v40  ;;  %v945_v39 = vld [vmem:[#allocation8 + $0x798] sm:$0xff] }
 0x215   :  { %4420 = vmatpush1.bf16.msra.mxu0 %v5908_v47  ;;  %4584 = vmatpush1.bf16.msra.mxu1 %v5910_v48  ;;  %v1390_v47 = vunpack.c.l.s8.bf16 %v921_v42  ;;  %v1387_v48 = vunpack.c.h.s8.bf16 %v919_v41 }
 0x216   :  { %4421 = vmatprep.subr.bf16.mxu0 %v5917_v53  ;;  %4585 = vmatprep.subr.bf16.mxu1 %v5919_v54  ;;  %v925_v53 = vld [vmem:[#allocation8 + $0x6f8] sm:$0xff]  ;;  %v5964_v54 = vcombine.low %v1378_v37, %v1382_v38  ;;  %v943_v38 = vld [vmem:[#allocation8 + $0x788] sm:$0xff] }
 0x217   :  { %v5973_v56 = vcombine.high %v1386_v46, %v1390_v47  ;;  %v1399_v62 = vunpack.c.h.s8.bf16 %v925_v53  ;;  %v5972_v1 = vcombine.low %v1386_v46, %v1390_v47  ;;  %v5974_v2 = vcombine.low %v1387_v48, %v1391_v49 }
 0x218   :  { %v1434_v42 = vunpack.c.l.s8.bf16 %v943_v38  ;;  %v1439_v46 = vunpack.c.h.s8.bf16 %v945_v39 }
 0x219   :  { %4422 = vmatpush1.bf16.msra.mxu0 %v5916_v57  ;;  %4586 = vmatpush1.bf16.msra.mxu1 %v5918_v59  ;;  %v5975_v57 = vcombine.high %v1387_v48, %v1391_v49  ;;  %v1394_v59 = vunpack.c.l.s8.bf16 %v923_v51  ;;  %v947_v49 = vld [vmem:[#allocation8 + $0x7a8] sm:$0xff] }
 0x21a   :  { %4432 = vmatprep.subr.bf16.mxu0 %v5925_v60  ;;  %4596 = vmatprep.subr.bf16.mxu1 %v5927_v61  ;;  %v1398_v60 = vunpack.c.l.s8.bf16 %v925_v53  ;;  %v1395_v61 = vunpack.c.h.s8.bf16 %v923_v51 }
 0x21c   :  { %4424 = vmatmul.mubr.bf16.vlgmr.msra.gmra.mrb[4].mxu0 %v6542_v15  ;;  %4588 = vmatmul.mubr.bf16.vlgmr.msra.gmra.mrb[4].mxu1 %v6542_v15  ;;  %v5940_v15 = vcombine.low %v1354_v52, %v1358_v6  ;;  %v1407_v52 = vunpack.c.h.s8.bf16 %v929_v63  ;;  %v5981_v6 = vcombine.high %v1394_v59, %v1398_v60  ;;  %v5983_v7 = vcombine.high %v1395_v61, %v1399_v62 }
 0x21d   :  { %4433 = vmatpush1.bf16.msra.mxu0 %v5924_v4  ;;  %4597 = vmatpush1.bf16.msra.mxu1 %v5926_v5  ;;  %v1406_v4 = vunpack.c.l.s8.bf16 %v929_v63  ;;  %v1403_v5 = vunpack.c.h.s8.bf16 %v927_v43  ;;  %v5982_v11 = vcombine.low %v1395_v61, %v1399_v62 }
 0x21e   :  { %4434 = vmatprep.subr.bf16.mxu0 %v5933_v9  ;;  %4598 = vmatprep.subr.bf16.mxu1 %v5935_v10  ;;  %v933_v9 = vld [vmem:[#allocation8 + $0x738] sm:$0xff]  ;;  %v5980_v10 = vcombine.low %v1394_v59, %v1398_v60  ;;  %v951_v60 = vld [vmem:[#allocation8 + $0x7c8] sm:$0xff] }
 0x21f   :  { %6045 = vmatprep.mubr.msk.bf16.mxu0 %vm3952_vm0, %v6544_v27  ;;  %6047 = vmatprep.mubr.msk.bf16.mxu1 %vm3952_vm0, %v6544_v27  ;;  %v5959_v27 = vcombine.high %v1371_v26, %v1375_v28  ;;  %v5989_v12 = vcombine.high %v1402_v3, %v1406_v4  ;;  %v1415_v0 = vunpack.c.h.s8.bf16 %v933_v9  ;;  %v5988_v20 = vcombine.low %v1402_v3, %v1406_v4  ;;  %v939_v28 = vld [vmem:[#allocation8 + $0x768] sm:$0xff] }
 0x220   :  { %v5990_v21 = vcombine.low %v1403_v5, %v1407_v52  ;;  %v1450_v43 = vunpack.c.l.s8.bf16 %v951_v60 }
 0x221   :  { %4435 = vmatpush1.bf16.msra.mxu0 %v5932_v13  ;;  %4599 = vmatpush1.bf16.msra.mxu1 %v5934_v14  ;;  %v5991_v13 = vcombine.high %v1403_v5, %v1407_v52  ;;  %v1410_v14 = vunpack.c.l.s8.bf16 %v931_v8 }
 0x222   :  { %4436 = vmatprep.subr.bf16.mxu0 %v5941_v16  ;;  %4600 = vmatprep.subr.bf16.mxu1 %v5943_v17  ;;  %v1414_v16 = vunpack.c.l.s8.bf16 %v933_v9  ;;  %v1411_v17 = vunpack.c.h.s8.bf16 %v931_v8  ;;  %v6037_v5 = vcombine.high %v1450_v43, %v1450_v43  ;;  %v127_v8 = vld [vmem:[#allocation7 + $0x8] sm:$0xff]  ;;  %v129_v9 = vld [vmem:[#allocation7 + $0x18] sm:$0xff] }
 0x224   :  { %v5997_v25 = vcombine.high %v1410_v14, %v1414_v16  ;;  %v5999_v26 = vcombine.high %v1411_v17, %v1415_v0  ;;  %v5998_v33 = vcombine.low %v1411_v17, %v1415_v0  ;;  %v99_v17 = vld [vmem:[#allocation2 + $0x8] sm:$0xff] }
 0x225   :  { %4437 = vmatpush1.bf16.msra.mxu0 %v5940_v15  ;;  %4601 = vmatpush1.bf16.msra.mxu1 %v5942_v23  ;;  %v1422_v15 = vunpack.c.l.s8.bf16 %v937_v19  ;;  %v1419_v23 = vunpack.c.h.s8.bf16 %v935_v18  ;;  %v327_v19 = vunpack.c.h.s8.bf16 %v127_v8 }
 0x226   :  { %4438 = vmatprep.subr.bf16.mxu0 %v5949_v29  ;;  %4602 = vmatprep.subr.bf16.mxu1 %v5951_v31  ;;  %v941_v29 = vld [vmem:[#allocation8 + $0x778] sm:$0xff]  ;;  %v5996_v31 = vcombine.low %v1410_v14, %v1414_v16  ;;  %v126_v14 = vld [vmem:[#allocation7] sm:$0xff]  ;;  %v128_v16 = vld [vmem:[#allocation7 + $0x10] sm:$0xff] }
 0x227   :  { %v6005_v32 = vcombine.high %v1418_v22, %v1422_v15  ;;  %v1431_v37 = vunpack.c.h.s8.bf16 %v941_v29  ;;  %v6004_v40 = vcombine.low %v1418_v22, %v1422_v15  ;;  %v6006_v41 = vcombine.low %v1419_v23, %v1423_v24  ;;  %v137_v22 = vld [vmem:[#allocation7 + $0x58] sm:$0xff] }
 0x228   :  { %v318_v0 = vunpack.c.l.s8.bf16 %v126_v14  ;;  %v320_v18 = vunpack.c.l.s8.bf16 %v128_v16  ;;  %v6580_v15 = vpack.c.bf16 %v99_v17, %v99_v17 }
 0x229   :  { %4439 = vmatpush1.bf16.msra.mxu0 %v5948_v34  ;;  %4603 = vmatpush1.bf16.msra.mxu1 %v5950_v35  ;;  %v6007_v34 = vcombine.high %v1419_v23, %v1423_v24  ;;  %v1426_v35 = vunpack.c.l.s8.bf16 %v939_v28  ;;  %v326_v23 = vunpack.c.h.s8.bf16 %v126_v14  ;;  %v328_v24 = vunpack.c.h.s8.bf16 %v128_v16 }
 0x22a   :  { %4440 = vmatprep.subr.bf16.mxu0 %v5957_v36  ;;  %4604 = vmatprep.subr.bf16.mxu1 %v5959_v27  ;;  %v1430_v36 = vunpack.c.l.s8.bf16 %v941_v29  ;;  %v1427_v27 = vunpack.c.h.s8.bf16 %v939_v28  ;;  %v134_v28 = vld [vmem:[#allocation7 + $0x40] sm:$0xff]  ;;  %v136_v29 = vld [vmem:[#allocation7 + $0x50] sm:$0xff] }
 0x22c   :  { %v6013_v47 = vcombine.high %v1426_v35, %v1430_v36  ;;  %v6015_v48 = vcombine.high %v1427_v27, %v1431_v37  ;;  %v6014_v51 = vcombine.low %v1427_v27, %v1431_v37  ;;  %v344_v27 = vunpack.c.h.s8.bf16 %v136_v29 }
 0x22d   :  { %4441 = vmatpush1.bf16.msra.mxu0 %v5956_v44  ;;  %4605 = vmatpush1.bf16.msra.mxu1 %v5958_v45  ;;  %v1438_v44 = vunpack.c.l.s8.bf16 %v945_v39  ;;  %v1435_v45 = vunpack.c.h.s8.bf16 %v943_v38  ;;  %v142_v39 = vld [vmem:[#allocation7 + $0x80] sm:$0xff] }
 0x22e   :  { %4442 = vmatprep.subr.bf16.mxu0 %v5965_v30  ;;  %4606 = vmatprep.subr.bf16.mxu1 %v5967_v50  ;;  %v949_v30 = vld [vmem:[#allocation8 + $0x7b8] sm:$0xff]  ;;  %v6012_v50 = vcombine.low %v1426_v35, %v1430_v36  ;;  %v342_v36 = vunpack.c.h.s8.bf16 %v134_v28 }
 0x22f   :  { %v6021_v53 = vcombine.high %v1434_v42, %v1438_v44  ;;  %v1447_v59 = vunpack.c.h.s8.bf16 %v949_v30  ;;  %v6020_v61 = vcombine.low %v1434_v42, %v1438_v44  ;;  %v6022_v62 = vcombine.low %v1435_v45, %v1439_v46  ;;  %v145_v35 = vld [vmem:[#allocation7 + $0x98] sm:$0xff] }
 0x230   :  { %v353_v38 = vunpack.c.l.s8.bf16 %v145_v35 }
 0x231   :  { %4443 = vmatpush1.bf16.msra.mxu0 %v5964_v54  ;;  %4607 = vmatpush1.bf16.msra.mxu1 %v5966_v55  ;;  %v6023_v54 = vcombine.high %v1435_v45, %v1439_v46  ;;  %v1442_v55 = vunpack.c.l.s8.bf16 %v947_v49  ;;  %v361_v45 = vunpack.c.h.s8.bf16 %v145_v35  ;;  %v151_v46 = vld [vmem:[#allocation7 + $0xc8] sm:$0xff] }
 0x232   :  { %4444 = vmatprep.subr.bf16.mxu0 %v5973_v56  ;;  %4608 = vmatprep.subr.bf16.mxu1 %v5975_v57  ;;  %v1446_v56 = vunpack.c.l.s8.bf16 %v949_v30  ;;  %v1443_v57 = vunpack.c.h.s8.bf16 %v947_v49  ;;  %v367_v30 = vunpack.c.l.s8.bf16 %v151_v46 }
 0x234   :  { %v6029_v63 = vcombine.high %v1442_v55, %v1446_v56  ;;  %v6028_v3 = vcombine.low %v1442_v55, %v1446_v56  ;;  %v6030_v4 = vcombine.low %v1443_v57, %v1447_v59  ;;  %v375_v56 = vunpack.c.h.s8.bf16 %v151_v46 }
 0x235   :  { %4445 = vmatpush1.bf16.msra.mxu0 %v5972_v1  ;;  %4609 = vmatpush1.bf16.msra.mxu1 %v5974_v2  ;;  %v6031_v1 = vcombine.high %v1443_v57, %v1447_v59  ;;  %v1451_v2 = vunpack.c.h.s8.bf16 %v951_v60  ;;  %v159_v59 = vld [vmem:[#allocation7 + $0x108] sm:$0xff]  ;;  %v161_v60 = vld [vmem:[#allocation7 + $0x118] sm:$0xff] }
 0x236   :  { %4446 = vmatprep.subr.bf16.mxu0 %v5981_v6  ;;  %4610 = vmatprep.subr.bf16.mxu1 %v5983_v7  ;;  %v6036_v6 = vcombine.low %v1450_v43, %v1450_v43  ;;  %v383_v43 = vunpack.c.l.s8.bf16 %v159_v59 }
 0x237   :  { %v6039_v52 = vcombine.high %v1451_v2, %v1451_v2  ;;  %v6038_v7 = vcombine.low %v1451_v2, %v1451_v2  ;;  %v160_v2 = vld [vmem:[#allocation7 + $0x110] sm:$0xff] }
 0x239   :  { %4447 = vmatpush1.bf16.msra.mxu0 %v5980_v10  ;;  %4611 = vmatpush1.bf16.msra.mxu1 %v5982_v11  ;;  %v3970_v10 = vsel %vm3956_vm1, %v6036_v6, 0  ;;  %v3976_v11 = vsel %vm3956_vm1, %v6038_v7, 0  ;;  %v167_v6 = vld [vmem:[#allocation7 + $0x148] sm:$0xff]  ;;  %v169_v7 = vld [vmem:[#allocation7 + $0x158] sm:$0xff] }
 0x23a   :  { %4448 = vmatprep.subr.bf16.mxu0 %v5989_v12  ;;  %4612 = vmatprep.subr.bf16.mxu1 %v5991_v13  ;;  %v319_v12 = vunpack.c.l.s8.bf16 %v127_v8  ;;  %v321_v13 = vunpack.c.l.s8.bf16 %v129_v9  ;;  %v407_v17 = vunpack.c.h.s8.bf16 %v167_v6 }
 0x23d   :  { %4449 = vmatpush1.bf16.msra.mxu0 %v5988_v20  ;;  %4613 = vmatpush1.bf16.msra.mxu1 %v5990_v21  ;;  %v329_v20 = vunpack.c.h.s8.bf16 %v129_v9  ;;  %v135_v21 = vld [vmem:[#allocation7 + $0x48] sm:$0xff]  ;;  %v392_v9 = vunpack.c.h.s8.bf16 %v160_v2 }
 0x23e   :  { %4450 = vmatprep.subr.bf16.mxu0 %v5997_v25  ;;  %4614 = vmatprep.subr.bf16.mxu1 %v5999_v26  ;;  %v335_v25 = vunpack.c.l.s8.bf16 %v135_v21  ;;  %v337_v26 = vunpack.c.l.s8.bf16 %v137_v22 }
 0x241   :  { %4451 = vmatpush1.bf16.msra.mxu0 %v5996_v31  ;;  %4615 = vmatpush1.bf16.msra.mxu1 %v5998_v33  ;;  %v334_v31 = vunpack.c.l.s8.bf16 %v134_v28  ;;  %v336_v33 = vunpack.c.l.s8.bf16 %v136_v29 }
 0x242   :  { %4452 = vmatprep.subr.bf16.mxu0 %v6005_v32  ;;  %4616 = vmatprep.subr.bf16.mxu1 %v6007_v34  ;;  %v345_v32 = vunpack.c.h.s8.bf16 %v137_v22  ;;  %v143_v34 = vld [vmem:[#allocation7 + $0x88] sm:$0xff] }
 0x243   :  { %v351_v37 = vunpack.c.l.s8.bf16 %v143_v34  ;;  %v359_v44 = vunpack.c.h.s8.bf16 %v143_v34 }
 0x245   :  { %4453 = vmatpush1.bf16.msra.mxu0 %v6004_v40  ;;  %4617 = vmatpush1.bf16.msra.mxu1 %v6006_v41  ;;  %v144_v40 = vld [vmem:[#allocation7 + $0x90] sm:$0xff]  ;;  %v350_v41 = vunpack.c.l.s8.bf16 %v142_v39 }
 0x246   :  { %4454 = vmatprep.subr.bf16.mxu0 %v6013_v47  ;;  %4618 = vmatprep.subr.bf16.mxu1 %v6015_v48  ;;  %v352_v42 = vunpack.c.l.s8.bf16 %v144_v40  ;;  %v153_v47 = vld [vmem:[#allocation7 + $0xd8] sm:$0xff]  ;;  %v358_v48 = vunpack.c.h.s8.bf16 %v142_v39  ;;  %v360_v49 = vunpack.c.h.s8.bf16 %v144_v40 }
 0x247   :  { %v377_v57 = vunpack.c.h.s8.bf16 %v153_v47 }
 0x249   :  { %4455 = vmatpush1.bf16.msra.mxu0 %v6012_v50  ;;  %4619 = vmatpush1.bf16.msra.mxu1 %v6014_v51  ;;  %v369_v50 = vunpack.c.l.s8.bf16 %v153_v47  ;;  %v150_v51 = vld [vmem:[#allocation7 + $0xc0] sm:$0xff]  ;;  %v98_v47 = vld [vmem:[#allocation2] sm:$0xff] }
 0x24a   :  { %4456 = vmatprep.subr.bf16.mxu0 %v6021_v53  ;;  %4620 = vmatprep.subr.bf16.mxu1 %v6023_v54  ;;  %v152_v53 = vld [vmem:[#allocation7 + $0xd0] sm:$0xff]  ;;  %v366_v54 = vunpack.c.l.s8.bf16 %v150_v51 }
 0x24b   :  { %v368_v55 = vunpack.c.l.s8.bf16 %v152_v53 }
 0x24d   :  { %4457 = vmatpush1.bf16.msra.mxu0 %v6020_v61  ;;  %4621 = vmatpush1.bf16.msra.mxu1 %v6022_v62  ;;  %v374_v61 = vunpack.c.h.s8.bf16 %v150_v51  ;;  %v376_v62 = vunpack.c.h.s8.bf16 %v152_v53  ;;  %v6586_v51 = vpack.c.bf16 %v98_v47, %v98_v47  ;;  %v101_v53 = vld [vmem:[#allocation2 + $0x18] sm:$0xff] }
 0x24e   :  { %4458 = vmatprep.subr.bf16.mxu0 %v6029_v63  ;;  %4622 = vmatprep.subr.bf16.mxu1 %v6031_v1  ;;  %v385_v63 = vunpack.c.l.s8.bf16 %v161_v60  ;;  %v158_v1 = vld [vmem:[#allocation7 + $0x100] sm:$0xff] }
 0x24f   :  { %v390_v8 = vunpack.c.h.s8.bf16 %v158_v1 }
 0x251   :  { %4459 = vmatpush1.bf16.msra.mxu0 %v6028_v3  ;;  %4623 = vmatpush1.bf16.msra.mxu1 %v6030_v4  ;;  %v382_v3 = vunpack.c.l.s8.bf16 %v158_v1  ;;  %v384_v4 = vunpack.c.l.s8.bf16 %v160_v2  ;;  %v198_v2 = vld [vmem:[#allocation7 + $0x240] sm:$0xff] }
 0x252   :  { %6044 = vmatprep.subr.msk.bf16.mxu0 %vm3956_vm1, %v6037_v5  ;;  %6046 = vmatprep.subr.msk.bf16.mxu1 %vm3956_vm1, %v6039_v52  ;;  %v391_v5 = vunpack.c.h.s8.bf16 %v159_v59  ;;  %v393_v52 = vunpack.c.h.s8.bf16 %v161_v60  ;;  %v199_v59 = vld [vmem:[#allocation7 + $0x248] sm:$0xff]  ;;  %v201_v60 = vld [vmem:[#allocation7 + $0x258] sm:$0xff] }
 0x253   :  { %v465_v1 = vunpack.c.l.s8.bf16 %v201_v60 }
 0x255   :  { %4461 = vmatpush1.bf16.msra.mxu0 %v3970_v10  ;;  %4625 = vmatpush1.bf16.msra.mxu1 %v3976_v11  ;;  %v399_v10 = vunpack.c.l.s8.bf16 %v167_v6  ;;  %v401_v11 = vunpack.c.l.s8.bf16 %v169_v7  ;;  %v473_v6 = vunpack.c.h.s8.bf16 %v201_v60 }
 0x256   :  { %4637 = vmatprep.subr.bf16.mxu0 %v319_v12  ;;  %4760 = vmatprep.subr.bf16.mxu1 %v321_v13  ;;  %v166_v12 = vld [vmem:[#allocation7 + $0x140] sm:$0xff]  ;;  %v168_v13 = vld [vmem:[#allocation7 + $0x150] sm:$0xff] }
 0x257   :  { %v398_v14 = vunpack.c.l.s8.bf16 %v166_v12  ;;  %v400_v16 = vunpack.c.l.s8.bf16 %v168_v13 }
 0x258   :  { %4465 = vmatmul.mubr.bf16.vlgmr.msra.gmra.mrb[4].mxu0 %v6556_v58  ;;  %4629 = vmatmul.mubr.bf16.vlgmr.msra.gmra.mrb[4].mxu1 %v6556_v58  ;;  %v343_v58 = vunpack.c.h.s8.bf16 %v135_v21  ;;  %v408_v21 = vunpack.c.h.s8.bf16 %v168_v13  ;;  %v206_v13 = vld [vmem:[#allocation7 + $0x280] sm:$0xff] }
 0x259   :  { %4638 = vmatpush1.bf16.msra.mxu0 %v318_v0  ;;  %4761 = vmatpush1.bf16.msra.mxu1 %v320_v18  ;;  %v409_v0 = vunpack.c.h.s8.bf16 %v169_v7  ;;  %v175_v18 = vld [vmem:[#allocation7 + $0x188] sm:$0xff] }
 0x25a   :  { %4639 = vmatprep.subr.bf16.mxu0 %v327_v19  ;;  %4762 = vmatprep.subr.bf16.mxu1 %v329_v20  ;;  %v177_v19 = vld [vmem:[#allocation7 + $0x198] sm:$0xff]  ;;  %v406_v20 = vunpack.c.h.s8.bf16 %v166_v12  ;;  %v415_v22 = vunpack.c.l.s8.bf16 %v175_v18  ;;  %v423_v29 = vunpack.c.h.s8.bf16 %v175_v18  ;;  %v207_v7 = vld [vmem:[#allocation7 + $0x288] sm:$0xff] }
 0x25b   :  { %4669 = vmatprep.mubr.bf16.mxu0 %v6580_v15  ;;  %4792 = vmatprep.mubr.bf16.mxu1 %v6580_v15 }
 0x25d   :  { %4640 = vmatpush1.bf16.msra.mxu0 %v326_v23  ;;  %4763 = vmatpush1.bf16.msra.mxu1 %v328_v24  ;;  %v417_v23 = vunpack.c.l.s8.bf16 %v177_v19  ;;  %v174_v24 = vld [vmem:[#allocation7 + $0x180] sm:$0xff] }
 0x25e   :  { %4641 = vmatprep.subr.bf16.mxu0 %v335_v25  ;;  %4764 = vmatprep.subr.bf16.mxu1 %v337_v26  ;;  %v176_v25 = vld [vmem:[#allocation7 + $0x190] sm:$0xff]  ;;  %v414_v26 = vunpack.c.l.s8.bf16 %v174_v24 }
 0x25f   :  { %v416_v28 = vunpack.c.l.s8.bf16 %v176_v25  ;;  %v424_v34 = vunpack.c.h.s8.bf16 %v176_v25  ;;  %v214_v25 = vld [vmem:[#allocation7 + $0x2c0] sm:$0xff] }
 0x261   :  { %4642 = vmatpush1.bf16.msra.mxu0 %v334_v31  ;;  %4765 = vmatpush1.bf16.msra.mxu1 %v336_v33  ;;  %v425_v31 = vunpack.c.h.s8.bf16 %v177_v19  ;;  %v183_v33 = vld [vmem:[#allocation7 + $0x1c8] sm:$0xff] }
 0x262   :  { %4643 = vmatprep.subr.bf16.mxu0 %v343_v58  ;;  %4766 = vmatprep.subr.bf16.mxu1 %v345_v32  ;;  %v185_v58 = vld [vmem:[#allocation7 + $0x1d8] sm:$0xff]  ;;  %v422_v32 = vunpack.c.h.s8.bf16 %v174_v24  ;;  %v431_v35 = vunpack.c.l.s8.bf16 %v183_v33  ;;  %v439_v40 = vunpack.c.h.s8.bf16 %v183_v33  ;;  %v215_v19 = vld [vmem:[#allocation7 + $0x2c8] sm:$0xff] }
 0x265   :  { %4644 = vmatpush1.bf16.msra.mxu0 %v342_v36  ;;  %4767 = vmatpush1.bf16.msra.mxu1 %v344_v27  ;;  %v433_v36 = vunpack.c.l.s8.bf16 %v185_v58  ;;  %v182_v27 = vld [vmem:[#allocation7 + $0x1c0] sm:$0xff] }
 0x266   :  { %4645 = vmatprep.subr.bf16.mxu0 %v351_v37  ;;  %4768 = vmatprep.subr.bf16.mxu1 %v353_v38  ;;  %v184_v37 = vld [vmem:[#allocation7 + $0x1d0] sm:$0xff]  ;;  %v430_v38 = vunpack.c.l.s8.bf16 %v182_v27 }
 0x267   :  { %v432_v39 = vunpack.c.l.s8.bf16 %v184_v37  ;;  %v440_v46 = vunpack.c.h.s8.bf16 %v184_v37  ;;  %v222_v37 = vld [vmem:[#allocation7 + $0x300] sm:$0xff] }
 0x269   :  { %4646 = vmatpush1.bf16.msra.mxu0 %v350_v41  ;;  %4769 = vmatpush1.bf16.msra.mxu1 %v352_v42  ;;  %v441_v41 = vunpack.c.h.s8.bf16 %v185_v58  ;;  %v191_v42 = vld [vmem:[#allocation7 + $0x208] sm:$0xff] }
 0x26a   :  { %4647 = vmatprep.subr.bf16.mxu0 %v359_v44  ;;  %4770 = vmatprep.subr.bf16.mxu1 %v361_v45  ;;  %v193_v44 = vld [vmem:[#allocation7 + $0x218] sm:$0xff]  ;;  %v438_v45 = vunpack.c.h.s8.bf16 %v182_v27  ;;  %v223_v58 = vld [vmem:[#allocation7 + $0x308] sm:$0xff] }
 0x26d   :  { %4648 = vmatpush1.bf16.msra.mxu0 %v358_v48  ;;  %4771 = vmatpush1.bf16.msra.mxu1 %v360_v49  ;;  %v447_v48 = vunpack.c.l.s8.bf16 %v191_v42  ;;  %v449_v49 = vunpack.c.l.s8.bf16 %v193_v44 }
 0x26e   :  { %4649 = vmatprep.subr.bf16.mxu0 %v367_v30  ;;  %4772 = vmatprep.subr.bf16.mxu1 %v369_v50  ;;  %v190_v30 = vld [vmem:[#allocation7 + $0x200] sm:$0xff]  ;;  %v192_v50 = vld [vmem:[#allocation7 + $0x210] sm:$0xff] }
 0x271   :  { %4650 = vmatpush1.bf16.msra.mxu0 %v366_v54  ;;  %4773 = vmatpush1.bf16.msra.mxu1 %v368_v55  ;;  %v446_v54 = vunpack.c.l.s8.bf16 %v190_v30  ;;  %v448_v55 = vunpack.c.l.s8.bf16 %v192_v50 }
 0x272   :  { %4651 = vmatprep.subr.bf16.mxu0 %v375_v56  ;;  %4774 = vmatprep.subr.bf16.mxu1 %v377_v57  ;;  %v455_v56 = vunpack.c.h.s8.bf16 %v191_v42  ;;  %v457_v57 = vunpack.c.h.s8.bf16 %v193_v44  ;;  %v231_v44 = vld [vmem:[#allocation7 + $0x348] sm:$0xff] }
 0x275   :  { %4652 = vmatpush1.bf16.msra.mxu0 %v374_v61  ;;  %4775 = vmatpush1.bf16.msra.mxu1 %v376_v62  ;;  %v6588_v61 = vpack.c.bf16 %v101_v53, %v101_v53  ;;  %v454_v62 = vunpack.c.h.s8.bf16 %v190_v30  ;;  %v230_v30 = vld [vmem:[#allocation7 + $0x340] sm:$0xff] }
 0x276   :  { %4653 = vmatprep.subr.bf16.mxu0 %v383_v43  ;;  %4776 = vmatprep.subr.bf16.mxu1 %v385_v63  ;;  %v456_v43 = vunpack.c.h.s8.bf16 %v192_v50  ;;  %v463_v63 = vunpack.c.l.s8.bf16 %v199_v59  ;;  %v232_v50 = vld [vmem:[#allocation7 + $0x350] sm:$0xff]  ;;  %v526_v53 = vunpack.c.l.s8.bf16 %v230_v30  ;;  %v534_v60 = vunpack.c.h.s8.bf16 %v230_v30 }
 0x279   :  { %4654 = vmatpush1.bf16.msra.mxu0 %v382_v3  ;;  %4777 = vmatpush1.bf16.msra.mxu1 %v384_v4  ;;  %v200_v3 = vld [vmem:[#allocation7 + $0x250] sm:$0xff]  ;;  %v462_v4 = vunpack.c.l.s8.bf16 %v198_v2 }
 0x27a   :  { %4655 = vmatprep.subr.bf16.mxu0 %v391_v5  ;;  %4778 = vmatprep.subr.bf16.mxu1 %v393_v52  ;;  %v464_v5 = vunpack.c.l.s8.bf16 %v200_v3  ;;  %v471_v52 = vunpack.c.h.s8.bf16 %v199_v59  ;;  %v241_v59 = vld [vmem:[#allocation7 + $0x398] sm:$0xff] }
 0x27d   :  { %4656 = vmatpush1.bf16.msra.mxu0 %v390_v8  ;;  %4779 = vmatpush1.bf16.msra.mxu1 %v392_v9  ;;  %v209_v8 = vld [vmem:[#allocation7 + $0x298] sm:$0xff]  ;;  %v470_v9 = vunpack.c.h.s8.bf16 %v198_v2  ;;  %v240_v2 = vld [vmem:[#allocation7 + $0x390] sm:$0xff] }
 0x27e   :  { %4657 = vmatprep.subr.bf16.mxu0 %v399_v10  ;;  %4780 = vmatprep.subr.bf16.mxu1 %v401_v11  ;;  %v472_v10 = vunpack.c.h.s8.bf16 %v200_v3  ;;  %v479_v11 = vunpack.c.l.s8.bf16 %v207_v7  ;;  %v481_v12 = vunpack.c.l.s8.bf16 %v209_v8  ;;  %v489_v18 = vunpack.c.h.s8.bf16 %v209_v8 }
 0x281   :  { %4658 = vmatpush1.bf16.msra.mxu0 %v398_v14  ;;  %4781 = vmatpush1.bf16.msra.mxu1 %v400_v16  ;;  %v208_v14 = vld [vmem:[#allocation7 + $0x290] sm:$0xff]  ;;  %v478_v16 = vunpack.c.l.s8.bf16 %v206_v13 }
 0x282   :  { %4659 = vmatprep.subr.bf16.mxu0 %v407_v17  ;;  %4782 = vmatprep.subr.bf16.mxu1 %v409_v0  ;;  %v480_v17 = vunpack.c.l.s8.bf16 %v208_v14  ;;  %v487_v0 = vunpack.c.h.s8.bf16 %v207_v7  ;;  %v249_v7 = vld [vmem:[#allocation7 + $0x3d8] sm:$0xff] }
 0x285   :  { %4660 = vmatpush1.bf16.msra.mxu0 %v406_v20  ;;  %4783 = vmatpush1.bf16.msra.mxu1 %v408_v21  ;;  %v217_v20 = vld [vmem:[#allocation7 + $0x2d8] sm:$0xff]  ;;  %v486_v21 = vunpack.c.h.s8.bf16 %v206_v13  ;;  %v248_v13 = vld [vmem:[#allocation7 + $0x3d0] sm:$0xff] }
 0x286   :  { %4661 = vmatprep.subr.bf16.mxu0 %v415_v22  ;;  %4784 = vmatprep.subr.bf16.mxu1 %v417_v23  ;;  %v488_v22 = vunpack.c.h.s8.bf16 %v208_v14  ;;  %v495_v23 = vunpack.c.l.s8.bf16 %v215_v19  ;;  %v497_v24 = vunpack.c.l.s8.bf16 %v217_v20  ;;  %v505_v33 = vunpack.c.h.s8.bf16 %v217_v20 }
 0x289   :  { %4662 = vmatpush1.bf16.msra.mxu0 %v414_v26  ;;  %4785 = vmatpush1.bf16.msra.mxu1 %v416_v28  ;;  %v216_v26 = vld [vmem:[#allocation7 + $0x2d0] sm:$0xff]  ;;  %v494_v28 = vunpack.c.l.s8.bf16 %v214_v25 }
 0x28a   :  { %4663 = vmatprep.subr.bf16.mxu0 %v423_v29  ;;  %4786 = vmatprep.subr.bf16.mxu1 %v425_v31  ;;  %v496_v29 = vunpack.c.l.s8.bf16 %v216_v26  ;;  %v503_v31 = vunpack.c.h.s8.bf16 %v215_v19  ;;  %v257_v19 = vld [vmem:[#allocation7 + $0x418] sm:$0xff] }
 0x28d   :  { %4664 = vmatpush1.bf16.msra.mxu0 %v422_v32  ;;  %4787 = vmatpush1.bf16.msra.mxu1 %v424_v34  ;;  %v225_v32 = vld [vmem:[#allocation7 + $0x318] sm:$0xff]  ;;  %v502_v34 = vunpack.c.h.s8.bf16 %v214_v25  ;;  %v254_v25 = vld [vmem:[#allocation7 + $0x400] sm:$0xff] }
 0x28e   :  { %4665 = vmatprep.subr.bf16.mxu0 %v431_v35  ;;  %4788 = vmatprep.subr.bf16.mxu1 %v433_v36  ;;  %v504_v35 = vunpack.c.h.s8.bf16 %v216_v26  ;;  %v511_v36 = vunpack.c.l.s8.bf16 %v223_v58  ;;  %v513_v27 = vunpack.c.l.s8.bf16 %v225_v32  ;;  %v521_v42 = vunpack.c.h.s8.bf16 %v225_v32  ;;  %v256_v26 = vld [vmem:[#allocation7 + $0x410] sm:$0xff] }
 0x28f   :  { %v585_v32 = vunpack.c.h.s8.bf16 %v257_v19 }
 0x291   :  { %4666 = vmatpush1.bf16.msra.mxu0 %v430_v38  ;;  %4789 = vmatpush1.bf16.msra.mxu1 %v432_v39  ;;  %v224_v38 = vld [vmem:[#allocation7 + $0x310] sm:$0xff]  ;;  %v510_v39 = vunpack.c.l.s8.bf16 %v222_v37 }
 0x292   :  { %4667 = vmatprep.subr.bf16.mxu0 %v439_v40  ;;  %4790 = vmatprep.subr.bf16.mxu1 %v441_v41  ;;  %v512_v40 = vunpack.c.l.s8.bf16 %v224_v38  ;;  %v519_v41 = vunpack.c.h.s8.bf16 %v223_v58  ;;  %v520_v47 = vunpack.c.h.s8.bf16 %v224_v38 }
 0x295   :  { %4668 = vmatpush1.bf16.msra.mxu0 %v438_v45  ;;  %4791 = vmatpush1.bf16.msra.mxu1 %v440_v46  ;;  %v233_v45 = vld [vmem:[#allocation7 + $0x358] sm:$0xff]  ;;  %v518_v46 = vunpack.c.h.s8.bf16 %v222_v37  ;;  %v584_v37 = vunpack.c.h.s8.bf16 %v256_v26 }
 0x296   :  { %4678 = vmatprep.subr.bf16.mxu0 %v447_v48  ;;  %4801 = vmatprep.subr.bf16.mxu1 %v449_v49  ;;  %v527_v48 = vunpack.c.l.s8.bf16 %v231_v44  ;;  %v529_v49 = vunpack.c.l.s8.bf16 %v233_v45 }
 0x298   :  { %4670 = vmatmul.mubr.bf16.vlgmr.msra.gmra.mrb[0].mxu0 %v6586_v51  ;;  %4793 = vmatmul.mubr.bf16.vlgmr.msra.gmra.mrb[0].mxu1 %v6586_v51 }
 0x299   :  { %4679 = vmatpush1.bf16.msra.mxu0 %v446_v54  ;;  %4802 = vmatpush1.bf16.msra.mxu1 %v448_v55  ;;  %v528_v54 = vunpack.c.l.s8.bf16 %v232_v50  ;;  %v535_v55 = vunpack.c.h.s8.bf16 %v231_v44 }
 0x29a   :  { %4680 = vmatprep.subr.bf16.mxu0 %v455_v56  ;;  %4803 = vmatprep.subr.bf16.mxu1 %v457_v57  ;;  %v537_v56 = vunpack.c.h.s8.bf16 %v233_v45  ;;  %v239_v57 = vld [vmem:[#allocation7 + $0x388] sm:$0xff] }
 0x29b   :  { %4710 = vmatprep.mubr.bf16.mxu0 %v6588_v61  ;;  %4833 = vmatprep.mubr.bf16.mxu1 %v6588_v61 }
 0x29d   :  { %4681 = vmatpush1.bf16.msra.mxu0 %v454_v62  ;;  %4804 = vmatpush1.bf16.msra.mxu1 %v456_v43  ;;  %v536_v62 = vunpack.c.h.s8.bf16 %v232_v50  ;;  %v543_v43 = vunpack.c.l.s8.bf16 %v239_v57 }
 0x29e   :  { %4682 = vmatprep.subr.bf16.mxu0 %v463_v63  ;;  %4805 = vmatprep.subr.bf16.mxu1 %v465_v1  ;;  %v545_v63 = vunpack.c.l.s8.bf16 %v241_v59  ;;  %v238_v1 = vld [vmem:[#allocation7 + $0x380] sm:$0xff] }
 0x29f   :  { %v542_v3 = vunpack.c.l.s8.bf16 %v238_v1  ;;  %v550_v8 = vunpack.c.h.s8.bf16 %v238_v1 }
 0x2a1   :  { %4683 = vmatpush1.bf16.msra.mxu0 %v462_v4  ;;  %4806 = vmatpush1.bf16.msra.mxu1 %v464_v5  ;;  %v544_v4 = vunpack.c.l.s8.bf16 %v240_v2  ;;  %v551_v5 = vunpack.c.h.s8.bf16 %v239_v57 }
 0x2a2   :  { %4684 = vmatprep.subr.bf16.mxu0 %v471_v52  ;;  %4807 = vmatprep.subr.bf16.mxu1 %v473_v6  ;;  %v553_v52 = vunpack.c.h.s8.bf16 %v241_v59  ;;  %v247_v6 = vld [vmem:[#allocation7 + $0x3c8] sm:$0xff] }
 0x2a5   :  { %4685 = vmatpush1.bf16.msra.mxu0 %v470_v9  ;;  %4808 = vmatpush1.bf16.msra.mxu1 %v472_v10  ;;  %v552_v9 = vunpack.c.h.s8.bf16 %v240_v2  ;;  %v559_v10 = vunpack.c.l.s8.bf16 %v247_v6 }
 0x2a6   :  { %4686 = vmatprep.subr.bf16.mxu0 %v479_v11  ;;  %4809 = vmatprep.subr.bf16.mxu1 %v481_v12  ;;  %v561_v11 = vunpack.c.l.s8.bf16 %v249_v7  ;;  %v246_v12 = vld [vmem:[#allocation7 + $0x3c0] sm:$0xff] }
 0x2a7   :  { %v558_v14 = vunpack.c.l.s8.bf16 %v246_v12  ;;  %v566_v20 = vunpack.c.h.s8.bf16 %v246_v12 }
 0x2a9   :  { %4687 = vmatpush1.bf16.msra.mxu0 %v478_v16  ;;  %4810 = vmatpush1.bf16.msra.mxu1 %v480_v17  ;;  %v560_v16 = vunpack.c.l.s8.bf16 %v248_v13  ;;  %v567_v17 = vunpack.c.h.s8.bf16 %v247_v6 }
 0x2aa   :  { %4688 = vmatprep.subr.bf16.mxu0 %v487_v0  ;;  %4811 = vmatprep.subr.bf16.mxu1 %v489_v18  ;;  %v569_v0 = vunpack.c.h.s8.bf16 %v249_v7  ;;  %v255_v18 = vld [vmem:[#allocation7 + $0x408] sm:$0xff] }
 0x2ab   :  { %v583_v58 = vunpack.c.h.s8.bf16 %v255_v18 }
 0x2ad   :  { %4689 = vmatpush1.bf16.msra.mxu0 %v486_v21  ;;  %4812 = vmatpush1.bf16.msra.mxu1 %v488_v22  ;;  %v568_v21 = vunpack.c.h.s8.bf16 %v248_v13  ;;  %v100_v22 = vld [vmem:[#allocation2 + $0x10] sm:$0xff] }
 0x2ae   :  { %4690 = vmatprep.subr.bf16.mxu0 %v495_v23  ;;  %4813 = vmatprep.subr.bf16.mxu1 %v497_v24  ;;  %v575_v23 = vunpack.c.l.s8.bf16 %v255_v18  ;;  %v577_v24 = vunpack.c.l.s8.bf16 %v257_v19 }
 0x2b1   :  { %4691 = vmatpush1.bf16.msra.mxu0 %v494_v28  ;;  %4814 = vmatpush1.bf16.msra.mxu1 %v496_v29  ;;  %v6594_v28 = vpack.c.bf16 %v100_v22, %v100_v22  ;;  %v103_v29 = vld [vmem:[#allocation2 + $0x28] sm:$0xff] }
 0x2b2   :  { %4692 = vmatprep.subr.bf16.mxu0 %v503_v31  ;;  %4815 = vmatprep.subr.bf16.mxu1 %v505_v33  ;;  %v574_v31 = vunpack.c.l.s8.bf16 %v254_v25  ;;  %v576_v33 = vunpack.c.l.s8.bf16 %v256_v26  ;;  %v297_v22 = vld [vmem:[#allocation7 + $0x558] sm:$0xff] }
 0x2b3   :  { %v657_v26 = vunpack.c.l.s8.bf16 %v297_v22 }
 0x2b5   :  { %4693 = vmatpush1.bf16.msra.mxu0 %v502_v34  ;;  %4816 = vmatpush1.bf16.msra.mxu1 %v504_v35  ;;  %v263_v34 = vld [vmem:[#allocation7 + $0x448] sm:$0xff]  ;;  %v265_v35 = vld [vmem:[#allocation7 + $0x458] sm:$0xff] }
 0x2b6   :  { %4694 = vmatprep.subr.bf16.mxu0 %v511_v36  ;;  %4817 = vmatprep.subr.bf16.mxu1 %v513_v27  ;;  %v6596_v36 = vpack.c.bf16 %v103_v29, %v103_v29  ;;  %v582_v27 = vunpack.c.h.s8.bf16 %v254_v25  ;;  %v591_v38 = vunpack.c.l.s8.bf16 %v263_v34  ;;  %v599_v45 = vunpack.c.h.s8.bf16 %v263_v34  ;;  %v294_v29 = vld [vmem:[#allocation7 + $0x540] sm:$0xff] }
 0x2b7   :  { %v665_v34 = vunpack.c.h.s8.bf16 %v297_v22 }
 0x2b9   :  { %4695 = vmatpush1.bf16.msra.mxu0 %v510_v39  ;;  %4818 = vmatpush1.bf16.msra.mxu1 %v512_v40  ;;  %v593_v39 = vunpack.c.l.s8.bf16 %v265_v35  ;;  %v262_v40 = vld [vmem:[#allocation7 + $0x440] sm:$0xff] }
 0x2ba   :  { %4696 = vmatprep.subr.bf16.mxu0 %v519_v41  ;;  %4819 = vmatprep.subr.bf16.mxu1 %v521_v42  ;;  %v264_v41 = vld [vmem:[#allocation7 + $0x450] sm:$0xff]  ;;  %v590_v42 = vunpack.c.l.s8.bf16 %v262_v40 }
 0x2bb   :  { %v592_v44 = vunpack.c.l.s8.bf16 %v264_v41  ;;  %v600_v30 = vunpack.c.h.s8.bf16 %v264_v41  ;;  %v302_v41 = vld [vmem:[#allocation7 + $0x580] sm:$0xff] }
 0x2bd   :  { %4697 = vmatpush1.bf16.msra.mxu0 %v518_v46  ;;  %4820 = vmatpush1.bf16.msra.mxu1 %v520_v47  ;;  %v601_v46 = vunpack.c.h.s8.bf16 %v265_v35  ;;  %v271_v47 = vld [vmem:[#allocation7 + $0x488] sm:$0xff] }
 0x2be   :  { %4698 = vmatprep.subr.bf16.mxu0 %v527_v48  ;;  %4821 = vmatprep.subr.bf16.mxu1 %v529_v49  ;;  %v273_v48 = vld [vmem:[#allocation7 + $0x498] sm:$0xff]  ;;  %v598_v49 = vunpack.c.h.s8.bf16 %v262_v40  ;;  %v607_v50 = vunpack.c.l.s8.bf16 %v271_v47  ;;  %v615_v59 = vunpack.c.h.s8.bf16 %v271_v47  ;;  %v303_v35 = vld [vmem:[#allocation7 + $0x588] sm:$0xff] }
 0x2c1   :  { %4699 = vmatpush1.bf16.msra.mxu0 %v526_v53  ;;  %4822 = vmatpush1.bf16.msra.mxu1 %v528_v54  ;;  %v609_v53 = vunpack.c.l.s8.bf16 %v273_v48  ;;  %v270_v54 = vld [vmem:[#allocation7 + $0x480] sm:$0xff] }
 0x2c2   :  { %4700 = vmatprep.subr.bf16.mxu0 %v535_v55  ;;  %4823 = vmatprep.subr.bf16.mxu1 %v537_v56  ;;  %v272_v55 = vld [vmem:[#allocation7 + $0x490] sm:$0xff]  ;;  %v606_v56 = vunpack.c.l.s8.bf16 %v270_v54 }
 0x2c3   :  { %v608_v57 = vunpack.c.l.s8.bf16 %v272_v55  ;;  %v616_v1 = vunpack.c.h.s8.bf16 %v272_v55  ;;  %v310_v55 = vld [vmem:[#allocation7 + $0x5c0] sm:$0xff] }
 0x2c5   :  { %4701 = vmatpush1.bf16.msra.mxu0 %v534_v60  ;;  %4824 = vmatpush1.bf16.msra.mxu1 %v536_v62  ;;  %v617_v60 = vunpack.c.h.s8.bf16 %v273_v48  ;;  %v279_v62 = vld [vmem:[#allocation7 + $0x4c8] sm:$0xff] }
 0x2c6   :  { %4702 = vmatprep.subr.bf16.mxu0 %v543_v43  ;;  %4825 = vmatprep.subr.bf16.mxu1 %v545_v63  ;;  %v281_v43 = vld [vmem:[#allocation7 + $0x4d8] sm:$0xff]  ;;  %v614_v63 = vunpack.c.h.s8.bf16 %v270_v54  ;;  %v623_v2 = vunpack.c.l.s8.bf16 %v279_v62  ;;  %v631_v7 = vunpack.c.h.s8.bf16 %v279_v62  ;;  %v311_v48 = vld [vmem:[#allocation7 + $0x5c8] sm:$0xff] }
 0x2c9   :  { %4703 = vmatpush1.bf16.msra.mxu0 %v542_v3  ;;  %4826 = vmatpush1.bf16.msra.mxu1 %v544_v4  ;;  %v625_v3 = vunpack.c.l.s8.bf16 %v281_v43  ;;  %v278_v4 = vld [vmem:[#allocation7 + $0x4c0] sm:$0xff] }
 0x2ca   :  { %4704 = vmatprep.subr.bf16.mxu0 %v551_v5  ;;  %4827 = vmatprep.subr.bf16.mxu1 %v553_v52  ;;  %v280_v5 = vld [vmem:[#allocation7 + $0x4d0] sm:$0xff]  ;;  %v622_v52 = vunpack.c.l.s8.bf16 %v278_v4 }
 0x2cb   :  { %v624_v6 = vunpack.c.l.s8.bf16 %v280_v5  ;;  %v632_v12 = vunpack.c.h.s8.bf16 %v280_v5 }
 0x2cd   :  { %4705 = vmatpush1.bf16.msra.mxu0 %v550_v8  ;;  %4828 = vmatpush1.bf16.msra.mxu1 %v552_v9  ;;  %v633_v8 = vunpack.c.h.s8.bf16 %v281_v43  ;;  %v287_v9 = vld [vmem:[#allocation7 + $0x508] sm:$0xff] }
 0x2ce   :  { %4706 = vmatprep.subr.bf16.mxu0 %v559_v10  ;;  %4829 = vmatprep.subr.bf16.mxu1 %v561_v11  ;;  %v289_v10 = vld [vmem:[#allocation7 + $0x518] sm:$0xff]  ;;  %v630_v11 = vunpack.c.h.s8.bf16 %v278_v4  ;;  %v639_v13 = vunpack.c.l.s8.bf16 %v287_v9  ;;  %v647_v19 = vunpack.c.h.s8.bf16 %v287_v9  ;;  %v131_v43 = vld [vmem:[#allocation7 + $0x28] sm:$0xff] }
 0x2cf   :  { %v323_v4 = vunpack.c.l.s8.bf16 %v131_v43 }
 0x2d1   :  { %4707 = vmatpush1.bf16.msra.mxu0 %v558_v14  ;;  %4830 = vmatpush1.bf16.msra.mxu1 %v560_v16  ;;  %v641_v14 = vunpack.c.l.s8.bf16 %v289_v10  ;;  %v286_v16 = vld [vmem:[#allocation7 + $0x500] sm:$0xff] }
 0x2d2   :  { %4708 = vmatprep.subr.bf16.mxu0 %v567_v17  ;;  %4831 = vmatprep.subr.bf16.mxu1 %v569_v0  ;;  %v288_v17 = vld [vmem:[#allocation7 + $0x510] sm:$0xff]  ;;  %v638_v0 = vunpack.c.l.s8.bf16 %v286_v16 }
 0x2d3   :  { %v640_v18 = vunpack.c.l.s8.bf16 %v288_v17 }
 0x2d5   :  { %4709 = vmatpush1.bf16.msra.mxu0 %v566_v20  ;;  %4832 = vmatpush1.bf16.msra.mxu1 %v568_v21  ;;  %v649_v20 = vunpack.c.h.s8.bf16 %v289_v10  ;;  %v295_v21 = vld [vmem:[#allocation7 + $0x548] sm:$0xff]  ;;  %v331_v10 = vunpack.c.h.s8.bf16 %v131_v43 }
 0x2d6   :  { %4719 = vmatprep.subr.bf16.mxu0 %v575_v23  ;;  %4842 = vmatprep.subr.bf16.mxu1 %v577_v24  ;;  %v646_v23 = vunpack.c.h.s8.bf16 %v286_v16  ;;  %v648_v24 = vunpack.c.h.s8.bf16 %v288_v17  ;;  %v655_v25 = vunpack.c.l.s8.bf16 %v295_v21 }
 0x2d8   :  { %4711 = vmatmul.mubr.bf16.vlgmr.msra.gmra.mrb[0].mxu0 %v6594_v28  ;;  %4834 = vmatmul.mubr.bf16.vlgmr.msra.gmra.mrb[0].mxu1 %v6594_v28 }
 0x2d9   :  { %4720 = vmatpush1.bf16.msra.mxu0 %v574_v31  ;;  %4843 = vmatpush1.bf16.msra.mxu1 %v576_v33  ;;  %v296_v31 = vld [vmem:[#allocation7 + $0x550] sm:$0xff]  ;;  %v654_v33 = vunpack.c.l.s8.bf16 %v294_v29 }
 0x2da   :  { %4721 = vmatprep.subr.bf16.mxu0 %v583_v58  ;;  %4844 = vmatprep.subr.bf16.mxu1 %v585_v32  ;;  %v656_v58 = vunpack.c.l.s8.bf16 %v296_v31  ;;  %v663_v32 = vunpack.c.h.s8.bf16 %v295_v21 }
 0x2db   :  { %4751 = vmatprep.mubr.bf16.mxu0 %v6596_v36  ;;  %4874 = vmatprep.mubr.bf16.mxu1 %v6596_v36 }
 0x2dd   :  { %4722 = vmatpush1.bf16.msra.mxu0 %v582_v27  ;;  %4845 = vmatpush1.bf16.msra.mxu1 %v584_v37  ;;  %v305_v27 = vld [vmem:[#allocation7 + $0x598] sm:$0xff]  ;;  %v662_v37 = vunpack.c.h.s8.bf16 %v294_v29 }
 0x2de   :  { %4723 = vmatprep.subr.bf16.mxu0 %v591_v38  ;;  %4846 = vmatprep.subr.bf16.mxu1 %v593_v39  ;;  %v664_v38 = vunpack.c.h.s8.bf16 %v296_v31  ;;  %v671_v39 = vunpack.c.l.s8.bf16 %v303_v35  ;;  %v673_v40 = vunpack.c.l.s8.bf16 %v305_v27  ;;  %v681_v47 = vunpack.c.h.s8.bf16 %v305_v27 }
 0x2e1   :  { %4724 = vmatpush1.bf16.msra.mxu0 %v590_v42  ;;  %4847 = vmatpush1.bf16.msra.mxu1 %v592_v44  ;;  %v304_v42 = vld [vmem:[#allocation7 + $0x590] sm:$0xff]  ;;  %v670_v44 = vunpack.c.l.s8.bf16 %v302_v41 }
 0x2e2   :  { %4725 = vmatprep.subr.bf16.mxu0 %v599_v45  ;;  %4848 = vmatprep.subr.bf16.mxu1 %v601_v46  ;;  %v672_v45 = vunpack.c.l.s8.bf16 %v304_v42  ;;  %v679_v46 = vunpack.c.h.s8.bf16 %v303_v35 }
 0x2e5   :  { %4726 = vmatpush1.bf16.msra.mxu0 %v598_v49  ;;  %4849 = vmatpush1.bf16.msra.mxu1 %v600_v30  ;;  %v313_v49 = vld [vmem:[#allocation7 + $0x5d8] sm:$0xff]  ;;  %v678_v30 = vunpack.c.h.s8.bf16 %v302_v41 }
 0x2e6   :  { %4727 = vmatprep.subr.bf16.mxu0 %v607_v50  ;;  %4850 = vmatprep.subr.bf16.mxu1 %v609_v53  ;;  %v680_v50 = vunpack.c.h.s8.bf16 %v304_v42  ;;  %v687_v53 = vunpack.c.l.s8.bf16 %v311_v48  ;;  %v689_v54 = vunpack.c.l.s8.bf16 %v313_v49  ;;  %v697_v62 = vunpack.c.h.s8.bf16 %v313_v49 }
 0x2e9   :  { %4728 = vmatpush1.bf16.msra.mxu0 %v606_v56  ;;  %4851 = vmatpush1.bf16.msra.mxu1 %v608_v57  ;;  %v312_v56 = vld [vmem:[#allocation7 + $0x5d0] sm:$0xff]  ;;  %v686_v57 = vunpack.c.l.s8.bf16 %v310_v55 }
 0x2ea   :  { %4729 = vmatprep.subr.bf16.mxu0 %v615_v59  ;;  %4852 = vmatprep.subr.bf16.mxu1 %v617_v60  ;;  %v688_v59 = vunpack.c.l.s8.bf16 %v312_v56  ;;  %v695_v60 = vunpack.c.h.s8.bf16 %v311_v48 }
 0x2ed   :  { %4730 = vmatpush1.bf16.msra.mxu0 %v614_v63  ;;  %4853 = vmatpush1.bf16.msra.mxu1 %v616_v1  ;;  %v133_v63 = vld [vmem:[#allocation7 + $0x38] sm:$0xff]  ;;  %v694_v1 = vunpack.c.h.s8.bf16 %v310_v55 }
 0x2ee   :  { %4731 = vmatprep.subr.bf16.mxu0 %v623_v2  ;;  %4854 = vmatprep.subr.bf16.mxu1 %v625_v3  ;;  %v696_v2 = vunpack.c.h.s8.bf16 %v312_v56  ;;  %v102_v3 = vld [vmem:[#allocation2 + $0x20] sm:$0xff]  ;;  %v325_v5 = vunpack.c.l.s8.bf16 %v133_v63 }
 0x2f1   :  { %4732 = vmatpush1.bf16.msra.mxu0 %v622_v52  ;;  %4855 = vmatpush1.bf16.msra.mxu1 %v624_v6  ;;  %v130_v52 = vld [vmem:[#allocation7 + $0x20] sm:$0xff]  ;;  %v132_v6 = vld [vmem:[#allocation7 + $0x30] sm:$0xff] }
 0x2f2   :  { %4733 = vmatprep.subr.bf16.mxu0 %v631_v7  ;;  %4856 = vmatprep.subr.bf16.mxu1 %v633_v8  ;;  %v6602_v7 = vpack.c.bf16 %v102_v3, %v102_v3  ;;  %v322_v8 = vunpack.c.l.s8.bf16 %v130_v52  ;;  %v324_v9 = vunpack.c.l.s8.bf16 %v132_v6  ;;  %v332_v16 = vunpack.c.h.s8.bf16 %v132_v6  ;;  %v170_v6 = vld [vmem:[#allocation7 + $0x160] sm:$0xff] }
 0x2f5   :  { %4734 = vmatpush1.bf16.msra.mxu0 %v630_v11  ;;  %4857 = vmatpush1.bf16.msra.mxu1 %v632_v12  ;;  %v333_v11 = vunpack.c.h.s8.bf16 %v133_v63  ;;  %v139_v12 = vld [vmem:[#allocation7 + $0x68] sm:$0xff] }
 0x2f6   :  { %4735 = vmatprep.subr.bf16.mxu0 %v639_v13  ;;  %4858 = vmatprep.subr.bf16.mxu1 %v641_v14  ;;  %v141_v13 = vld [vmem:[#allocation7 + $0x78] sm:$0xff]  ;;  %v330_v14 = vunpack.c.h.s8.bf16 %v130_v52  ;;  %v339_v17 = vunpack.c.l.s8.bf16 %v139_v12  ;;  %v347_v22 = vunpack.c.h.s8.bf16 %v139_v12 }
 0x2f9   :  { %4736 = vmatpush1.bf16.msra.mxu0 %v638_v0  ;;  %4859 = vmatpush1.bf16.msra.mxu1 %v640_v18  ;;  %v341_v0 = vunpack.c.l.s8.bf16 %v141_v13  ;;  %v138_v18 = vld [vmem:[#allocation7 + $0x60] sm:$0xff] }
 0x2fa   :  { %4737 = vmatprep.subr.bf16.mxu0 %v647_v19  ;;  %4860 = vmatprep.subr.bf16.mxu1 %v649_v20  ;;  %v140_v19 = vld [vmem:[#allocation7 + $0x70] sm:$0xff]  ;;  %v338_v20 = vunpack.c.l.s8.bf16 %v138_v18 }
 0x2fb   :  { %v340_v21 = vunpack.c.l.s8.bf16 %v140_v19  ;;  %v348_v29 = vunpack.c.h.s8.bf16 %v140_v19  ;;  %v178_v19 = vld [vmem:[#allocation7 + $0x1a0] sm:$0xff] }
 0x2fd   :  { %4738 = vmatpush1.bf16.msra.mxu0 %v646_v23  ;;  %4861 = vmatpush1.bf16.msra.mxu1 %v648_v24  ;;  %v349_v23 = vunpack.c.h.s8.bf16 %v141_v13  ;;  %v147_v24 = vld [vmem:[#allocation7 + $0xa8] sm:$0xff] }
 0x2fe   :  { %4739 = vmatprep.subr.bf16.mxu0 %v655_v25  ;;  %4862 = vmatprep.subr.bf16.mxu1 %v657_v26  ;;  %v149_v25 = vld [vmem:[#allocation7 + $0xb8] sm:$0xff]  ;;  %v346_v26 = vunpack.c.h.s8.bf16 %v138_v18  ;;  %v355_v31 = vunpack.c.l.s8.bf16 %v147_v24  ;;  %v363_v35 = vunpack.c.h.s8.bf16 %v147_v24  ;;  %v179_v13 = vld [vmem:[#allocation7 + $0x1a8] sm:$0xff] }
 0x2ff   :  { %v365_v27 = vunpack.c.h.s8.bf16 %v149_v25 }
 0x301   :  { %4740 = vmatpush1.bf16.msra.mxu0 %v654_v33  ;;  %4863 = vmatpush1.bf16.msra.mxu1 %v656_v58  ;;  %v357_v33 = vunpack.c.l.s8.bf16 %v149_v25  ;;  %v146_v58 = vld [vmem:[#allocation7 + $0xa0] sm:$0xff]  ;;  %v187_v25 = vld [vmem:[#allocation7 + $0x1e8] sm:$0xff] }
 0x302   :  { %4741 = vmatprep.subr.bf16.mxu0 %v663_v32  ;;  %4864 = vmatprep.subr.bf16.mxu1 %v665_v34  ;;  %v354_v32 = vunpack.c.l.s8.bf16 %v146_v58 }
 0x305   :  { %4742 = vmatpush1.bf16.msra.mxu0 %v662_v37  ;;  %4865 = vmatpush1.bf16.msra.mxu1 %v664_v38  ;;  %v155_v37 = vld [vmem:[#allocation7 + $0xe8] sm:$0xff]  ;;  %v157_v38 = vld [vmem:[#allocation7 + $0xf8] sm:$0xff] }
 0x306   :  { %4743 = vmatprep.subr.bf16.mxu0 %v671_v39  ;;  %4866 = vmatprep.subr.bf16.mxu1 %v673_v40  ;;  %v362_v39 = vunpack.c.h.s8.bf16 %v146_v58  ;;  %v371_v41 = vunpack.c.l.s8.bf16 %v155_v37  ;;  %v373_v42 = vunpack.c.l.s8.bf16 %v157_v38  ;;  %v379_v48 = vunpack.c.h.s8.bf16 %v155_v37 }
 0x307   :  { %v381_v49 = vunpack.c.h.s8.bf16 %v157_v38  ;;  %v195_v38 = vld [vmem:[#allocation7 + $0x228] sm:$0xff] }
 0x309   :  { %4744 = vmatpush1.bf16.msra.mxu0 %v670_v44  ;;  %4867 = vmatpush1.bf16.msra.mxu1 %v672_v45  ;;  %v154_v44 = vld [vmem:[#allocation7 + $0xe0] sm:$0xff]  ;;  %v156_v45 = vld [vmem:[#allocation7 + $0xf0] sm:$0xff] }
 0x30a   :  { %4745 = vmatprep.subr.bf16.mxu0 %v679_v46  ;;  %4868 = vmatprep.subr.bf16.mxu1 %v681_v47  ;;  %v370_v46 = vunpack.c.l.s8.bf16 %v154_v44  ;;  %v372_v47 = vunpack.c.l.s8.bf16 %v156_v45 }
 0x30d   :  { %4746 = vmatpush1.bf16.msra.mxu0 %v678_v30  ;;  %4869 = vmatpush1.bf16.msra.mxu1 %v680_v50  ;;  %v163_v30 = vld [vmem:[#allocation7 + $0x128] sm:$0xff]  ;;  %v165_v50 = vld [vmem:[#allocation7 + $0x138] sm:$0xff] }
 0x30e   :  { %4747 = vmatprep.subr.bf16.mxu0 %v687_v53  ;;  %4870 = vmatprep.subr.bf16.mxu1 %v689_v54  ;;  %v378_v53 = vunpack.c.h.s8.bf16 %v154_v44  ;;  %v380_v54 = vunpack.c.h.s8.bf16 %v156_v45  ;;  %v387_v55 = vunpack.c.l.s8.bf16 %v163_v30  ;;  %v389_v56 = vunpack.c.l.s8.bf16 %v165_v50  ;;  %v194_v45 = vld [vmem:[#allocation7 + $0x220] sm:$0xff] }
 0x30f   :  { %v395_v43 = vunpack.c.h.s8.bf16 %v163_v30  ;;  %v397_v63 = vunpack.c.h.s8.bf16 %v165_v50  ;;  %v203_v50 = vld [vmem:[#allocation7 + $0x268] sm:$0xff] }
 0x311   :  { %4748 = vmatpush1.bf16.msra.mxu0 %v686_v57  ;;  %4871 = vmatpush1.bf16.msra.mxu1 %v688_v59  ;;  %v162_v57 = vld [vmem:[#allocation7 + $0x120] sm:$0xff]  ;;  %v164_v59 = vld [vmem:[#allocation7 + $0x130] sm:$0xff] }
 0x312   :  { %4749 = vmatprep.subr.bf16.mxu0 %v695_v60  ;;  %4872 = vmatprep.subr.bf16.mxu1 %v697_v62  ;;  %v386_v60 = vunpack.c.l.s8.bf16 %v162_v57  ;;  %v388_v62 = vunpack.c.l.s8.bf16 %v164_v59  ;;  %v394_v3 = vunpack.c.h.s8.bf16 %v162_v57 }
 0x315   :  { %4750 = vmatpush1.bf16.msra.mxu0 %v694_v1  ;;  %4873 = vmatpush1.bf16.msra.mxu1 %v696_v2  ;;  %v171_v1 = vld [vmem:[#allocation7 + $0x168] sm:$0xff]  ;;  %v173_v2 = vld [vmem:[#allocation7 + $0x178] sm:$0xff] }
 0x316   :  { %4883 = vmatprep.subr.bf16.mxu0 %v323_v4  ;;  %5006 = vmatprep.subr.bf16.mxu1 %v325_v5  ;;  %v396_v4 = vunpack.c.h.s8.bf16 %v164_v59  ;;  %v403_v5 = vunpack.c.l.s8.bf16 %v171_v1  ;;  %v405_v52 = vunpack.c.l.s8.bf16 %v173_v2  ;;  %v413_v12 = vunpack.c.h.s8.bf16 %v173_v2  ;;  %v202_v59 = vld [vmem:[#allocation7 + $0x260] sm:$0xff]  ;;  %v213_v2 = vld [vmem:[#allocation7 + $0x2b8] sm:$0xff] }
 0x318   :  { %4752 = vmatmul.mubr.bf16.vlgmr.msra.gmra.mrb[0].mxu0 %v6602_v7  ;;  %4875 = vmatmul.mubr.bf16.vlgmr.msra.gmra.mrb[0].mxu1 %v6602_v7 }
 0x319   :  { %4884 = vmatpush1.bf16.msra.mxu0 %v322_v8  ;;  %5007 = vmatpush1.bf16.msra.mxu1 %v324_v9  ;;  %v172_v8 = vld [vmem:[#allocation7 + $0x170] sm:$0xff]  ;;  %v402_v9 = vunpack.c.l.s8.bf16 %v170_v6 }
 0x31a   :  { %4885 = vmatprep.subr.bf16.mxu0 %v331_v10  ;;  %5008 = vmatprep.subr.bf16.mxu1 %v333_v11  ;;  %v404_v10 = vunpack.c.l.s8.bf16 %v172_v8  ;;  %v411_v11 = vunpack.c.h.s8.bf16 %v171_v1  ;;  %v211_v1 = vld [vmem:[#allocation7 + $0x2a8] sm:$0xff] }
 0x31b   :  { %4915 = vmatprep.mubr.bf16.mxu0 %v6580_v15  ;;  %5038 = vmatprep.mubr.bf16.mxu1 %v6580_v15  ;;  %v148_v15 = vld [vmem:[#allocation7 + $0xb0] sm:$0xff] }
 0x31c   :  { %v356_v34 = vunpack.c.l.s8.bf16 %v148_v15  ;;  %v364_v40 = vunpack.c.h.s8.bf16 %v148_v15  ;;  %v186_v15 = vld [vmem:[#allocation7 + $0x1e0] sm:$0xff] }
 0x31d   :  { %4886 = vmatpush1.bf16.msra.mxu0 %v330_v14  ;;  %5009 = vmatpush1.bf16.msra.mxu1 %v332_v16  ;;  %v181_v14 = vld [vmem:[#allocation7 + $0x1b8] sm:$0xff]  ;;  %v410_v16 = vunpack.c.h.s8.bf16 %v170_v6  ;;  %v210_v6 = vld [vmem:[#allocation7 + $0x2a0] sm:$0xff] }
 0x31e   :  { %4887 = vmatprep.subr.bf16.mxu0 %v339_v17  ;;  %5010 = vmatprep.subr.bf16.mxu1 %v341_v0  ;;  %v412_v17 = vunpack.c.h.s8.bf16 %v172_v8  ;;  %v419_v0 = vunpack.c.l.s8.bf16 %v179_v13  ;;  %v421_v18 = vunpack.c.l.s8.bf16 %v181_v14  ;;  %v429_v24 = vunpack.c.h.s8.bf16 %v181_v14 }
 0x31f   :  { %v482_v8 = vunpack.c.l.s8.bf16 %v210_v6  ;;  %v490_v14 = vunpack.c.h.s8.bf16 %v210_v6  ;;  %v252_v6 = vld [vmem:[#allocation7 + $0x3f0] sm:$0xff] }
 0x321   :  { %4888 = vmatpush1.bf16.msra.mxu0 %v338_v20  ;;  %5011 = vmatpush1.bf16.msra.mxu1 %v340_v21  ;;  %v180_v20 = vld [vmem:[#allocation7 + $0x1b0] sm:$0xff]  ;;  %v418_v21 = vunpack.c.l.s8.bf16 %v178_v19 }
 0x322   :  { %4889 = vmatprep.subr.bf16.mxu0 %v347_v22  ;;  %5012 = vmatprep.subr.bf16.mxu1 %v349_v23  ;;  %v420_v22 = vunpack.c.l.s8.bf16 %v180_v20  ;;  %v427_v23 = vunpack.c.h.s8.bf16 %v179_v13  ;;  %v221_v13 = vld [vmem:[#allocation7 + $0x2f8] sm:$0xff] }
 0x325   :  { %4890 = vmatpush1.bf16.msra.mxu0 %v346_v26  ;;  %5013 = vmatpush1.bf16.msra.mxu1 %v348_v29  ;;  %v189_v26 = vld [vmem:[#allocation7 + $0x1f8] sm:$0xff]  ;;  %v426_v29 = vunpack.c.h.s8.bf16 %v178_v19  ;;  %v220_v19 = vld [vmem:[#allocation7 + $0x2f0] sm:$0xff] }
 0x326   :  { %4891 = vmatprep.subr.bf16.mxu0 %v355_v31  ;;  %5014 = vmatprep.subr.bf16.mxu1 %v357_v33  ;;  %v428_v31 = vunpack.c.h.s8.bf16 %v180_v20  ;;  %v435_v33 = vunpack.c.l.s8.bf16 %v187_v25  ;;  %v437_v58 = vunpack.c.l.s8.bf16 %v189_v26  ;;  %v445_v37 = vunpack.c.h.s8.bf16 %v189_v26 }
 0x329   :  { %4892 = vmatpush1.bf16.msra.mxu0 %v354_v32  ;;  %5015 = vmatpush1.bf16.msra.mxu1 %v356_v34  ;;  %v188_v32 = vld [vmem:[#allocation7 + $0x1f0] sm:$0xff]  ;;  %v434_v34 = vunpack.c.l.s8.bf16 %v186_v15 }
 0x32a   :  { %4893 = vmatprep.subr.bf16.mxu0 %v363_v35  ;;  %5016 = vmatprep.subr.bf16.mxu1 %v365_v27  ;;  %v436_v35 = vunpack.c.l.s8.bf16 %v188_v32  ;;  %v443_v27 = vunpack.c.h.s8.bf16 %v187_v25  ;;  %v229_v25 = vld [vmem:[#allocation7 + $0x338] sm:$0xff] }
 0x32d   :  { %4894 = vmatpush1.bf16.msra.mxu0 %v362_v39  ;;  %5017 = vmatpush1.bf16.msra.mxu1 %v364_v40  ;;  %v197_v39 = vld [vmem:[#allocation7 + $0x238] sm:$0xff]  ;;  %v442_v40 = vunpack.c.h.s8.bf16 %v186_v15  ;;  %v228_v15 = vld [vmem:[#allocation7 + $0x330] sm:$0xff] }
 0x32e   :  { %4895 = vmatprep.subr.bf16.mxu0 %v371_v41  ;;  %5018 = vmatprep.subr.bf16.mxu1 %v373_v42  ;;  %v444_v41 = vunpack.c.h.s8.bf16 %v188_v32  ;;  %v451_v42 = vunpack.c.l.s8.bf16 %v195_v38  ;;  %v453_v44 = vunpack.c.l.s8.bf16 %v197_v39  ;;  %v461_v30 = vunpack.c.h.s8.bf16 %v197_v39 }
 0x331   :  { %4896 = vmatpush1.bf16.msra.mxu0 %v370_v46  ;;  %5019 = vmatpush1.bf16.msra.mxu1 %v372_v47  ;;  %v196_v46 = vld [vmem:[#allocation7 + $0x230] sm:$0xff]  ;;  %v450_v47 = vunpack.c.l.s8.bf16 %v194_v45 }
 0x332   :  { %4897 = vmatprep.subr.bf16.mxu0 %v379_v48  ;;  %5020 = vmatprep.subr.bf16.mxu1 %v381_v49  ;;  %v452_v48 = vunpack.c.l.s8.bf16 %v196_v46  ;;  %v459_v49 = vunpack.c.h.s8.bf16 %v195_v38  ;;  %v237_v38 = vld [vmem:[#allocation7 + $0x378] sm:$0xff] }
 0x335   :  { %4898 = vmatpush1.bf16.msra.mxu0 %v378_v53  ;;  %5021 = vmatpush1.bf16.msra.mxu1 %v380_v54  ;;  %v205_v53 = vld [vmem:[#allocation7 + $0x278] sm:$0xff]  ;;  %v458_v54 = vunpack.c.h.s8.bf16 %v194_v45  ;;  %v236_v45 = vld [vmem:[#allocation7 + $0x370] sm:$0xff] }
 0x336   :  { %4899 = vmatprep.subr.bf16.mxu0 %v387_v55  ;;  %5022 = vmatprep.subr.bf16.mxu1 %v389_v56  ;;  %v460_v55 = vunpack.c.h.s8.bf16 %v196_v46  ;;  %v467_v56 = vunpack.c.l.s8.bf16 %v203_v50  ;;  %v469_v57 = vunpack.c.l.s8.bf16 %v205_v53 }
 0x339   :  { %4900 = vmatpush1.bf16.msra.mxu0 %v386_v60  ;;  %5023 = vmatpush1.bf16.msra.mxu1 %v388_v62  ;;  %v204_v60 = vld [vmem:[#allocation7 + $0x270] sm:$0xff]  ;;  %v466_v62 = vunpack.c.l.s8.bf16 %v202_v59 }
 0x33a   :  { %4901 = vmatprep.subr.bf16.mxu0 %v395_v43  ;;  %5024 = vmatprep.subr.bf16.mxu1 %v397_v63  ;;  %v468_v43 = vunpack.c.l.s8.bf16 %v204_v60  ;;  %v477_v63 = vunpack.c.h.s8.bf16 %v205_v53 }
 0x33d   :  { %4902 = vmatpush1.bf16.msra.mxu0 %v394_v3  ;;  %5025 = vmatpush1.bf16.msra.mxu1 %v396_v4  ;;  %v474_v3 = vunpack.c.h.s8.bf16 %v202_v59  ;;  %v476_v4 = vunpack.c.h.s8.bf16 %v204_v60  ;;  %v244_v59 = vld [vmem:[#allocation7 + $0x3b0] sm:$0xff] }
 0x33e   :  { %4903 = vmatprep.subr.bf16.mxu0 %v403_v5  ;;  %5026 = vmatprep.subr.bf16.mxu1 %v405_v52  ;;  %v483_v5 = vunpack.c.l.s8.bf16 %v211_v1  ;;  %v485_v52 = vunpack.c.l.s8.bf16 %v213_v2 }
 0x341   :  { %4904 = vmatpush1.bf16.msra.mxu0 %v402_v9  ;;  %5027 = vmatpush1.bf16.msra.mxu1 %v404_v10  ;;  %v491_v10 = vunpack.c.h.s8.bf16 %v211_v1  ;;  %v253_v1 = vld [vmem:[#allocation7 + $0x3f8] sm:$0xff] }
 0x342   :  { %4905 = vmatprep.subr.bf16.mxu0 %v411_v11  ;;  %5028 = vmatprep.subr.bf16.mxu1 %v413_v12  ;;  %v493_v11 = vunpack.c.h.s8.bf16 %v213_v2  ;;  %v219_v12 = vld [vmem:[#allocation7 + $0x2e8] sm:$0xff] }
 0x345   :  { %4906 = vmatpush1.bf16.msra.mxu0 %v410_v16  ;;  %5029 = vmatpush1.bf16.msra.mxu1 %v412_v17  ;;  %v499_v17 = vunpack.c.l.s8.bf16 %v219_v12 }
 0x346   :  { %4907 = vmatprep.subr.bf16.mxu0 %v419_v0  ;;  %5030 = vmatprep.subr.bf16.mxu1 %v421_v18  ;;  %v501_v0 = vunpack.c.l.s8.bf16 %v221_v13  ;;  %v218_v18 = vld [vmem:[#allocation7 + $0x2e0] sm:$0xff] }
 0x347   :  { %v498_v20 = vunpack.c.l.s8.bf16 %v218_v18  ;;  %v506_v26 = vunpack.c.h.s8.bf16 %v218_v18  ;;  %v260_v18 = vld [vmem:[#allocation7 + $0x430] sm:$0xff] }
 0x349   :  { %4908 = vmatpush1.bf16.msra.mxu0 %v418_v21  ;;  %5031 = vmatpush1.bf16.msra.mxu1 %v420_v22  ;;  %v500_v21 = vunpack.c.l.s8.bf16 %v220_v19  ;;  %v507_v22 = vunpack.c.h.s8.bf16 %v219_v12  ;;  %v261_v12 = vld [vmem:[#allocation7 + $0x438] sm:$0xff] }
 0x34a   :  { %4909 = vmatprep.subr.bf16.mxu0 %v427_v23  ;;  %5032 = vmatprep.subr.bf16.mxu1 %v429_v24  ;;  %v509_v23 = vunpack.c.h.s8.bf16 %v221_v13  ;;  %v227_v24 = vld [vmem:[#allocation7 + $0x328] sm:$0xff] }
 0x34d   :  { %4910 = vmatpush1.bf16.msra.mxu0 %v426_v29  ;;  %5033 = vmatpush1.bf16.msra.mxu1 %v428_v31  ;;  %v508_v29 = vunpack.c.h.s8.bf16 %v220_v19  ;;  %v515_v31 = vunpack.c.l.s8.bf16 %v227_v24 }
 0x34e   :  { %4911 = vmatprep.subr.bf16.mxu0 %v435_v33  ;;  %5034 = vmatprep.subr.bf16.mxu1 %v437_v58  ;;  %v517_v33 = vunpack.c.l.s8.bf16 %v229_v25  ;;  %v226_v58 = vld [vmem:[#allocation7 + $0x320] sm:$0xff] }
 0x34f   :  { %v514_v32 = vunpack.c.l.s8.bf16 %v226_v58  ;;  %v522_v39 = vunpack.c.h.s8.bf16 %v226_v58  ;;  %v268_v58 = vld [vmem:[#allocation7 + $0x470] sm:$0xff] }
 0x351   :  { %4912 = vmatpush1.bf16.msra.mxu0 %v434_v34  ;;  %5035 = vmatpush1.bf16.msra.mxu1 %v436_v35  ;;  %v516_v34 = vunpack.c.l.s8.bf16 %v228_v15  ;;  %v523_v35 = vunpack.c.h.s8.bf16 %v227_v24  ;;  %v269_v24 = vld [vmem:[#allocation7 + $0x478] sm:$0xff] }
 0x352   :  { %4913 = vmatprep.subr.bf16.mxu0 %v443_v27  ;;  %5036 = vmatprep.subr.bf16.mxu1 %v445_v37  ;;  %v525_v27 = vunpack.c.h.s8.bf16 %v229_v25  ;;  %v235_v37 = vld [vmem:[#allocation7 + $0x368] sm:$0xff] }
 0x355   :  { %4914 = vmatpush1.bf16.msra.mxu0 %v442_v40  ;;  %5037 = vmatpush1.bf16.msra.mxu1 %v444_v41  ;;  %v524_v40 = vunpack.c.h.s8.bf16 %v228_v15  ;;  %v531_v41 = vunpack.c.l.s8.bf16 %v235_v37 }
 0x356   :  { %4924 = vmatprep.subr.bf16.mxu0 %v451_v42  ;;  %5047 = vmatprep.subr.bf16.mxu1 %v453_v44  ;;  %v533_v42 = vunpack.c.l.s8.bf16 %v237_v38  ;;  %v234_v44 = vld [vmem:[#allocation7 + $0x360] sm:$0xff] }
 0x357   :  { %v530_v46 = vunpack.c.l.s8.bf16 %v234_v44  ;;  %v538_v53 = vunpack.c.h.s8.bf16 %v234_v44 }
 0x358   :  { %4916 = vmatmul.mubr.bf16.vlgmr.msra.gmra.mrb[4].mxu0 %v6586_v51  ;;  %5039 = vmatmul.mubr.bf16.vlgmr.msra.gmra.mrb[4].mxu1 %v6586_v51  ;;  %v475_v51 = vunpack.c.h.s8.bf16 %v203_v50  ;;  %v245_v50 = vld [vmem:[#allocation7 + $0x3b8] sm:$0xff] }
 0x359   :  { %4925 = vmatpush1.bf16.msra.mxu0 %v450_v47  ;;  %5048 = vmatpush1.bf16.msra.mxu1 %v452_v48  ;;  %v532_v47 = vunpack.c.l.s8.bf16 %v236_v45  ;;  %v539_v48 = vunpack.c.h.s8.bf16 %v235_v37 }
 0x35a   :  { %4926 = vmatprep.subr.bf16.mxu0 %v459_v49  ;;  %5049 = vmatprep.subr.bf16.mxu1 %v461_v30  ;;  %v541_v49 = vunpack.c.h.s8.bf16 %v237_v38  ;;  %v243_v30 = vld [vmem:[#allocation7 + $0x3a8] sm:$0xff]  ;;  %v604_v38 = vunpack.c.h.s8.bf16 %v268_v58 }
 0x35b   :  { %4956 = vmatprep.mubr.bf16.mxu0 %v6588_v61  ;;  %5079 = vmatprep.mubr.bf16.mxu1 %v6588_v61  ;;  %v212_v61 = vld [vmem:[#allocation7 + $0x2b0] sm:$0xff] }
 0x35c   :  { %v484_v9 = vunpack.c.l.s8.bf16 %v212_v61  ;;  %v492_v16 = vunpack.c.h.s8.bf16 %v212_v61 }
 0x35d   :  { %4927 = vmatpush1.bf16.msra.mxu0 %v458_v54  ;;  %5050 = vmatpush1.bf16.msra.mxu1 %v460_v55  ;;  %v540_v54 = vunpack.c.h.s8.bf16 %v236_v45  ;;  %v547_v55 = vunpack.c.l.s8.bf16 %v243_v30 }
 0x35e   :  { %4928 = vmatprep.subr.bf16.mxu0 %v467_v56  ;;  %5051 = vmatprep.subr.bf16.mxu1 %v469_v57  ;;  %v549_v56 = vunpack.c.l.s8.bf16 %v245_v50  ;;  %v242_v57 = vld [vmem:[#allocation7 + $0x3a0] sm:$0xff] }
 0x35f   :  { %v546_v60 = vunpack.c.l.s8.bf16 %v242_v57  ;;  %v554_v2 = vunpack.c.h.s8.bf16 %v242_v57 }
 0x361   :  { %4929 = vmatpush1.bf16.msra.mxu0 %v466_v62  ;;  %5052 = vmatpush1.bf16.msra.mxu1 %v468_v43  ;;  %v548_v62 = vunpack.c.l.s8.bf16 %v244_v59  ;;  %v555_v43 = vunpack.c.h.s8.bf16 %v243_v30 }
 0x362   :  { %4930 = vmatprep.subr.bf16.mxu0 %v475_v51  ;;  %5053 = vmatprep.subr.bf16.mxu1 %v477_v63  ;;  %v557_v51 = vunpack.c.h.s8.bf16 %v245_v50  ;;  %v251_v63 = vld [vmem:[#allocation7 + $0x3e8] sm:$0xff] }
 0x365   :  { %4931 = vmatpush1.bf16.msra.mxu0 %v474_v3  ;;  %5054 = vmatpush1.bf16.msra.mxu1 %v476_v4  ;;  %v556_v3 = vunpack.c.h.s8.bf16 %v244_v59  ;;  %v563_v4 = vunpack.c.l.s8.bf16 %v251_v63 }
 0x366   :  { %4932 = vmatprep.subr.bf16.mxu0 %v483_v5  ;;  %5055 = vmatprep.subr.bf16.mxu1 %v485_v52  ;;  %v565_v5 = vunpack.c.l.s8.bf16 %v253_v1  ;;  %v250_v52 = vld [vmem:[#allocation7 + $0x3e0] sm:$0xff] }
 0x367   :  { %v562_v61 = vunpack.c.l.s8.bf16 %v250_v52  ;;  %v570_v13 = vunpack.c.h.s8.bf16 %v250_v52 }
 0x369   :  { %4933 = vmatpush1.bf16.msra.mxu0 %v482_v8  ;;  %5056 = vmatpush1.bf16.msra.mxu1 %v484_v9  ;;  %v564_v8 = vunpack.c.l.s8.bf16 %v252_v6  ;;  %v571_v9 = vunpack.c.h.s8.bf16 %v251_v63 }
 0x36a   :  { %4934 = vmatprep.subr.bf16.mxu0 %v491_v10  ;;  %5057 = vmatprep.subr.bf16.mxu1 %v493_v11  ;;  %v573_v10 = vunpack.c.h.s8.bf16 %v253_v1  ;;  %v259_v11 = vld [vmem:[#allocation7 + $0x428] sm:$0xff] }
 0x36d   :  { %4935 = vmatpush1.bf16.msra.mxu0 %v490_v14  ;;  %5058 = vmatpush1.bf16.msra.mxu1 %v492_v16  ;;  %v572_v14 = vunpack.c.h.s8.bf16 %v252_v6  ;;  %v579_v16 = vunpack.c.l.s8.bf16 %v259_v11 }
 0x36e   :  { %4936 = vmatprep.subr.bf16.mxu0 %v499_v17  ;;  %5059 = vmatprep.subr.bf16.mxu1 %v501_v0  ;;  %v581_v17 = vunpack.c.l.s8.bf16 %v261_v12  ;;  %v258_v0 = vld [vmem:[#allocation7 + $0x420] sm:$0xff] }
 0x36f   :  { %v578_v19 = vunpack.c.l.s8.bf16 %v258_v0  ;;  %v586_v25 = vunpack.c.h.s8.bf16 %v258_v0 }
 0x371   :  { %4937 = vmatpush1.bf16.msra.mxu0 %v498_v20  ;;  %5060 = vmatpush1.bf16.msra.mxu1 %v500_v21  ;;  %v580_v20 = vunpack.c.l.s8.bf16 %v260_v18  ;;  %v587_v21 = vunpack.c.h.s8.bf16 %v259_v11 }
 0x372   :  { %4938 = vmatprep.subr.bf16.mxu0 %v507_v22  ;;  %5061 = vmatprep.subr.bf16.mxu1 %v509_v23  ;;  %v589_v22 = vunpack.c.h.s8.bf16 %v261_v12  ;;  %v267_v23 = vld [vmem:[#allocation7 + $0x468] sm:$0xff] }
 0x375   :  { %4939 = vmatpush1.bf16.msra.mxu0 %v506_v26  ;;  %5062 = vmatpush1.bf16.msra.mxu1 %v508_v29  ;;  %v588_v26 = vunpack.c.h.s8.bf16 %v260_v18  ;;  %v595_v29 = vunpack.c.l.s8.bf16 %v267_v23 }
 0x376   :  { %4940 = vmatprep.subr.bf16.mxu0 %v515_v31  ;;  %5063 = vmatprep.subr.bf16.mxu1 %v517_v33  ;;  %v597_v31 = vunpack.c.l.s8.bf16 %v269_v24  ;;  %v266_v33 = vld [vmem:[#allocation7 + $0x460] sm:$0xff] }
 0x377   :  { %v594_v15 = vunpack.c.l.s8.bf16 %v266_v33  ;;  %v602_v37 = vunpack.c.h.s8.bf16 %v266_v33 }
 0x379   :  { %4941 = vmatpush1.bf16.msra.mxu0 %v514_v32  ;;  %5064 = vmatpush1.bf16.msra.mxu1 %v516_v34  ;;  %v596_v32 = vunpack.c.l.s8.bf16 %v268_v58  ;;  %v605_v34 = vunpack.c.h.s8.bf16 %v269_v24 }
 0x37a   :  { %4942 = vmatprep.subr.bf16.mxu0 %v523_v35  ;;  %5065 = vmatprep.subr.bf16.mxu1 %v525_v27  ;;  %v275_v35 = vld [vmem:[#allocation7 + $0x4a8] sm:$0xff]  ;;  %v277_v27 = vld [vmem:[#allocation7 + $0x4b8] sm:$0xff] }
 0x37b   :  { %v619_v45 = vunpack.c.h.s8.bf16 %v275_v35 }
 0x37d   :  { %4943 = vmatpush1.bf16.msra.mxu0 %v522_v39  ;;  %5066 = vmatpush1.bf16.msra.mxu1 %v524_v40  ;;  %v611_v39 = vunpack.c.l.s8.bf16 %v275_v35  ;;  %v613_v40 = vunpack.c.l.s8.bf16 %v277_v27 }
 0x37e   :  { %4944 = vmatprep.subr.bf16.mxu0 %v531_v41  ;;  %5067 = vmatprep.subr.bf16.mxu1 %v533_v42  ;;  %v274_v41 = vld [vmem:[#allocation7 + $0x4a0] sm:$0xff] }
 0x37f   :  { %v610_v42 = vunpack.c.l.s8.bf16 %v274_v41 }
 0x381   :  { %4945 = vmatpush1.bf16.msra.mxu0 %v530_v46  ;;  %5068 = vmatpush1.bf16.msra.mxu1 %v532_v47  ;;  %v621_v46 = vunpack.c.h.s8.bf16 %v277_v27  ;;  %v283_v47 = vld [vmem:[#allocation7 + $0x4e8] sm:$0xff] }
 0x382   :  { %4946 = vmatprep.subr.bf16.mxu0 %v539_v48  ;;  %5069 = vmatprep.subr.bf16.mxu1 %v541_v49  ;;  %v285_v48 = vld [vmem:[#allocation7 + $0x4f8] sm:$0xff]  ;;  %v618_v49 = vunpack.c.h.s8.bf16 %v274_v41  ;;  %v627_v50 = vunpack.c.l.s8.bf16 %v283_v47  ;;  %v635_v59 = vunpack.c.h.s8.bf16 %v283_v47 }
 0x385   :  { %4947 = vmatpush1.bf16.msra.mxu0 %v538_v53  ;;  %5070 = vmatpush1.bf16.msra.mxu1 %v540_v54  ;;  %v629_v53 = vunpack.c.l.s8.bf16 %v285_v48  ;;  %v282_v54 = vld [vmem:[#allocation7 + $0x4e0] sm:$0xff] }
 0x386   :  { %4948 = vmatprep.subr.bf16.mxu0 %v547_v55  ;;  %5071 = vmatprep.subr.bf16.mxu1 %v549_v56  ;;  %v284_v55 = vld [vmem:[#allocation7 + $0x4f0] sm:$0xff]  ;;  %v626_v56 = vunpack.c.l.s8.bf16 %v282_v54 }
 0x387   :  { %v628_v57 = vunpack.c.l.s8.bf16 %v284_v55  ;;  %v636_v63 = vunpack.c.h.s8.bf16 %v284_v55 }
 0x389   :  { %4949 = vmatpush1.bf16.msra.mxu0 %v546_v60  ;;  %5072 = vmatpush1.bf16.msra.mxu1 %v548_v62  ;;  %v637_v60 = vunpack.c.h.s8.bf16 %v285_v48  ;;  %v291_v62 = vld [vmem:[#allocation7 + $0x528] sm:$0xff] }
 0x38a   :  { %4950 = vmatprep.subr.bf16.mxu0 %v555_v43  ;;  %5073 = vmatprep.subr.bf16.mxu1 %v557_v51  ;;  %v293_v43 = vld [vmem:[#allocation7 + $0x538] sm:$0xff]  ;;  %v634_v51 = vunpack.c.h.s8.bf16 %v282_v54  ;;  %v643_v1 = vunpack.c.l.s8.bf16 %v291_v62  ;;  %v651_v6 = vunpack.c.h.s8.bf16 %v291_v62 }
 0x38d   :  { %4951 = vmatpush1.bf16.msra.mxu0 %v554_v2  ;;  %5074 = vmatpush1.bf16.msra.mxu1 %v556_v3  ;;  %v645_v2 = vunpack.c.l.s8.bf16 %v293_v43  ;;  %v290_v3 = vld [vmem:[#allocation7 + $0x520] sm:$0xff] }
 0x38e   :  { %4952 = vmatprep.subr.bf16.mxu0 %v563_v4  ;;  %5075 = vmatprep.subr.bf16.mxu1 %v565_v5  ;;  %v292_v4 = vld [vmem:[#allocation7 + $0x530] sm:$0xff]  ;;  %v642_v5 = vunpack.c.l.s8.bf16 %v290_v3 }
 0x38f   :  { %v644_v52 = vunpack.c.l.s8.bf16 %v292_v4  ;;  %v652_v11 = vunpack.c.h.s8.bf16 %v292_v4 }
 0x391   :  { %4953 = vmatpush1.bf16.msra.mxu0 %v562_v61  ;;  %5076 = vmatpush1.bf16.msra.mxu1 %v564_v8  ;;  %v653_v61 = vunpack.c.h.s8.bf16 %v293_v43  ;;  %v299_v8 = vld [vmem:[#allocation7 + $0x568] sm:$0xff] }
 0x392   :  { %4954 = vmatprep.subr.bf16.mxu0 %v571_v9  ;;  %5077 = vmatprep.subr.bf16.mxu1 %v573_v10  ;;  %v301_v9 = vld [vmem:[#allocation7 + $0x578] sm:$0xff]  ;;  %v650_v10 = vunpack.c.h.s8.bf16 %v290_v3  ;;  %v659_v12 = vunpack.c.l.s8.bf16 %v299_v8  ;;  %v667_v18 = vunpack.c.h.s8.bf16 %v299_v8 }
 0x395   :  { %4955 = vmatpush1.bf16.msra.mxu0 %v570_v13  ;;  %5078 = vmatpush1.bf16.msra.mxu1 %v572_v14  ;;  %v661_v13 = vunpack.c.l.s8.bf16 %v301_v9  ;;  %v298_v14 = vld [vmem:[#allocation7 + $0x560] sm:$0xff] }
 0x396   :  { %4965 = vmatprep.subr.bf16.mxu0 %v579_v16  ;;  %5088 = vmatprep.subr.bf16.mxu1 %v581_v17  ;;  %v300_v16 = vld [vmem:[#allocation7 + $0x570] sm:$0xff]  ;;  %v658_v17 = vunpack.c.l.s8.bf16 %v298_v14 }
 0x397   :  { %v660_v0 = vunpack.c.l.s8.bf16 %v300_v16 }
 0x398   :  { %4957 = vmatmul.mubr.bf16.vlgmr.msra.gmra.mrb[4].mxu0 %v6594_v28  ;;  %5080 = vmatmul.mubr.bf16.vlgmr.msra.gmra.mrb[4].mxu1 %v6594_v28  ;;  %v603_v28 = vunpack.c.h.s8.bf16 %v267_v23  ;;  %v668_v23 = vunpack.c.h.s8.bf16 %v300_v16 }
 0x399   :  { %4966 = vmatpush1.bf16.msra.mxu0 %v578_v19  ;;  %5089 = vmatpush1.bf16.msra.mxu1 %v580_v20  ;;  %v669_v19 = vunpack.c.h.s8.bf16 %v301_v9  ;;  %v307_v20 = vld [vmem:[#allocation7 + $0x5a8] sm:$0xff] }
 0x39a   :  { %4967 = vmatprep.subr.bf16.mxu0 %v587_v21  ;;  %5090 = vmatprep.subr.bf16.mxu1 %v589_v22  ;;  %v309_v21 = vld [vmem:[#allocation7 + $0x5b8] sm:$0xff]  ;;  %v666_v22 = vunpack.c.h.s8.bf16 %v298_v14  ;;  %v675_v24 = vunpack.c.l.s8.bf16 %v307_v20  ;;  %v683_v58 = vunpack.c.h.s8.bf16 %v307_v20 }
 0x39b   :  { %4997 = vmatprep.mubr.bf16.mxu0 %v6596_v36  ;;  %5120 = vmatprep.mubr.bf16.mxu1 %v6596_v36  ;;  %v276_v36 = vld [vmem:[#allocation7 + $0x4b0] sm:$0xff] }
 0x39c   :  { %v612_v44 = vunpack.c.l.s8.bf16 %v276_v36  ;;  %v620_v30 = vunpack.c.h.s8.bf16 %v276_v36 }
 0x39d   :  { %4968 = vmatpush1.bf16.msra.mxu0 %v586_v25  ;;  %5091 = vmatpush1.bf16.msra.mxu1 %v588_v26  ;;  %v677_v25 = vunpack.c.l.s8.bf16 %v309_v21  ;;  %v306_v26 = vld [vmem:[#allocation7 + $0x5a0] sm:$0xff] }
 0x39e   :  { %4969 = vmatprep.subr.bf16.mxu0 %v595_v29  ;;  %5092 = vmatprep.subr.bf16.mxu1 %v597_v31  ;;  %v308_v29 = vld [vmem:[#allocation7 + $0x5b0] sm:$0xff]  ;;  %v674_v31 = vunpack.c.l.s8.bf16 %v306_v26 }
 0x39f   :  { %v676_v33 = vunpack.c.l.s8.bf16 %v308_v29  ;;  %v684_v35 = vunpack.c.h.s8.bf16 %v308_v29 }
 0x3a1   :  { %4970 = vmatpush1.bf16.msra.mxu0 %v594_v15  ;;  %5093 = vmatpush1.bf16.msra.mxu1 %v596_v32  ;;  %v685_v15 = vunpack.c.h.s8.bf16 %v309_v21  ;;  %v315_v32 = vld [vmem:[#allocation7 + $0x5e8] sm:$0xff] }
 0x3a2   :  { %4971 = vmatprep.subr.bf16.mxu0 %v603_v28  ;;  %5094 = vmatprep.subr.bf16.mxu1 %v605_v34  ;;  %v317_v28 = vld [vmem:[#allocation7 + $0x5f8] sm:$0xff]  ;;  %v682_v34 = vunpack.c.h.s8.bf16 %v306_v26  ;;  %v691_v27 = vunpack.c.l.s8.bf16 %v315_v32  ;;  %v699_v36 = vunpack.c.h.s8.bf16 %v315_v32 }
 0x3a5   :  { %4972 = vmatpush1.bf16.msra.mxu0 %v602_v37  ;;  %5095 = vmatpush1.bf16.msra.mxu1 %v604_v38  ;;  %v693_v37 = vunpack.c.l.s8.bf16 %v317_v28  ;;  %v314_v38 = vld [vmem:[#allocation7 + $0x5e0] sm:$0xff] }
 0x3a6   :  { %4973 = vmatprep.subr.bf16.mxu0 %v611_v39  ;;  %5096 = vmatprep.subr.bf16.mxu1 %v613_v40  ;;  %v316_v39 = vld [vmem:[#allocation7 + $0x5f0] sm:$0xff]  ;;  %v690_v40 = vunpack.c.l.s8.bf16 %v314_v38 }
 0x3a7   :  { %v692_v41 = vunpack.c.l.s8.bf16 %v316_v39  ;;  %v700_v47 = vunpack.c.h.s8.bf16 %v316_v39 }
 0x3a9   :  { %4974 = vmatpush1.bf16.msra.mxu0 %v610_v42  ;;  %5097 = vmatpush1.bf16.msra.mxu1 %v612_v44  ;;  %v701_v42 = vunpack.c.h.s8.bf16 %v317_v28  ;;  %v5241_v44 = vld [vmem:[#allocation10 + $0x20] sm:$0xff] }
 0x3aa   :  { %4975 = vmatprep.subr.bf16.mxu0 %v619_v45  ;;  %5098 = vmatprep.subr.bf16.mxu1 %v621_v46  ;;  %v5249_v45 = vld [vmem:[#allocation10 + $0x60] sm:$0xff]  ;;  %v698_v46 = vunpack.c.h.s8.bf16 %v314_v38  ;;  %v5277_v48 = vunpack.c.l.s8.bf16 %v5241_v44  ;;  %v5278_v55 = vunpack.c.h.s8.bf16 %v5241_v44 }
 0x3ad   :  { %4976 = vmatpush1.bf16.msra.mxu0 %v618_v49  ;;  %5099 = vmatpush1.bf16.msra.mxu1 %v620_v30  ;;  %v5293_v49 = vunpack.c.l.s8.bf16 %v5249_v45  ;;  %v5237_v30 = vld [vmem:[#allocation10] sm:$0xff] }
 0x3ae   :  { %4977 = vmatprep.subr.bf16.mxu0 %v627_v50  ;;  %5100 = vmatprep.subr.bf16.mxu1 %v629_v53  ;;  %v5245_v50 = vld [vmem:[#allocation10 + $0x40] sm:$0xff]  ;;  %v5269_v53 = vunpack.c.l.s8.bf16 %v5237_v30 }
 0x3af   :  { %v5285_v54 = vunpack.c.l.s8.bf16 %v5245_v50  ;;  %v5286_v62 = vunpack.c.h.s8.bf16 %v5245_v50 }
 0x3b1   :  { %4978 = vmatpush1.bf16.msra.mxu0 %v626_v56  ;;  %5101 = vmatpush1.bf16.msra.mxu1 %v628_v57  ;;  %v5294_v56 = vunpack.c.h.s8.bf16 %v5249_v45  ;;  %v5242_v57 = vld [vmem:[#allocation10 + $0x28] sm:$0xff] }
 0x3b2   :  { %4979 = vmatprep.subr.bf16.mxu0 %v635_v59  ;;  %5102 = vmatprep.subr.bf16.mxu1 %v637_v60  ;;  %v5250_v59 = vld [vmem:[#allocation10 + $0x68] sm:$0xff]  ;;  %v5270_v60 = vunpack.c.h.s8.bf16 %v5237_v30  ;;  %v5279_v43 = vunpack.c.l.s8.bf16 %v5242_v57 }
 0x3b5   :  { %4980 = vmatpush1.bf16.msra.mxu0 %v634_v51  ;;  %5103 = vmatpush1.bf16.msra.mxu1 %v636_v63  ;;  %v5295_v51 = vunpack.c.l.s8.bf16 %v5250_v59  ;;  %v5238_v63 = vld [vmem:[#allocation10 + $0x8] sm:$0xff] }
 0x3b6   :  { %4981 = vmatprep.subr.bf16.mxu0 %v643_v1  ;;  %5104 = vmatprep.subr.bf16.mxu1 %v645_v2  ;;  %v5246_v1 = vld [vmem:[#allocation10 + $0x48] sm:$0xff]  ;;  %v5131_v2 = vlaneseq  ;;  %v5271_v3 = vunpack.c.l.s8.bf16 %v5238_v63  ;;  %v5272_v8 = vunpack.c.h.s8.bf16 %v5238_v63 }
 0x3b7   :  { %v5287_v4 = vunpack.c.l.s8.bf16 %v5246_v1  ;;  %v5288_v9 = vunpack.c.h.s8.bf16 %v5246_v1 }
 0x3b9   :  { %4982 = vmatpush1.bf16.msra.mxu0 %v642_v5  ;;  %5105 = vmatpush1.bf16.msra.mxu1 %v644_v52  ;;  %v5280_v5 = vunpack.c.h.s8.bf16 %v5242_v57  ;;  %v5296_v52 = vunpack.c.h.s8.bf16 %v5250_v59 }
 0x3ba   :  { %4983 = vmatprep.subr.bf16.mxu0 %v651_v6  ;;  %5106 = vmatprep.subr.bf16.mxu1 %v653_v61  ;;  %v5251_v6 = vld [vmem:[#allocation10 + $0x70] sm:$0xff]  ;;  %v6618_v61 = vshrl.u32 %v5131_v2, 7 }
 0x3bc   :  { %v5133_v14 = vsub.s32 0, %v6618_v61  ;;  %v5141_v16 = vsub.s32 2, %v6618_v61  ;;  %v5145_v20 = vsub.s32 3, %v6618_v61 }
 0x3bd   :  { %4984 = vmatpush1.bf16.msra.mxu0 %v650_v10  ;;  %5107 = vmatpush1.bf16.msra.mxu1 %v652_v11  ;;  %v5297_v11 = vunpack.c.l.s8.bf16 %v5251_v6 }
 0x3be   :  { %4985 = vmatprep.subr.bf16.mxu0 %v659_v12  ;;  %5108 = vmatprep.subr.bf16.mxu1 %v661_v13  ;;  %v5239_v12 = vld [vmem:[#allocation10 + $0x10] sm:$0xff] }
 0x3bf   :  { %v5247_v13 = vld [vmem:[#allocation10 + $0x50] sm:$0xff] }
 0x3c1   :  { %4986 = vmatpush1.bf16.msra.mxu0 %v658_v17  ;;  %5109 = vmatpush1.bf16.msra.mxu1 %v660_v0  ;;  %v5273_v17 = vunpack.c.l.s8.bf16 %v5239_v12  ;;  %v5289_v0 = vunpack.c.l.s8.bf16 %v5247_v13 }
 0x3c2   :  { %4987 = vmatprep.subr.bf16.mxu0 %v667_v18  ;;  %5110 = vmatprep.subr.bf16.mxu1 %v669_v19  ;;  %v6625_v18 = vld [vmem:[%s6676_s4] sm:$0xff]  ;;  %v5137_v19 = vsub.s32 1, %v6618_v61 }
 0x3c3   :  { %v5134_v26 = vrot.slane %v6625_v18, %v5133_v14  ;;  %v5142_v29 = vrot.slane %v6625_v18, %v5141_v16 }
 0x3c5   :  { %4988 = vmatpush1.bf16.msra.mxu0 %v666_v22  ;;  %5111 = vmatpush1.bf16.msra.mxu1 %v668_v23  ;;  %v5298_v22 = vunpack.c.h.s8.bf16 %v5251_v6  ;;  %v6632_v23 = vld [vmem:[%s6677_s5] sm:$0xff] }
 0x3c6   :  { %4989 = vmatprep.subr.bf16.mxu0 %v675_v24  ;;  %5112 = vmatprep.subr.bf16.mxu1 %v677_v25  ;;  %v5244_v24 = vld [vmem:[#allocation10 + $0x38] sm:$0xff]  ;;  %v5184_v32 = vrot.slane %v6632_v23, %v5133_v14  ;;  %v5192_v39 = vrot.slane %v6632_v23, %v5141_v16 }
 0x3c7   :  { %v5252_v25 = vld [vmem:[#allocation10 + $0x78] sm:$0xff]  ;;  %v5283_v28 = vunpack.c.l.s8.bf16 %v5244_v24 }
 0x3c8   :  { %v5300_v57 = vunpack.c.h.s8.bf16 %v5252_v25 }
 0x3c9   :  { %4990 = vmatpush1.bf16.msra.mxu0 %v674_v31  ;;  %5113 = vmatpush1.bf16.msra.mxu1 %v676_v33  ;;  %v5138_v31 = vrot.slane %v6625_v18, %v5137_v19  ;;  %v5146_v33 = vrot.slane %v6625_v18, %v5145_v20 }
 0x3ca   :  { %4991 = vmatprep.subr.bf16.mxu0 %v683_v58  ;;  %5114 = vmatprep.subr.bf16.mxu1 %v685_v15  ;;  %v5274_v58 = vunpack.c.h.s8.bf16 %v5239_v12  ;;  %v5290_v15 = vunpack.c.h.s8.bf16 %v5247_v13 }
 0x3cd   :  { %4992 = vmatpush1.bf16.msra.mxu0 %v682_v34  ;;  %5115 = vmatpush1.bf16.msra.mxu1 %v684_v35  ;;  %v5299_v34 = vunpack.c.l.s8.bf16 %v5252_v25  ;;  %v5240_v35 = vld [vmem:[#allocation10 + $0x18] sm:$0xff] }
 0x3ce   :  { %4993 = vmatprep.subr.bf16.mxu0 %v691_v27  ;;  %5116 = vmatprep.subr.bf16.mxu1 %v693_v37  ;;  %v5248_v27 = vld [vmem:[#allocation10 + $0x58] sm:$0xff]  ;;  %v5275_v30 = vunpack.c.l.s8.bf16 %v5240_v35  ;;  %v5276_v2 = vunpack.c.h.s8.bf16 %v5240_v35 }
 0x3cf   :  { %v5291_v50 = vunpack.c.l.s8.bf16 %v5248_v27 }
 0x3d1   :  { %4994 = vmatpush1.bf16.msra.mxu0 %v690_v40  ;;  %5117 = vmatpush1.bf16.msra.mxu1 %v692_v41  ;;  %v5188_v40 = vrot.slane %v6632_v23, %v5137_v19  ;;  %v5196_v41 = vrot.slane %v6632_v23, %v5145_v20  ;;  %v5266_v19 = vld [vmem:[#allocation10 + $0xe8] sm:$0xff] }
 0x3d2   :  { %4995 = vmatprep.subr.bf16.mxu0 %v699_v36  ;;  %5118 = vmatprep.subr.bf16.mxu1 %v701_v42  ;;  %v5327_v25 = vunpack.c.l.s8.bf16 %v5266_v19 }
 0x3d5   :  { %4996 = vmatpush1.bf16.msra.mxu0 %v698_v46  ;;  %5119 = vmatpush1.bf16.msra.mxu1 %v700_v47 }
 0x3d6   :  { %6050 = vmatprep.subr.bf16.mxu0 %v5277_v48  ;;  %6072 = vmatprep.subr.bf16.mxu1 %v5293_v49 }
 0x3d8   :  { %4998 = vmatmul.mubr.bf16.vlgmr.msra.gmra.mrb[4].mxu0 %v6602_v7  ;;  %5121 = vmatmul.mubr.bf16.vlgmr.msra.gmra.mrb[4].mxu1 %v6602_v7  ;;  %v5243_v7 = vld [vmem:[#allocation10 + $0x30] sm:$0xff] }
 0x3d9   :  { %6051 = vmatpush3.bf16.msra.mxu0 %v5269_v53  ;;  %6073 = vmatpush3.bf16.msra.mxu1 %v5285_v54  ;;  %v5281_v10 = vunpack.c.l.s8.bf16 %v5243_v7  ;;  %v5282_v21 = vunpack.c.h.s8.bf16 %v5243_v7 }
 0x3da   :  { %6052 = vmatprep.subr.bf16.mxu0 %v5278_v55  ;;  %6074 = vmatprep.subr.bf16.mxu1 %v5294_v56  ;;  %v5284_v56 = vunpack.c.h.s8.bf16 %v5244_v24  ;;  %v5254_v24 = vld [vmem:[#allocation10 + $0x88] sm:$0xff] }
 0x3dd   :  { %6053 = vmatpush3.bf16.msra.mxu0 %v5270_v60  ;;  %6075 = vmatpush3.bf16.msra.mxu1 %v5286_v62 }
 0x3de   :  { %6054 = vmatprep.subr.bf16.mxu0 %v5279_v43  ;;  %6076 = vmatprep.subr.bf16.mxu1 %v5295_v51  ;;  %v5257_v43 = vld [vmem:[#allocation10 + $0xa0] sm:$0xff] }
 0x3df   :  { %v5265_v51 = vld [vmem:[#allocation10 + $0xe0] sm:$0xff]  ;;  %v5310_v14 = vunpack.c.h.s8.bf16 %v5257_v43 }
 0x3e1   :  { %6055 = vmatpush3.bf16.msra.mxu0 %v5271_v3  ;;  %6077 = vmatpush3.bf16.msra.mxu1 %v5287_v4  ;;  %v5292_v4 = vunpack.c.h.s8.bf16 %v5248_v27  ;;  %v5255_v27 = vld [vmem:[#allocation10 + $0x90] sm:$0xff] }
 0x3e2   :  { %6056 = vmatprep.subr.bf16.mxu0 %v5280_v5  ;;  %6078 = vmatprep.subr.bf16.mxu1 %v5296_v52  ;;  %v5309_v5 = vunpack.c.l.s8.bf16 %v5257_v43  ;;  %v5253_v52 = vld [vmem:[#allocation10 + $0x80] sm:$0xff]  ;;  %v5161_v43 = vsub.s32 7, %v6618_v61 }
 0x3e3   :  { %v5302_v20 = vunpack.c.h.s8.bf16 %v5253_v52 }
 0x3e5   :  { %6057 = vmatpush3.bf16.msra.mxu0 %v5272_v8  ;;  %6079 = vmatpush3.bf16.msra.mxu1 %v5288_v9  ;;  %v5325_v9 = vunpack.c.l.s8.bf16 %v5265_v51 }
 0x3e6   :  { %6058 = vmatprep.subr.bf16.mxu0 %v5281_v10  ;;  %6080 = vmatprep.subr.bf16.mxu1 %v5297_v11  ;;  %v5261_v10 = vld [vmem:[#allocation10 + $0xc0] sm:$0xff]  ;;  %v5301_v11 = vunpack.c.l.s8.bf16 %v5253_v52 }
 0x3e7   :  { %v5317_v13 = vunpack.c.l.s8.bf16 %v5261_v10 }
 0x3e9   :  { %6059 = vmatpush3.bf16.msra.mxu0 %v5273_v17  ;;  %6081 = vmatpush3.bf16.msra.mxu1 %v5289_v0  ;;  %v5326_v17 = vunpack.c.h.s8.bf16 %v5265_v51  ;;  %v5258_v0 = vld [vmem:[#allocation10 + $0xa8] sm:$0xff] }
 0x3ea   :  { %6060 = vmatprep.subr.bf16.mxu0 %v5282_v21  ;;  %6082 = vmatprep.subr.bf16.mxu1 %v5298_v22  ;;  %v5318_v21 = vunpack.c.h.s8.bf16 %v5261_v10  ;;  %v5311_v22 = vunpack.c.l.s8.bf16 %v5258_v0 }
 0x3eb   :  { %v4753_v37 = vpop.f32.mrb[0].mxu0  ;;  %v4876_v38 = vpop.f32.mrb[0].mxu1 }
 0x3ec   :  { %v5171_v36 = vmul.f32 %v5134_v26, %v4753_v37  ;;  %v5173_v42 = vmul.f32 %v5142_v29, %v4876_v38  ;;  %v4755_v44 = vpop.f32.mrb[1].mxu0  ;;  %v4878_v45 = vpop.f32.mrb[1].mxu1  ;;  %v5262_v26 = vld [vmem:[#allocation10 + $0xc8] sm:$0xff]  ;;  %v5303_v29 = vunpack.c.l.s8.bf16 %v5254_v24  ;;  %v5263_v38 = vld [vmem:[#allocation10 + $0xd0] sm:$0xff] }
 0x3ed   :  { %v5172_v46 = vmul.f32 %v5138_v31, %v4755_v44  ;;  %v5174_v47 = vmul.f32 %v5146_v33, %v4878_v45  ;;  %v4757_v48 = vpop.f32.mrb[2].mxu0  ;;  %v4880_v49 = vpop.f32.mrb[2].mxu1  ;;  %6061 = vmatpush3.bf16.msra.mxu0 %v5274_v58  ;;  %6083 = vmatpush3.bf16.msra.mxu1 %v5290_v15  ;;  %v5319_v31 = vunpack.c.l.s8.bf16 %v5262_v26  ;;  %v5312_v33 = vunpack.c.h.s8.bf16 %v5258_v0  ;;  %v5259_v15 = vld [vmem:[#allocation10 + $0xb0] sm:$0xff]  ;;  %v5260_v45 = vld [vmem:[#allocation10 + $0xb8] sm:$0xff] }
 0x3ee   :  { %v5221_v53 = vadd.f32 %v5184_v32, %v5171_v36  ;;  %v4758_v54 = vpop.f32.mrb[3].mxu0  ;;  %v4881_v55 = vpop.f32.mrb[3].mxu1  ;;  %6062 = vmatprep.subr.bf16.mxu0 %v5283_v28  ;;  %6084 = vmatprep.subr.bf16.mxu1 %v5299_v34  ;;  %v5223_v59 = vadd.f32 %v5192_v39, %v5173_v42  ;;  %v5328_v58 = vunpack.c.h.s8.bf16 %v5266_v19  ;;  %v5267_v32 = vld [vmem:[#allocation10 + $0xf0] sm:$0xff]  ;;  %v5304_v28 = vunpack.c.h.s8.bf16 %v5254_v24  ;;  %v5256_v49 = vld [vmem:[#allocation10 + $0x98] sm:$0xff] }
 0x3ef   :  { %v5222_v60 = vadd.f32 %v5188_v40, %v5172_v46  ;;  %v5224_v62 = vadd.f32 %v5196_v41, %v5174_v47  ;;  %v5320_v34 = vunpack.c.h.s8.bf16 %v5262_v26  ;;  %v5313_v35 = vunpack.c.l.s8.bf16 %v5259_v15  ;;  %v5268_v46 = vld [vmem:[#allocation10 + $0xf8] sm:$0xff] }
 0x3f0   :  { %v5229_v3 = vmax.f32 %v5221_v53, 0.0  ;;  %v5231_v7 = vmax.f32 %v5223_v59, 0.0  ;;  %v5329_v37 = vunpack.c.l.s8.bf16 %v5267_v32  ;;  %v5305_v39 = vunpack.c.l.s8.bf16 %v5255_v27 }
 0x3f1   :  { %v5230_v63 = vmax.f32 %v5222_v60, 0.0  ;;  %v5232_v1 = vmax.f32 %v5224_v62, 0.0  ;;  %6063 = vmatpush3.bf16.msra.mxu0 %v5275_v30  ;;  %6085 = vmatpush3.bf16.msra.mxu1 %v5291_v50  ;;  %v5321_v40 = vunpack.c.l.s8.bf16 %v5263_v38  ;;  %v5314_v41 = vunpack.c.h.s8.bf16 %v5259_v15  ;;  %v5264_v30 = vld [vmem:[#allocation10 + $0xd8] sm:$0xff] }
 0x3f2   :  { %6064 = vmatprep.subr.bf16.mxu0 %v5284_v56  ;;  %6086 = vmatprep.subr.bf16.mxu1 %v5300_v57  ;;  %v5333_v12 = vpack.c.bf16 %v5229_v3, %v5229_v3  ;;  %v5335_v16 = vpack.c.bf16 %v5231_v7, %v5231_v7  ;;  %v5330_v36 = vunpack.c.h.s8.bf16 %v5267_v32  ;;  %v5306_v42 = vunpack.c.h.s8.bf16 %v5255_v27 }
 0x3f3   :  { %v5334_v6 = vpack.c.bf16 %v5230_v63, %v5230_v63  ;;  %v5336_v8 = vpack.c.bf16 %v5232_v1, %v5232_v1  ;;  %v5322_v44 = vunpack.c.h.s8.bf16 %v5263_v38  ;;  %v5315_v47 = vunpack.c.l.s8.bf16 %v5260_v45 }
 0x3f4   :  { %v5331_v48 = vunpack.c.l.s8.bf16 %v5268_v46  ;;  %v5307_v50 = vunpack.c.l.s8.bf16 %v5256_v49  ;;  %v5323_v53 = vunpack.c.l.s8.bf16 %v5264_v30  ;;  %v5316_v54 = vunpack.c.h.s8.bf16 %v5260_v45 }
 0x3f5   :  { %6065 = vmatpush3.bf16.msra.mxu0 %v5276_v2  ;;  %5373 = vmatprep.mubr.bf16.mxu0 %v5334_v6  ;;  %v5332_v55 = vunpack.c.h.s8.bf16 %v5268_v46  ;;  %v5308_v56 = vunpack.c.h.s8.bf16 %v5256_v49  ;;  %v5324_v57 = vunpack.c.h.s8.bf16 %v5264_v30  ;;  %v5149_v59 = vsub.s32 4, %v6618_v61 }
 0x3f6   :  { %6087 = vmatpush3.bf16.msra.mxu1 %v5292_v4  ;;  %5413 = vmatprep.mubr.bf16.mxu1 %v5336_v8  ;;  %v5157_v60 = vsub.s32 6, %v6618_v61  ;;  %v5153_v62 = vsub.s32 5, %v6618_v61  ;;  %v5162_v2 = vrot.slane %v6625_v18, %v5161_v43  ;;  %v5212_v6 = vrot.slane %v6632_v23, %v5161_v43 }
 0x3f7   :  { %6094 = vmatprep.subr.bf16.mxu0 %v5309_v5  ;;  %6116 = vmatprep.subr.bf16.mxu1 %v5325_v9  ;;  %v5150_v51 = vrot.slane %v6625_v18, %v5149_v59  ;;  %v5200_v3 = vrot.slane %v6632_v23, %v5149_v59 }
 0x3f8   :  { %5374 = vmatmul.mubr.bf16.vlgmr.msra.gmra.mrb[8].mxu0 %v5333_v12  ;;  %v5158_v63 = vrot.slane %v6625_v18, %v5157_v60  ;;  %v5154_v1 = vrot.slane %v6625_v18, %v5153_v62  ;;  %v5208_v4 = vrot.slane %v6632_v23, %v5157_v60  ;;  %v5204_v7 = vrot.slane %v6632_v23, %v5153_v62 }
 0x3f9   :  { %5414 = vmatmul.mubr.bf16.vlgmr.msra.gmra.mrb[8].mxu1 %v5335_v16  ;;  %6095 = vmatpush3.bf16.msra.mxu0 %v5301_v11 }
 0x3fa   :  { %6117 = vmatpush3.bf16.msra.mxu1 %v5317_v13  ;;  %6096 = vmatprep.subr.bf16.mxu0 %v5310_v14 }
 0x3fb   :  { %6118 = vmatprep.subr.bf16.mxu1 %v5326_v17 }
 0x3fd   :  { %6097 = vmatpush3.bf16.msra.mxu0 %v5302_v20 }
 0x3fe   :  { %6119 = vmatpush3.bf16.msra.mxu1 %v5318_v21  ;;  %6098 = vmatprep.subr.bf16.mxu0 %v5311_v22 }
 0x3ff   :  { %6120 = vmatprep.subr.bf16.mxu1 %v5327_v25 }
 0x401   :  { %6099 = vmatpush3.bf16.msra.mxu0 %v5303_v29 }
 0x402   :  { %6121 = vmatpush3.bf16.msra.mxu1 %v5319_v31  ;;  %6100 = vmatprep.subr.bf16.mxu0 %v5312_v33 }
 0x403   :  { %6122 = vmatprep.subr.bf16.mxu1 %v5328_v58 }
 0x405   :  { %6101 = vmatpush3.bf16.msra.mxu0 %v5304_v28 }
 0x406   :  { %6123 = vmatpush3.bf16.msra.mxu1 %v5320_v34  ;;  %6102 = vmatprep.subr.bf16.mxu0 %v5313_v35 }
 0x407   :  { %6124 = vmatprep.subr.bf16.mxu1 %v5329_v37 }
 0x409   :  { %6103 = vmatpush3.bf16.msra.mxu0 %v5305_v39 }
 0x40a   :  { %6125 = vmatpush3.bf16.msra.mxu1 %v5321_v40  ;;  %6104 = vmatprep.subr.bf16.mxu0 %v5314_v41 }
 0x40b   :  { %6126 = vmatprep.subr.bf16.mxu1 %v5330_v36 }
 0x40d   :  { %6105 = vmatpush3.bf16.msra.mxu0 %v5306_v42 }
 0x40e   :  { %6127 = vmatpush3.bf16.msra.mxu1 %v5322_v44  ;;  %6106 = vmatprep.subr.bf16.mxu0 %v5315_v47 }
 0x40f   :  { %6128 = vmatprep.subr.bf16.mxu1 %v5331_v48 }
 0x411   :  { %6107 = vmatpush3.bf16.msra.mxu0 %v5307_v50  ;;  %v6048_v50 = vld [vmem:[%s6679_s7] ss:$0 sm:$0xff] }
 0x412   :  { %6129 = vmatpush3.bf16.msra.mxu1 %v5323_v53  ;;  %6108 = vmatprep.subr.bf16.mxu0 %v5316_v54  ;;  %v6049_v54 = vld [vmem:[%s6680_s8] ss:$0 sm:$0xff] }
 0x413   :  { %6130 = vmatprep.subr.bf16.mxu1 %v5332_v55 }
 0x415   :  { %6109 = vmatpush3.bf16.msra.mxu0 %v5308_v56 }
 0x416   :  { %6131 = vmatpush3.bf16.msra.mxu1 %v5324_v57 }
 0x4ab   :  { %v4999_v5 = vpop.f32.mrb[4].mxu0  ;;  %v5122_v52 = vpop.f32.mrb[4].mxu1 }
 0x4ac   :  { %v5175_v8 = vmul.f32 %v5150_v51, %v4999_v5  ;;  %v5177_v61 = vmul.f32 %v5158_v63, %v5122_v52  ;;  %v5001_v9 = vpop.f32.mrb[5].mxu0  ;;  %v5124_v10 = vpop.f32.mrb[5].mxu1 }
 0x4ad   :  { %v5176_v11 = vmul.f32 %v5154_v1, %v5001_v9  ;;  %v5178_v12 = vmul.f32 %v5162_v2, %v5124_v10  ;;  %v5003_v13 = vpop.f32.mrb[6].mxu0  ;;  %v5126_v14 = vpop.f32.mrb[6].mxu1 }
 0x4ae   :  { %v5225_v16 = vadd.f32 %v5200_v3, %v5175_v8  ;;  %v5227_v18 = vadd.f32 %v5208_v4, %v5177_v61  ;;  %v5004_v17 = vpop.f32.mrb[7].mxu0  ;;  %v5127_v0 = vpop.f32.mrb[7].mxu1 }
 0x4af   :  { %v5226_v19 = vadd.f32 %v5204_v7, %v5176_v11  ;;  %v5228_v20 = vadd.f32 %v5212_v6, %v5178_v12 }
 0x4b0   :  { %v5233_v21 = vmax.f32 %v5225_v16, 0.0  ;;  %v5235_v22 = vmax.f32 %v5227_v18, 0.0 }
 0x4b1   :  { %v5234_v24 = vmax.f32 %v5226_v19, 0.0  ;;  %v5236_v25 = vmax.f32 %v5228_v20, 0.0 }
 0x4b2   :  { %v5337_v29 = vpack.c.bf16 %v5233_v21, %v5233_v21  ;;  %v5339_v31 = vpack.c.bf16 %v5235_v22, %v5235_v22 }
 0x4b3   :  { %v5338_v26 = vpack.c.bf16 %v5234_v24, %v5234_v24  ;;  %v5340_v23 = vpack.c.bf16 %v5236_v25, %v5236_v25 }
 0x4b5   :  { %5453 = vmatprep.mubr.bf16.mxu0 %v5338_v26  ;;  %5493 = vmatprep.mubr.bf16.mxu1 %v5340_v23 }
 0x4b6   :  { %5454 = vmatmul.mubr.bf16.vlgmr.msra.gmra.mrb[12].mxu0 %v5337_v29  ;;  %5494 = vmatmul.mubr.bf16.vlgmr.msra.gmra.mrb[12].mxu1 %v5339_v31 }
 0x4cb   :  { %v6066_v33 = vpop.f32.mrb[8].mxu0 }
 0x4cc   :  { %v6088_v58 = vpop.f32.mrb[8].mxu1  ;;  %v6067_v15 = vpop.f32.mrb[9].mxu0 }
 0x4cd   :  { %v6068_v32 = vadd.f32 %v6067_v15, %v6066_v33  ;;  %v6089_v28 = vpop.f32.mrb[9].mxu1  ;;  %v6069_v34 = vpop.f32.mrb[10].mxu0 }
 0x4ce   :  { %v6090_v35 = vadd.f32 %v6089_v28, %v6088_v58  ;;  %v6091_v27 = vpop.f32.mrb[10].mxu1  ;;  %v6070_v37 = vpop.f32.mrb[11].mxu0 }
 0x4cf   :  { %v6092_v38 = vpop.f32.mrb[11].mxu1 }
 0x4d0   :  { %v5416_v39 = vadd.f32 %v6090_v35, %v6068_v32 }
 0x589   :  { %v6110_v40 = vpop.f32.mrb[12].mxu0  ;;  %v6132_v41 = vpop.f32.mrb[12].mxu1 }
 0x58a   :  { %v6111_v36 = vpop.f32.mrb[13].mxu0  ;;  %v6133_v42 = vpop.f32.mrb[13].mxu1 }
 0x58b   :  { %v6112_v44 = vadd.f32 %v6111_v36, %v6110_v40  ;;  %v6134_v45 = vadd.f32 %v6133_v42, %v6132_v41  ;;  %v6113_v46 = vpop.f32.mrb[14].mxu0  ;;  %v6135_v47 = vpop.f32.mrb[14].mxu1 }
 0x58c   :  { %v6114_v48 = vpop.f32.mrb[15].mxu0  ;;  %v6136_v49 = vpop.f32.mrb[15].mxu1 }
 0x58d   :  { %v5456_v30 = vadd.f32 %v6112_v44, %v5416_v39 }
 0x58f   :  { %v5496_v53 = vadd.f32 %v6134_v45, %v5456_v30 }
 0x591   :  { %v5508_v55 = vmul.f32 %v6048_v50, %v5496_v53 }
 0x593   :  { %v5516_v56 = vadd.f32 %v6049_v54, %v5508_v55 }
 0x595   :  { %v5517_v57 = vmax.f32 %v5516_v56, 0.0 }
 0x597   :  { %5518 = vst [vmem:[#allocation11] sm:$0xff] %v5517_v57 }
 0x598   :  { %6367 = shalt.err (!%p6364_p2)
}
 0x599   :  { %s6368_s14 = scalar_lea.hbm %s6681_s9, 128 }
 0x59a   :  { %p6369_p3 = scmp.ne.s32.totalorder %s6681_s9, %s6368_s14  ;;  %p6372_p4 = scmp.lt.u32.totalorder %s6368_s14, %s6681_s9 }
 0x59c   :  { %p6374_p5 = pnand %p6372_p4, %p6369_p3 }
 0x59e   :  { %6377 = shalt.err (!%p6374_p5)
}
 0x59f   :  { %5528 = dma.vmem_to_hbm [thread:$0]  %s5526_s11, 128, %s6681_s9, [#allocation4]  }
 0x5a0   :  { %6384 = dma.done.wait [#allocation4], 128  }
 0x5a1   :  { %6385 = vsyncadd [#allocation4], 4294967168 }
 0x5a2   :  { %5532 = vsyncpa [#allocation3], 1 }
 0x5a3   :  { %5533 = vsyncpa [#allocation6], 1 }
 0x5a4   :  { %5534 = vsyncpa [#allocation9], 1 }
 0x5a5   :  { %5535 = vsyncpa [#allocation4], 1 }

</bundles_post_ra>
